<compile_context>
chip_gen: v7x
topology: tpu7x:2x2x1
jax: 0.10.0
libtpu: 0.0.40
codegen_flags: <defaults>
</compile_context>

<pallas_src>
import functools
import math

import jax
import jax.numpy as jnp
from jax import lax
from jax.experimental import pallas as pl
from jax.experimental.pallas import tpu as pltpu  # noqa: F401  (TPU backend)

# ---------------- synthetic config (small, consistent with the module) -------
B = 2          # batch size
T = 8          # sequence length
VOCAB = 50     # vocab.word_num
E = 32         # embedding size
H = 16         # args.hidden_size
O = 2 * H      # output_size = hidden_size * 2
DK = 32        # args.dk (== output_size so the interaction transformer is dim-consistent)
LS = 4         # args.label_stm
LN_NUM = 8     # vocab.label_num
HEADS = 2      # args.multiNum
EPS = 1e-5


# ---------------- Pallas kernels ---------------------------------------------
def _sigmoid(x):
    return 1.0 / (1.0 + jnp.exp(-x))


def _encoder_kernel(x_ref, len_ref, wih_f_ref, wih_b_ref, bih_f_ref, bih_b_ref,
                    whh_f_ref, whh_b_ref, wor_ref, worb_ref, o_ref):
    """Per-sample layer_norm + fused bidirectional LSTM + WO_rnn projection.

    x_ref   : (T, B, E)   embeddings, time-major
    len_ref : (B, 1)      int32 sequence lengths (pack_padded_sequence mask)
    wih_*   : (E, 4H)     input->gates weights (transposed, PyTorch gate order i,f,g,o)
    bih_*   : (1, 4H)     b_ih + b_hh (pre-summed)
    whh_*   : (H, 4H)     hidden->gates weights (transposed)
    wor/worb: (2H, dk), (1, dk)   WO_rnn
    o_ref   : (B, T, dk)  WO_rnn(bi-LSTM output), batch-major
    """
    f32 = jnp.float32
    x = x_ref[...]
    t_len, bsz, _ = x.shape
    hid = whh_f_ref.shape[0]

    # RNN_Strim.layer_norm: each sample is normalized over ALL of its (T, E)
    # elements.  Chained single-axis means == mean over (T, E) (equal group sizes).
    mu = jnp.mean(jnp.mean(x, axis=2, keepdims=True), axis=0, keepdims=True)        # (1,B,1)
    var = jnp.mean(jnp.mean((x - mu) ** 2, axis=2, keepdims=True), axis=0, keepdims=True)
    xn = (x - mu) * lax.rsqrt(var + EPS)

    lens = len_ref[...]                                       # (B, 1) int32
    wih_f = wih_f_ref[...]
    wih_b = wih_b_ref[...]
    bih_f = bih_f_ref[...]
    bih_b = bih_b_ref[...]
    whh_f = whh_f_ref[...]
    whh_b = whh_b_ref[...]

    def cell(h_prev, c_prev, xg, whh):
        gates = xg + jnp.dot(h_prev, whh, preferred_element_type=f32)    # (B, 4H)
        i_g = _sigmoid(gates[:, 0 * hid:1 * hid])             # PyTorch gate order: i, f, g, o
        f_g = _sigmoid(gates[:, 1 * hid:2 * hid])
        g_g = jnp.tanh(gates[:, 2 * hid:3 * hid])
        o_g = _sigmoid(gates[:, 3 * hid:4 * hid])
        c_new = f_g * c_prev + i_g * g_g
        h_new = o_g * jnp.tanh(c_new)
        return h_new, c_new

    zeros = jnp.zeros((bsz, hid), f32)
    h_f, c_f, h_b, c_b = zeros, zeros, zeros, zeros
    out_f = [None] * t_len
    out_b = [None] * t_len

    # Fully-unrolled recurrence: a single kernel launch instead of grid=(T,) x 2
    # directions.  The backward stream walks original time index T-1-t directly.
    for t in range(t_len):
        # forward direction, time t
        xg = jnp.dot(xn[t], wih_f, preferred_element_type=f32) + bih_f
        h_new, c_new = cell(h_f, c_f, xg, whh_f)
        m = (lens > t).astype(f32)                            # (B, 1) packed-sequence mask
        h_f = m * h_new + (1.0 - m) * h_f
        c_f = m * c_new + (1.0 - m) * c_f
        out_f[t] = m * h_new                                  # pad steps emit zeros

        # backward direction, time T-1-t
        tb = t_len - 1 - t
        xg_b = jnp.dot(xn[tb], wih_b, preferred_element_type=f32) + bih_b
        hb_new, cb_new = cell(h_b, c_b, xg_b, whh_b)
        mb = (lens > tb).astype(f32)
        h_b = mb * hb_new + (1.0 - mb) * h_b
        c_b = mb * cb_new + (1.0 - mb) * c_b
        out_b[tb] = mb * hb_new

    # concat directions per batch row and fuse the WO_rnn projection.
    wor = wor_ref[...]
    worb = worb_ref[...]
    for b in range(bsz):
        fwd_b = jnp.concatenate([out_f[t][b:b + 1, :] for t in range(t_len)], axis=0)   # (T, H)
        bwd_b = jnp.concatenate([out_b[t][b:b + 1, :] for t in range(t_len)], axis=0)   # (T, H)
        rnn_b = jnp.concatenate([fwd_b, bwd_b], axis=-1)                                # (T, 2H)
        o_ref[b] = jnp.dot(rnn_b, wor, preferred_element_type=f32) + worb               # (T, dk)


def _head_kernel(rnn_ref, qx_ref, labd_ref, wos_ref, bos_ref, ln1g_ref, ln1b_ref,
                 wq_ref, bq_ref, wkv_ref, bkv_ref, wo_ref, bo_ref,
                 lnag_ref, lnab_ref, w1_ref, b1_ref, w2_ref, b2_ref,
                 lnbg_ref, lnbb_ref, tw_ref, tb_ref, o_ref, *, heads, dkh):
    """Label-stream attention + interaction transformer + label logits, fused."""
    f32 = jnp.float32

    def softmax(s):
        s = s - jnp.max(s, axis=-1, keepdims=True)
        e = jnp.exp(s)
        return e * pl.reciprocal(jnp.sum(e, axis=-1, keepdims=True), approx=True)

    def layernorm(v, g, b):
        mu = jnp.mean(v, axis=-1, keepdims=True)
        var = jnp.mean((v - mu) ** 2, axis=-1, keepdims=True)
        return (v - mu) * lax.rsqrt(var + EPS) * g + b

    qx = qx_ref[...]                                          # (Ls, dk)

    # label-stream attention: alpha = softmax(qx @ kx^T), z = alpha @ kx
    kx = jnp.dot(labd_ref[...], wos_ref[...], preferred_element_type=f32) + bos_ref[...]  # (Ln, dk)
    alpha = softmax(lax.dot_general(qx, kx, (((1,), (1,)), ((), ())),
                                    preferred_element_type=f32))                          # (Ls, Ln)
    z = jnp.dot(alpha, kx, preferred_element_type=f32)
    lab = layernorm(qx + z, ln1g_ref[...], ln1b_ref[...])     # (Ls, dk) == label_strim

    # TODO(synk): TransformerLayers_PostLN source not provided; implemented as a
    # standard 1-layer post-LN multi-head cross-attention block + FFN, returning
    # the query stream (== att[0] in the original forward).
    rnn = rnn_ref[...]                                        # (B, T, dk) == WO_rnn(rnn_output)
    bsz = rnn.shape[0]
    ls = qx.shape[0]
    scale = 1.0 / math.sqrt(dkh)

    qh = jnp.dot(lab, wq_ref[...], preferred_element_type=f32) + bq_ref[...]   # (Ls, heads*dkh)
    wkv = wkv_ref[...]
    bkv = bkv_ref[...]
    z_rows = []
    for b in range(bsz):                                      # static loops inside ONE launch
        kv_b = jnp.dot(rnn[b], wkv, preferred_element_type=f32) + bkv          # (T, 2*heads*dkh)
        heads_out = []
        for h in range(heads):
            q_h = qh[:, h * dkh:(h + 1) * dkh]
            k_h = kv_b[:, (2 * h) * dkh:(2 * h + 1) * dkh]
            v_h = kv_b[:, (2 * h + 1) * dkh:(2 * h + 2) * dkh]
            s = lax.dot_general(q_h, k_h, (((1,), (1,)), ((), ())),
                                preferred_element_type=f32) * scale            # (Ls, T)
            heads_out.append(jnp.dot(softmax(s), v_h, preferred_element_type=f32))
        z_rows.append(jnp.concatenate(heads_out, axis=-1))                     # (Ls, heads*dkh)
    z_all = jnp.concatenate(z_rows, axis=0)                                    # (B*Ls, heads*dkh)

    proj = jnp.dot(z_all, wo_ref[...], preferred_element_type=f32) + bo_ref[...]   # (B*Ls, dk)
    lab_rep = jnp.concatenate([lab] * bsz, axis=0)                                  # (B*Ls, dk)
    x1 = layernorm(lab_rep + proj, lnag_ref[...], lnab_ref[...])
    ffn = jnp.maximum(jnp.dot(x1, w1_ref[...], preferred_element_type=f32) + b1_ref[...], 0.0)
    ffn = jnp.dot(ffn, w2_ref[...], preferred_element_type=f32) + b2_ref[...]
    att = layernorm(x1 + ffn, lnbg_ref[...], lnbb_ref[...])                         # (B*Ls, dk)

    # att <- alpha^T @ att ; logits = third_w.mul(att).sum(-1) + third_b
    # (sum_l alpha[l,n] * (att_b[l,:] . tw[n,:]) == tw.mul(alpha^T @ att_b).sum(-1))
    tw = tw_ref[...]                                          # (Ln, dk)
    rows = []
    for b in range(bsz):
        att_b = att[b * ls:(b + 1) * ls, :]                                         # (Ls, dk)
        m_b = lax.dot_general(att_b, tw, (((1,), (1,)), ((), ())),
                              preferred_element_type=f32)                           # (Ls, Ln)
        rows.append(jnp.sum(alpha * m_b, axis=0, keepdims=True))                    # (1, Ln)
    o_ref[...] = jnp.concatenate(rows, axis=0) + tb_ref[...]                        # (B, Ln)


# ---------------- parameters --------------------------------------------------
def init_params(key):
    keys = iter(jax.random.split(key, 64))

    def rnd(shape, scale=0.1):
        return jax.random.normal(next(keys), shape, dtype=jnp.float32) * scale

    p = {}
    # TODO(synk): EmbeddingLayer source not provided; a plain trainable table is used.
    p['embedding'] = rnd((VOCAB, E), 1.0)
    # bidirectional single-layer LSTM (PyTorch layout: weight_ih (4H,in), weight_hh (4H,H))
    for d in ('f', 'b'):
        p[f'w_ih_{d}'] = rnd((4 * H, E))
        p[f'w_hh_{d}'] = rnd((4 * H, H))
        p[f'b_ih_{d}'] = rnd((4 * H,))
        p[f'b_hh_{d}'] = rnd((4 * H,))
    p['labDescVec'] = rnd((1, LN_NUM, O), 1.0)     # pickle-loaded in the original; synthesized here
    p['label_strim'] = rnd((1, LS, DK), 1.0)
    p['W_os_w'] = rnd((DK, O)); p['W_os_b'] = rnd((DK,))
    p['WO_rnn_w'] = rnd((DK, O)); p['WO_rnn_b'] = rnd((DK,))
    p['ln1_g'] = jnp.ones((DK,), jnp.float32); p['ln1_b'] = jnp.zeros((DK,), jnp.float32)
    # transformer_interaction (1 post-LN layer, HEADS heads, per-head dim DK, feaSize == DK)
    tr = {}
    tr['WQ'] = rnd((HEADS, DK, DK)); tr['bQ'] = rnd((HEADS, DK))
    tr['WK'] = rnd((HEADS, DK, DK)); tr['bK'] = rnd((HEADS, DK))
    tr['WV'] = rnd((HEADS, DK, DK)); tr['bV'] = rnd((HEADS, DK))
    tr['WO_w'] = rnd((DK, HEADS * DK)); tr['WO_b'] = rnd((DK,))
    tr['lnA_g'] = jnp.ones((DK,), jnp.float32); tr['lnA_b'] = jnp.zeros((DK,), jnp.float32)
    tr['W1'] = rnd((4 * DK, DK)); tr['b1'] = rnd((4 * DK,))
    tr['W2'] = rnd((DK, 4 * DK)); tr['b2'] = rnd((DK,))
    tr['lnB_g'] = jnp.ones((DK,), jnp.float32); tr['lnB_b'] = jnp.zeros((DK,), jnp.float32)
    p['tr'] = tr
    p['third_w'] = rnd((LN_NUM, DK)); p['third_b'] = rnd((LN_NUM,))
    return p


def pack_params(p):
    """One-time repack of torch-layout parameters into kernel-ready layouts:
    weights pre-transposed, per-head Q/K/V packed into lane-dense matrices,
    LSTM biases (b_ih + b_hh) pre-summed."""
    pp = {'embedding': p['embedding']}
    for d in ('f', 'b'):
        pp[f'wih_{d}'] = p[f'w_ih_{d}'].T                               # (E, 4H)
        pp[f'whh_{d}'] = p[f'w_hh_{d}'].T                               # (H, 4H)
        pp[f'bih_{d}'] = (p[f'b_ih_{d}'] + p[f'b_hh_{d}']).reshape(1, -1)
    pp['wor'] = p['WO_rnn_w'].T                                         # (2H, dk)
    pp['worb'] = p['WO_rnn_b'].reshape(1, -1)
    pp['qx'] = p['label_strim'][0]                                      # (Ls, dk)
    pp['labd'] = p['labDescVec'][0]                                     # (Ln, 2H)
    pp['wos'] = p['W_os_w'].T; pp['bos'] = p['W_os_b'].reshape(1, -1)
    pp['ln1g'] = p['ln1_g'].reshape(1, -1); pp['ln1b'] = p['ln1_b'].reshape(1, -1)
    tr = p['tr']
    pp['wq'] = jnp.concatenate([tr['WQ'][h].T for h in range(HEADS)], axis=1)       # (dk, heads*dk)
    pp['bq'] = jnp.concatenate([tr['bQ'][h] for h in range(HEADS)]).reshape(1, -1)
    wkv_cols, bkv_cols = [], []
    for h in range(HEADS):                               # column order: [K_h, V_h] per head
        wkv_cols += [tr['WK'][h].T, tr['WV'][h].T]
        bkv_cols += [tr['bK'][h], tr['bV'][h]]
    pp['wkv'] = jnp.concatenate(wkv_cols, axis=1)                                   # (dk, 2*heads*dk)
    pp['bkv'] = jnp.concatenate(bkv_cols).reshape(1, -1)
    pp['wo'] = tr['WO_w'].T; pp['bo'] = tr['WO_b'].reshape(1, -1)
    pp['lnAg'] = tr['lnA_g'].reshape(1, -1); pp['lnAb'] = tr['lnA_b'].reshape(1, -1)
    pp['w1'] = tr['W1'].T; pp['b1'] = tr['b1'].reshape(1, -1)
    pp['w2'] = tr['W2'].T; pp['b2'] = tr['b2'].reshape(1, -1)
    pp['lnBg'] = tr['lnB_g'].reshape(1, -1); pp['lnBb'] = tr['lnB_b'].reshape(1, -1)
    pp['tw'] = p['third_w']; pp['tb'] = p['third_b'].reshape(1, -1)
    return pp


# ---------------- model forward ------------------------------------------------
def forward(pp, input_ids, lengths):
    bsz, t_len = input_ids.shape
    dk = pp['wor'].shape[1]
    ln_num = pp['tw'].shape[0]

    # Embedding lookup (XLA gather, glue).  The ids are transposed so the gather
    # directly yields a time-major (T, B, E) tensor (no transpose of the big tensor).
    embeds = jnp.take(pp['embedding'], input_ids.T, axis=0)
    lens2d = lengths.reshape(bsz, 1).astype(jnp.int32)

    # Kernel 1: per-sample layer_norm + fused bidirectional LSTM + WO_rnn.
    rnn_proj = pl.pallas_call(
        _encoder_kernel,
        out_shape=jax.ShapeDtypeStruct((bsz, t_len, dk), jnp.float32),
    )(embeds, lens2d, pp['wih_f'], pp['wih_b'], pp['bih_f'], pp['bih_b'],
      pp['whh_f'], pp['whh_b'], pp['wor'], pp['worb'])

    # Kernel 2: label-stream attention + interaction transformer + label logits.
    head = functools.partial(_head_kernel, heads=HEADS, dkh=DK)
    logits = pl.pallas_call(
        head,
        out_shape=jax.ShapeDtypeStruct((bsz, ln_num), jnp.float32),
    )(rnn_proj, pp['qx'], pp['labd'], pp['wos'], pp['bos'], pp['ln1g'], pp['ln1b'],
      pp['wq'], pp['bq'], pp['wkv'], pp['bkv'], pp['wo'], pp['bo'],
      pp['lnAg'], pp['lnAb'], pp['w1'], pp['b1'], pp['w2'], pp['b2'],
      pp['lnBg'], pp['lnBb'], pp['tw'], pp['tb'])
    return logits


if __name__ == "__main__":
    key = jax.random.PRNGKey(0)
    pkey, dkey = jax.random.split(key)
    params = init_params(pkey)
    pp = pack_params(params)
    input_ids = jax.random.randint(dkey, (B, T), 0, VOCAB, dtype=jnp.int32)
    lengths = jnp.array([T, T - 2], dtype=jnp.int32)   # pack_padded_sequence lengths
    fwd = jax.jit(forward)
    logits = fwd(pp, input_ids, lengths)
    jax.block_until_ready(logits)
    assert logits.shape == (B, LN_NUM), logits.shape
    assert bool(jnp.all(jnp.isfinite(logits)))
    print("KERNEL_OK")
</pallas_src>

<mosaic_0001>
module attributes {stable_mosaic.version = 11 : i64} {
  func.func @_encoder_kernel(%arg0: memref<8x2x32xf32, #tpu.memory_space<vmem>>, %arg1: memref<2x1xi32, #tpu.memory_space<vmem>>, %arg2: memref<32x64xf32, #tpu.memory_space<vmem>>, %arg3: memref<32x64xf32, #tpu.memory_space<vmem>>, %arg4: memref<1x64xf32, #tpu.memory_space<vmem>>, %arg5: memref<1x64xf32, #tpu.memory_space<vmem>>, %arg6: memref<16x64xf32, #tpu.memory_space<vmem>>, %arg7: memref<16x64xf32, #tpu.memory_space<vmem>>, %arg8: memref<32x32xf32, #tpu.memory_space<vmem>>, %arg9: memref<1x32xf32, #tpu.memory_space<vmem>>, %arg10: memref<2x8x32xf32, #tpu.memory_space<vmem>>) attributes {dimension_semantics = [], scalar_prefetch = 0 : i64, scratch_operands = 0 : i64, tpu.core_type = #tpu.core_type<tc>} {
    %c0 = arith.constant 0 : index
    %c0_0 = arith.constant 0 : index
    %c0_1 = arith.constant 0 : index
    %0 = vector.load %arg0[%c0, %c0_0, %c0_1] : memref<8x2x32xf32, #tpu.memory_space<vmem>>, vector<8x2x32xf32>
    %cst = arith.constant dense<0.000000e+00> : vector<8x2xf32>
    %1 = vector.multi_reduction <add>, %0, %cst [2] : vector<8x2x32xf32> to vector<8x2xf32>
    %2 = vector.shape_cast %1 : vector<8x2xf32> to vector<8x2x1xf32>
    %cst_2 = arith.constant 3.200000e+01 : f32
    %3 = vector.broadcast %cst_2 : f32 to vector<8x2x1xf32>
    %4 = arith.divf %2, %3 : vector<8x2x1xf32>
    %cst_3 = arith.constant dense<0.000000e+00> : vector<2x1xf32>
    %5 = vector.multi_reduction <add>, %4, %cst_3 [0] : vector<8x2x1xf32> to vector<2x1xf32>
    %6 = vector.shape_cast %5 : vector<2x1xf32> to vector<1x2x1xf32>
    %cst_4 = arith.constant 8.000000e+00 : f32
    %7 = vector.broadcast %cst_4 : f32 to vector<1x2x1xf32>
    %8 = arith.divf %6, %7 : vector<1x2x1xf32>
    %9 = vector.broadcast %8 : vector<1x2x1xf32> to vector<8x2x32xf32>
    %10 = arith.subf %0, %9 : vector<8x2x32xf32>
    %11 = arith.mulf %10, %10 : vector<8x2x32xf32>
    %cst_5 = arith.constant dense<0.000000e+00> : vector<8x2xf32>
    %12 = vector.multi_reduction <add>, %11, %cst_5 [2] : vector<8x2x32xf32> to vector<8x2xf32>
    %13 = vector.shape_cast %12 : vector<8x2xf32> to vector<8x2x1xf32>
    %cst_6 = arith.constant 3.200000e+01 : f32
    %14 = vector.broadcast %cst_6 : f32 to vector<8x2x1xf32>
    %15 = arith.divf %13, %14 : vector<8x2x1xf32>
    %cst_7 = arith.constant dense<0.000000e+00> : vector<2x1xf32>
    %16 = vector.multi_reduction <add>, %15, %cst_7 [0] : vector<8x2x1xf32> to vector<2x1xf32>
    %17 = vector.shape_cast %16 : vector<2x1xf32> to vector<1x2x1xf32>
    %cst_8 = arith.constant 8.000000e+00 : f32
    %18 = vector.broadcast %cst_8 : f32 to vector<1x2x1xf32>
    %19 = arith.divf %17, %18 : vector<1x2x1xf32>
    %20 = vector.broadcast %8 : vector<1x2x1xf32> to vector<8x2x32xf32>
    %21 = arith.subf %0, %20 : vector<8x2x32xf32>
    %cst_9 = arith.constant 9.99999974E-6 : f32
    %22 = vector.broadcast %cst_9 : f32 to vector<1x2x1xf32>
    %23 = arith.addf %19, %22 : vector<1x2x1xf32>
    %24 = math.rsqrt %23 : vector<1x2x1xf32>
    %25 = vector.broadcast %24 : vector<1x2x1xf32> to vector<8x2x32xf32>
    %26 = arith.mulf %21, %25 : vector<8x2x32xf32>
    %c0_10 = arith.constant 0 : index
    %c0_11 = arith.constant 0 : index
    %27 = vector.load %arg1[%c0_10, %c0_11] : memref<2x1xi32, #tpu.memory_space<vmem>>, vector<2x1xi32>
    %c0_12 = arith.constant 0 : index
    %c0_13 = arith.constant 0 : index
    %28 = vector.load %arg2[%c0_12, %c0_13] : memref<32x64xf32, #tpu.memory_space<vmem>>, vector<32x64xf32>
    %c0_14 = arith.constant 0 : index
    %c0_15 = arith.constant 0 : index
    %29 = vector.load %arg3[%c0_14, %c0_15] : memref<32x64xf32, #tpu.memory_space<vmem>>, vector<32x64xf32>
    %c0_16 = arith.constant 0 : index
    %c0_17 = arith.constant 0 : index
    %30 = vector.load %arg4[%c0_16, %c0_17] : memref<1x64xf32, #tpu.memory_space<vmem>>, vector<1x64xf32>
    %c0_18 = arith.constant 0 : index
    %c0_19 = arith.constant 0 : index
    %31 = vector.load %arg5[%c0_18, %c0_19] : memref<1x64xf32, #tpu.memory_space<vmem>>, vector<1x64xf32>
    %c0_20 = arith.constant 0 : index
    %c0_21 = arith.constant 0 : index
    %32 = vector.load %arg6[%c0_20, %c0_21] : memref<16x64xf32, #tpu.memory_space<vmem>>, vector<16x64xf32>
    %c0_22 = arith.constant 0 : index
    %c0_23 = arith.constant 0 : index
    %33 = vector.load %arg7[%c0_22, %c0_23] : memref<16x64xf32, #tpu.memory_space<vmem>>, vector<16x64xf32>
    %cst_24 = arith.constant 0.000000e+00 : f32
    %34 = vector.broadcast %cst_24 : f32 to vector<2x16xf32>
    %35 = vector.extract_strided_slice %26 {offsets = [0, 0, 0], sizes = [1, 2, 32], strides = [1, 1, 1]} : vector<8x2x32xf32> to vector<1x2x32xf32>
    %36 = vector.shape_cast %35 : vector<1x2x32xf32> to vector<2x32xf32>
    %cst_25 = arith.constant dense<0.000000e+00> : vector<2x64xf32>
    %37 = tpu.matmul %36, %28, %cst_25 {dimension_numbers = #tpu.dot_dimension_numbers<[1], [0], [0], [1], [0, 0, 1, 1], [], []>} : vector<2x32xf32>, vector<32x64xf32>, vector<2x64xf32> -> vector<2x64xf32>
    %38 = vector.broadcast %30 : vector<1x64xf32> to vector<2x64xf32>
    %39 = arith.addf %37, %38 : vector<2x64xf32>
    %cst_26 = arith.constant dense<0.000000e+00> : vector<2x64xf32>
    %40 = tpu.matmul %34, %32, %cst_26 {dimension_numbers = #tpu.dot_dimension_numbers<[1], [0], [0], [1], [0, 0, 1, 1], [], []>} : vector<2x16xf32>, vector<16x64xf32>, vector<2x64xf32> -> vector<2x64xf32>
    %41 = arith.addf %39, %40 : vector<2x64xf32>
    %42 = vector.extract_strided_slice %41 {offsets = [0, 0], sizes = [2, 16], strides = [1, 1]} : vector<2x64xf32> to vector<2x16xf32>
    %cst_27 = arith.constant 0.000000e+00 : f32
    %43 = vector.broadcast %cst_27 : f32 to vector<2x16xf32>
    %44 = arith.subf %43, %42 : vector<2x16xf32>
    %45 = math.exp %44 : vector<2x16xf32>
    %cst_28 = arith.constant 1.000000e+00 : f32
    %46 = vector.broadcast %cst_28 : f32 to vector<2x16xf32>
    %47 = arith.addf %46, %45 : vector<2x16xf32>
    %cst_29 = arith.constant 1.000000e+00 : f32
    %48 = vector.broadcast %cst_29 : f32 to vector<2x16xf32>
    %49 = arith.divf %48, %47 : vector<2x16xf32>
    %50 = vector.extract_strided_slice %41 {offsets = [0, 16], sizes = [2, 16], strides = [1, 1]} : vector<2x64xf32> to vector<2x16xf32>
    %cst_30 = arith.constant 0.000000e+00 : f32
    %51 = vector.broadcast %cst_30 : f32 to vector<2x16xf32>
    %52 = arith.subf %51, %50 : vector<2x16xf32>
    %53 = math.exp %52 : vector<2x16xf32>
    %cst_31 = arith.constant 1.000000e+00 : f32
    %54 = vector.broadcast %cst_31 : f32 to vector<2x16xf32>
    %55 = arith.addf %54, %53 : vector<2x16xf32>
    %cst_32 = arith.constant 1.000000e+00 : f32
    %56 = vector.broadcast %cst_32 : f32 to vector<2x16xf32>
    %57 = arith.divf %56, %55 : vector<2x16xf32>
    %58 = vector.extract_strided_slice %41 {offsets = [0, 32], sizes = [2, 16], strides = [1, 1]} : vector<2x64xf32> to vector<2x16xf32>
    %59 = math.tanh %58 : vector<2x16xf32>
    %60 = vector.extract_strided_slice %41 {offsets = [0, 48], sizes = [2, 16], strides = [1, 1]} : vector<2x64xf32> to vector<2x16xf32>
    %cst_33 = arith.constant 0.000000e+00 : f32
    %61 = vector.broadcast %cst_33 : f32 to vector<2x16xf32>
    %62 = arith.subf %61, %60 : vector<2x16xf32>
    %63 = math.exp %62 : vector<2x16xf32>
    %cst_34 = arith.constant 1.000000e+00 : f32
    %64 = vector.broadcast %cst_34 : f32 to vector<2x16xf32>
    %65 = arith.addf %64, %63 : vector<2x16xf32>
    %cst_35 = arith.constant 1.000000e+00 : f32
    %66 = vector.broadcast %cst_35 : f32 to vector<2x16xf32>
    %67 = arith.divf %66, %65 : vector<2x16xf32>
    %68 = arith.mulf %57, %34 : vector<2x16xf32>
    %69 = arith.mulf %49, %59 : vector<2x16xf32>
    %70 = arith.addf %68, %69 : vector<2x16xf32>
    %71 = math.tanh %70 : vector<2x16xf32>
    %72 = arith.mulf %67, %71 : vector<2x16xf32>
    %c0_i32 = arith.constant 0 : i32
    %73 = vector.broadcast %c0_i32 : i32 to vector<2x1xi32>
    %74 = arith.cmpi sgt, %27, %73 : vector<2x1xi32>
    %75 = arith.extui %74 : vector<2x1xi1> to vector<2x1xi32>
    %76 = arith.sitofp %75 : vector<2x1xi32> to vector<2x1xf32>
    %77 = vector.broadcast %76 : vector<2x1xf32> to vector<2x16xf32>
    %78 = arith.mulf %77, %72 : vector<2x16xf32>
    %cst_36 = arith.constant 1.000000e+00 : f32
    %79 = vector.broadcast %cst_36 : f32 to vector<2x1xf32>
    %80 = arith.subf %79, %76 : vector<2x1xf32>
    %81 = vector.broadcast %80 : vector<2x1xf32> to vector<2x16xf32>
    %82 = arith.mulf %81, %34 : vector<2x16xf32>
    %83 = arith.addf %78, %82 : vector<2x16xf32>
    %84 = vector.broadcast %76 : vector<2x1xf32> to vector<2x16xf32>
    %85 = arith.mulf %84, %70 : vector<2x16xf32>
    %cst_37 = arith.constant 1.000000e+00 : f32
    %86 = vector.broadcast %cst_37 : f32 to vector<2x1xf32>
    %87 = arith.subf %86, %76 : vector<2x1xf32>
    %88 = vector.broadcast %87 : vector<2x1xf32> to vector<2x16xf32>
    %89 = arith.mulf %88, %34 : vector<2x16xf32>
    %90 = arith.addf %85, %89 : vector<2x16xf32>
    %91 = vector.broadcast %76 : vector<2x1xf32> to vector<2x16xf32>
    %92 = arith.mulf %91, %72 : vector<2x16xf32>
    %93 = vector.extract_strided_slice %26 {offsets = [7, 0, 0], sizes = [1, 2, 32], strides = [1, 1, 1]} : vector<8x2x32xf32> to vector<1x2x32xf32>
    %94 = vector.shape_cast %93 : vector<1x2x32xf32> to vector<2x32xf32>
    %cst_38 = arith.constant dense<0.000000e+00> : vector<2x64xf32>
    %95 = tpu.matmul %94, %29, %cst_38 {dimension_numbers = #tpu.dot_dimension_numbers<[1], [0], [0], [1], [0, 0, 1, 1], [], []>} : vector<2x32xf32>, vector<32x64xf32>, vector<2x64xf32> -> vector<2x64xf32>
    %96 = vector.broadcast %31 : vector<1x64xf32> to vector<2x64xf32>
    %97 = arith.addf %95, %96 : vector<2x64xf32>
    %cst_39 = arith.constant dense<0.000000e+00> : vector<2x64xf32>
    %98 = tpu.matmul %34, %33, %cst_39 {dimension_numbers = #tpu.dot_dimension_numbers<[1], [0], [0], [1], [0, 0, 1, 1], [], []>} : vector<2x16xf32>, vector<16x64xf32>, vector<2x64xf32> -> vector<2x64xf32>
    %99 = arith.addf %97, %98 : vector<2x64xf32>
    %100 = vector.extract_strided_slice %99 {offsets = [0, 0], sizes = [2, 16], strides = [1, 1]} : vector<2x64xf32> to vector<2x16xf32>
    %cst_40 = arith.constant 0.000000e+00 : f32
    %101 = vector.broadcast %cst_40 : f32 to vector<2x16xf32>
    %102 = arith.subf %101, %100 : vector<2x16xf32>
    %103 = math.exp %102 : vector<2x16xf32>
    %cst_41 = arith.constant 1.000000e+00 : f32
    %104 = vector.broadcast %cst_41 : f32 to vector<2x16xf32>
    %105 = arith.addf %104, %103 : vector<2x16xf32>
    %cst_42 = arith.constant 1.000000e+00 : f32
    %106 = vector.broadcast %cst_42 : f32 to vector<2x16xf32>
    %107 = arith.divf %106, %105 : vector<2x16xf32>
    %108 = vector.extract_strided_slice %99 {offsets = [0, 16], sizes = [2, 16], strides = [1, 1]} : vector<2x64xf32> to vector<2x16xf32>
    %cst_43 = arith.constant 0.000000e+00 : f32
    %109 = vector.broadcast %cst_43 : f32 to vector<2x16xf32>
    %110 = arith.subf %109, %108 : vector<2x16xf32>
    %111 = math.exp %110 : vector<2x16xf32>
    %cst_44 = arith.constant 1.000000e+00 : f32
    %112 = vector.broadcast %cst_44 : f32 to vector<2x16xf32>
    %113 = arith.addf %112, %111 : vector<2x16xf32>
    %cst_45 = arith.constant 1.000000e+00 : f32
    %114 = vector.broadcast %cst_45 : f32 to vector<2x16xf32>
    %115 = arith.divf %114, %113 : vector<2x16xf32>
    %116 = vector.extract_strided_slice %99 {offsets = [0, 32], sizes = [2, 16], strides = [1, 1]} : vector<2x64xf32> to vector<2x16xf32>
    %117 = math.tanh %116 : vector<2x16xf32>
    %118 = vector.extract_strided_slice %99 {offsets = [0, 48], sizes = [2, 16], strides = [1, 1]} : vector<2x64xf32> to vector<2x16xf32>
    %cst_46 = arith.constant 0.000000e+00 : f32
    %119 = vector.broadcast %cst_46 : f32 to vector<2x16xf32>
    %120 = arith.subf %119, %118 : vector<2x16xf32>
    %121 = math.exp %120 : vector<2x16xf32>
    %cst_47 = arith.constant 1.000000e+00 : f32
    %122 = vector.broadcast %cst_47 : f32 to vector<2x16xf32>
    %123 = arith.addf %122, %121 : vector<2x16xf32>
    %cst_48 = arith.constant 1.000000e+00 : f32
    %124 = vector.broadcast %cst_48 : f32 to vector<2x16xf32>
    %125 = arith.divf %124, %123 : vector<2x16xf32>
    %126 = arith.mulf %115, %34 : vector<2x16xf32>
    %127 = arith.mulf %107, %117 : vector<2x16xf32>
    %128 = arith.addf %126, %127 : vector<2x16xf32>
    %129 = math.tanh %128 : vector<2x16xf32>
    %130 = arith.mulf %125, %129 : vector<2x16xf32>
    %c7_i32 = arith.constant 7 : i32
    %131 = vector.broadcast %c7_i32 : i32 to vector<2x1xi32>
    %132 = arith.cmpi sgt, %27, %131 : vector<2x1xi32>
    %133 = arith.extui %132 : vector<2x1xi1> to vector<2x1xi32>
    %134 = arith.sitofp %133 : vector<2x1xi32> to vector<2x1xf32>
    %135 = vector.broadcast %134 : vector<2x1xf32> to vector<2x16xf32>
    %136 = arith.mulf %135, %130 : vector<2x16xf32>
    %cst_49 = arith.constant 1.000000e+00 : f32
    %137 = vector.broadcast %cst_49 : f32 to vector<2x1xf32>
    %138 = arith.subf %137, %134 : vector<2x1xf32>
    %139 = vector.broadcast %138 : vector<2x1xf32> to vector<2x16xf32>
    %140 = arith.mulf %139, %34 : vector<2x16xf32>
    %141 = arith.addf %136, %140 : vector<2x16xf32>
    %142 = vector.broadcast %134 : vector<2x1xf32> to vector<2x16xf32>
    %143 = arith.mulf %142, %128 : vector<2x16xf32>
    %cst_50 = arith.constant 1.000000e+00 : f32
    %144 = vector.broadcast %cst_50 : f32 to vector<2x1xf32>
    %145 = arith.subf %144, %134 : vector<2x1xf32>
    %146 = vector.broadcast %145 : vector<2x1xf32> to vector<2x16xf32>
    %147 = arith.mulf %146, %34 : vector<2x16xf32>
    %148 = arith.addf %143, %147 : vector<2x16xf32>
    %149 = vector.broadcast %134 : vector<2x1xf32> to vector<2x16xf32>
    %150 = arith.mulf %149, %130 : vector<2x16xf32>
    %151 = vector.extract_strided_slice %26 {offsets = [1, 0, 0], sizes = [1, 2, 32], strides = [1, 1, 1]} : vector<8x2x32xf32> to vector<1x2x32xf32>
    %152 = vector.shape_cast %151 : vector<1x2x32xf32> to vector<2x32xf32>
    %cst_51 = arith.constant dense<0.000000e+00> : vector<2x64xf32>
    %153 = tpu.matmul %152, %28, %cst_51 {dimension_numbers = #tpu.dot_dimension_numbers<[1], [0], [0], [1], [0, 0, 1, 1], [], []>} : vector<2x32xf32>, vector<32x64xf32>, vector<2x64xf32> -> vector<2x64xf32>
    %154 = vector.broadcast %30 : vector<1x64xf32> to vector<2x64xf32>
    %155 = arith.addf %153, %154 : vector<2x64xf32>
    %cst_52 = arith.constant dense<0.000000e+00> : vector<2x64xf32>
    %156 = tpu.matmul %83, %32, %cst_52 {dimension_numbers = #tpu.dot_dimension_numbers<[1], [0], [0], [1], [0, 0, 1, 1], [], []>} : vector<2x16xf32>, vector<16x64xf32>, vector<2x64xf32> -> vector<2x64xf32>
    %157 = arith.addf %155, %156 : vector<2x64xf32>
    %158 = vector.extract_strided_slice %157 {offsets = [0, 0], sizes = [2, 16], strides = [1, 1]} : vector<2x64xf32> to vector<2x16xf32>
    %cst_53 = arith.constant 0.000000e+00 : f32
    %159 = vector.broadcast %cst_53 : f32 to vector<2x16xf32>
    %160 = arith.subf %159, %158 : vector<2x16xf32>
    %161 = math.exp %160 : vector<2x16xf32>
    %cst_54 = arith.constant 1.000000e+00 : f32
    %162 = vector.broadcast %cst_54 : f32 to vector<2x16xf32>
    %163 = arith.addf %162, %161 : vector<2x16xf32>
    %cst_55 = arith.constant 1.000000e+00 : f32
    %164 = vector.broadcast %cst_55 : f32 to vector<2x16xf32>
    %165 = arith.divf %164, %163 : vector<2x16xf32>
    %166 = vector.extract_strided_slice %157 {offsets = [0, 16], sizes = [2, 16], strides = [1, 1]} : vector<2x64xf32> to vector<2x16xf32>
    %cst_56 = arith.constant 0.000000e+00 : f32
    %167 = vector.broadcast %cst_56 : f32 to vector<2x16xf32>
    %168 = arith.subf %167, %166 : vector<2x16xf32>
    %169 = math.exp %168 : vector<2x16xf32>
    %cst_57 = arith.constant 1.000000e+00 : f32
    %170 = vector.broadcast %cst_57 : f32 to vector<2x16xf32>
    %171 = arith.addf %170, %169 : vector<2x16xf32>
    %cst_58 = arith.constant 1.000000e+00 : f32
    %172 = vector.broadcast %cst_58 : f32 to vector<2x16xf32>
    %173 = arith.divf %172, %171 : vector<2x16xf32>
    %174 = vector.extract_strided_slice %157 {offsets = [0, 32], sizes = [2, 16], strides = [1, 1]} : vector<2x64xf32> to vector<2x16xf32>
    %175 = math.tanh %174 : vector<2x16xf32>
    %176 = vector.extract_strided_slice %157 {offsets = [0, 48], sizes = [2, 16], strides = [1, 1]} : vector<2x64xf32> to vector<2x16xf32>
    %cst_59 = arith.constant 0.000000e+00 : f32
    %177 = vector.broadcast %cst_59 : f32 to vector<2x16xf32>
    %178 = arith.subf %177, %176 : vector<2x16xf32>
    %179 = math.exp %178 : vector<2x16xf32>
    %cst_60 = arith.constant 1.000000e+00 : f32
    %180 = vector.broadcast %cst_60 : f32 to vector<2x16xf32>
    %181 = arith.addf %180, %179 : vector<2x16xf32>
    %cst_61 = arith.constant 1.000000e+00 : f32
    %182 = vector.broadcast %cst_61 : f32 to vector<2x16xf32>
    %183 = arith.divf %182, %181 : vector<2x16xf32>
    %184 = arith.mulf %173, %90 : vector<2x16xf32>
    %185 = arith.mulf %165, %175 : vector<2x16xf32>
    %186 = arith.addf %184, %185 : vector<2x16xf32>
    %187 = math.tanh %186 : vector<2x16xf32>
    %188 = arith.mulf %183, %187 : vector<2x16xf32>
    %c1_i32 = arith.constant 1 : i32
    %189 = vector.broadcast %c1_i32 : i32 to vector<2x1xi32>
    %190 = arith.cmpi sgt, %27, %189 : vector<2x1xi32>
    %191 = arith.extui %190 : vector<2x1xi1> to vector<2x1xi32>
    %192 = arith.sitofp %191 : vector<2x1xi32> to vector<2x1xf32>
    %193 = vector.broadcast %192 : vector<2x1xf32> to vector<2x16xf32>
    %194 = arith.mulf %193, %188 : vector<2x16xf32>
    %cst_62 = arith.constant 1.000000e+00 : f32
    %195 = vector.broadcast %cst_62 : f32 to vector<2x1xf32>
    %196 = arith.subf %195, %192 : vector<2x1xf32>
    %197 = vector.broadcast %196 : vector<2x1xf32> to vector<2x16xf32>
    %198 = arith.mulf %197, %83 : vector<2x16xf32>
    %199 = arith.addf %194, %198 : vector<2x16xf32>
    %200 = vector.broadcast %192 : vector<2x1xf32> to vector<2x16xf32>
    %201 = arith.mulf %200, %186 : vector<2x16xf32>
    %cst_63 = arith.constant 1.000000e+00 : f32
    %202 = vector.broadcast %cst_63 : f32 to vector<2x1xf32>
    %203 = arith.subf %202, %192 : vector<2x1xf32>
    %204 = vector.broadcast %203 : vector<2x1xf32> to vector<2x16xf32>
    %205 = arith.mulf %204, %90 : vector<2x16xf32>
    %206 = arith.addf %201, %205 : vector<2x16xf32>
    %207 = vector.broadcast %192 : vector<2x1xf32> to vector<2x16xf32>
    %208 = arith.mulf %207, %188 : vector<2x16xf32>
    %209 = vector.extract_strided_slice %26 {offsets = [6, 0, 0], sizes = [1, 2, 32], strides = [1, 1, 1]} : vector<8x2x32xf32> to vector<1x2x32xf32>
    %210 = vector.shape_cast %209 : vector<1x2x32xf32> to vector<2x32xf32>
    %cst_64 = arith.constant dense<0.000000e+00> : vector<2x64xf32>
    %211 = tpu.matmul %210, %29, %cst_64 {dimension_numbers = #tpu.dot_dimension_numbers<[1], [0], [0], [1], [0, 0, 1, 1], [], []>} : vector<2x32xf32>, vector<32x64xf32>, vector<2x64xf32> -> vector<2x64xf32>
    %212 = vector.broadcast %31 : vector<1x64xf32> to vector<2x64xf32>
    %213 = arith.addf %211, %212 : vector<2x64xf32>
    %cst_65 = arith.constant dense<0.000000e+00> : vector<2x64xf32>
    %214 = tpu.matmul %141, %33, %cst_65 {dimension_numbers = #tpu.dot_dimension_numbers<[1], [0], [0], [1], [0, 0, 1, 1], [], []>} : vector<2x16xf32>, vector<16x64xf32>, vector<2x64xf32> -> vector<2x64xf32>
    %215 = arith.addf %213, %214 : vector<2x64xf32>
    %216 = vector.extract_strided_slice %215 {offsets = [0, 0], sizes = [2, 16], strides = [1, 1]} : vector<2x64xf32> to vector<2x16xf32>
    %cst_66 = arith.constant 0.000000e+00 : f32
    %217 = vector.broadcast %cst_66 : f32 to vector<2x16xf32>
    %218 = arith.subf %217, %216 : vector<2x16xf32>
    %219 = math.exp %218 : vector<2x16xf32>
    %cst_67 = arith.constant 1.000000e+00 : f32
    %220 = vector.broadcast %cst_67 : f32 to vector<2x16xf32>
    %221 = arith.addf %220, %219 : vector<2x16xf32>
    %cst_68 = arith.constant 1.000000e+00 : f32
    %222 = vector.broadcast %cst_68 : f32 to vector<2x16xf32>
    %223 = arith.divf %222, %221 : vector<2x16xf32>
    %224 = vector.extract_strided_slice %215 {offsets = [0, 16], sizes = [2, 16], strides = [1, 1]} : vector<2x64xf32> to vector<2x16xf32>
    %cst_69 = arith.constant 0.000000e+00 : f32
    %225 = vector.broadcast %cst_69 : f32 to vector<2x16xf32>
    %226 = arith.subf %225, %224 : vector<2x16xf32>
    %227 = math.exp %226 : vector<2x16xf32>
    %cst_70 = arith.constant 1.000000e+00 : f32
    %228 = vector.broadcast %cst_70 : f32 to vector<2x16xf32>
    %229 = arith.addf %228, %227 : vector<2x16xf32>
    %cst_71 = arith.constant 1.000000e+00 : f32
    %230 = vector.broadcast %cst_71 : f32 to vector<2x16xf32>
    %231 = arith.divf %230, %229 : vector<2x16xf32>
    %232 = vector.extract_strided_slice %215 {offsets = [0, 32], sizes = [2, 16], strides = [1, 1]} : vector<2x64xf32> to vector<2x16xf32>
    %233 = math.tanh %232 : vector<2x16xf32>
    %234 = vector.extract_strided_slice %215 {offsets = [0, 48], sizes = [2, 16], strides = [1, 1]} : vector<2x64xf32> to vector<2x16xf32>
    %cst_72 = arith.constant 0.000000e+00 : f32
    %235 = vector.broadcast %cst_72 : f32 to vector<2x16xf32>
    %236 = arith.subf %235, %234 : vector<2x16xf32>
    %237 = math.exp %236 : vector<2x16xf32>
    %cst_73 = arith.constant 1.000000e+00 : f32
    %238 = vector.broadcast %cst_73 : f32 to vector<2x16xf32>
    %239 = arith.addf %238, %237 : vector<2x16xf32>
    %cst_74 = arith.constant 1.000000e+00 : f32
    %240 = vector.broadcast %cst_74 : f32 to vector<2x16xf32>
    %241 = arith.divf %240, %239 : vector<2x16xf32>
    %242 = arith.mulf %231, %148 : vector<2x16xf32>
    %243 = arith.mulf %223, %233 : vector<2x16xf32>
    %244 = arith.addf %242, %243 : vector<2x16xf32>
    %245 = math.tanh %244 : vector<2x16xf32>
    %246 = arith.mulf %241, %245 : vector<2x16xf32>
    %c6_i32 = arith.constant 6 : i32
    %247 = vector.broadcast %c6_i32 : i32 to vector<2x1xi32>
    %248 = arith.cmpi sgt, %27, %247 : vector<2x1xi32>
    %249 = arith.extui %248 : vector<2x1xi1> to vector<2x1xi32>
    %250 = arith.sitofp %249 : vector<2x1xi32> to vector<2x1xf32>
    %251 = vector.broadcast %250 : vector<2x1xf32> to vector<2x16xf32>
    %252 = arith.mulf %251, %246 : vector<2x16xf32>
    %cst_75 = arith.constant 1.000000e+00 : f32
    %253 = vector.broadcast %cst_75 : f32 to vector<2x1xf32>
    %254 = arith.subf %253, %250 : vector<2x1xf32>
    %255 = vector.broadcast %254 : vector<2x1xf32> to vector<2x16xf32>
    %256 = arith.mulf %255, %141 : vector<2x16xf32>
    %257 = arith.addf %252, %256 : vector<2x16xf32>
    %258 = vector.broadcast %250 : vector<2x1xf32> to vector<2x16xf32>
    %259 = arith.mulf %258, %244 : vector<2x16xf32>
    %cst_76 = arith.constant 1.000000e+00 : f32
    %260 = vector.broadcast %cst_76 : f32 to vector<2x1xf32>
    %261 = arith.subf %260, %250 : vector<2x1xf32>
    %262 = vector.broadcast %261 : vector<2x1xf32> to vector<2x16xf32>
    %263 = arith.mulf %262, %148 : vector<2x16xf32>
    %264 = arith.addf %259, %263 : vector<2x16xf32>
    %265 = vector.broadcast %250 : vector<2x1xf32> to vector<2x16xf32>
    %266 = arith.mulf %265, %246 : vector<2x16xf32>
    %267 = vector.extract_strided_slice %26 {offsets = [2, 0, 0], sizes = [1, 2, 32], strides = [1, 1, 1]} : vector<8x2x32xf32> to vector<1x2x32xf32>
    %268 = vector.shape_cast %267 : vector<1x2x32xf32> to vector<2x32xf32>
    %cst_77 = arith.constant dense<0.000000e+00> : vector<2x64xf32>
    %269 = tpu.matmul %268, %28, %cst_77 {dimension_numbers = #tpu.dot_dimension_numbers<[1], [0], [0], [1], [0, 0, 1, 1], [], []>} : vector<2x32xf32>, vector<32x64xf32>, vector<2x64xf32> -> vector<2x64xf32>
    %270 = vector.broadcast %30 : vector<1x64xf32> to vector<2x64xf32>
    %271 = arith.addf %269, %270 : vector<2x64xf32>
    %cst_78 = arith.constant dense<0.000000e+00> : vector<2x64xf32>
    %272 = tpu.matmul %199, %32, %cst_78 {dimension_numbers = #tpu.dot_dimension_numbers<[1], [0], [0], [1], [0, 0, 1, 1], [], []>} : vector<2x16xf32>, vector<16x64xf32>, vector<2x64xf32> -> vector<2x64xf32>
    %273 = arith.addf %271, %272 : vector<2x64xf32>
    %274 = vector.extract_strided_slice %273 {offsets = [0, 0], sizes = [2, 16], strides = [1, 1]} : vector<2x64xf32> to vector<2x16xf32>
    %cst_79 = arith.constant 0.000000e+00 : f32
    %275 = vector.broadcast %cst_79 : f32 to vector<2x16xf32>
    %276 = arith.subf %275, %274 : vector<2x16xf32>
    %277 = math.exp %276 : vector<2x16xf32>
    %cst_80 = arith.constant 1.000000e+00 : f32
    %278 = vector.broadcast %cst_80 : f32 to vector<2x16xf32>
    %279 = arith.addf %278, %277 : vector<2x16xf32>
    %cst_81 = arith.constant 1.000000e+00 : f32
    %280 = vector.broadcast %cst_81 : f32 to vector<2x16xf32>
    %281 = arith.divf %280, %279 : vector<2x16xf32>
    %282 = vector.extract_strided_slice %273 {offsets = [0, 16], sizes = [2, 16], strides = [1, 1]} : vector<2x64xf32> to vector<2x16xf32>
    %cst_82 = arith.constant 0.000000e+00 : f32
    %283 = vector.broadcast %cst_82 : f32 to vector<2x16xf32>
    %284 = arith.subf %283, %282 : vector<2x16xf32>
    %285 = math.exp %284 : vector<2x16xf32>
    %cst_83 = arith.constant 1.000000e+00 : f32
    %286 = vector.broadcast %cst_83 : f32 to vector<2x16xf32>
    %287 = arith.addf %286, %285 : vector<2x16xf32>
    %cst_84 = arith.constant 1.000000e+00 : f32
    %288 = vector.broadcast %cst_84 : f32 to vector<2x16xf32>
    %289 = arith.divf %288, %287 : vector<2x16xf32>
    %290 = vector.extract_strided_slice %273 {offsets = [0, 32], sizes = [2, 16], strides = [1, 1]} : vector<2x64xf32> to vector<2x16xf32>
    %291 = math.tanh %290 : vector<2x16xf32>
    %292 = vector.extract_strided_slice %273 {offsets = [0, 48], sizes = [2, 16], strides = [1, 1]} : vector<2x64xf32> to vector<2x16xf32>
    %cst_85 = arith.constant 0.000000e+00 : f32
    %293 = vector.broadcast %cst_85 : f32 to vector<2x16xf32>
    %294 = arith.subf %293, %292 : vector<2x16xf32>
    %295 = math.exp %294 : vector<2x16xf32>
    %cst_86 = arith.constant 1.000000e+00 : f32
    %296 = vector.broadcast %cst_86 : f32 to vector<2x16xf32>
    %297 = arith.addf %296, %295 : vector<2x16xf32>
    %cst_87 = arith.constant 1.000000e+00 : f32
    %298 = vector.broadcast %cst_87 : f32 to vector<2x16xf32>
    %299 = arith.divf %298, %297 : vector<2x16xf32>
    %300 = arith.mulf %289, %206 : vector<2x16xf32>
    %301 = arith.mulf %281, %291 : vector<2x16xf32>
    %302 = arith.addf %300, %301 : vector<2x16xf32>
    %303 = math.tanh %302 : vector<2x16xf32>
    %304 = arith.mulf %299, %303 : vector<2x16xf32>
    %c2_i32 = arith.constant 2 : i32
    %305 = vector.broadcast %c2_i32 : i32 to vector<2x1xi32>
    %306 = arith.cmpi sgt, %27, %305 : vector<2x1xi32>
    %307 = arith.extui %306 : vector<2x1xi1> to vector<2x1xi32>
    %308 = arith.sitofp %307 : vector<2x1xi32> to vector<2x1xf32>
    %309 = vector.broadcast %308 : vector<2x1xf32> to vector<2x16xf32>
    %310 = arith.mulf %309, %304 : vector<2x16xf32>
    %cst_88 = arith.constant 1.000000e+00 : f32
    %311 = vector.broadcast %cst_88 : f32 to vector<2x1xf32>
    %312 = arith.subf %311, %308 : vector<2x1xf32>
    %313 = vector.broadcast %312 : vector<2x1xf32> to vector<2x16xf32>
    %314 = arith.mulf %313, %199 : vector<2x16xf32>
    %315 = arith.addf %310, %314 : vector<2x16xf32>
    %316 = vector.broadcast %308 : vector<2x1xf32> to vector<2x16xf32>
    %317 = arith.mulf %316, %302 : vector<2x16xf32>
    %cst_89 = arith.constant 1.000000e+00 : f32
    %318 = vector.broadcast %cst_89 : f32 to vector<2x1xf32>
    %319 = arith.subf %318, %308 : vector<2x1xf32>
    %320 = vector.broadcast %319 : vector<2x1xf32> to vector<2x16xf32>
    %321 = arith.mulf %320, %206 : vector<2x16xf32>
    %322 = arith.addf %317, %321 : vector<2x16xf32>
    %323 = vector.broadcast %308 : vector<2x1xf32> to vector<2x16xf32>
    %324 = arith.mulf %323, %304 : vector<2x16xf32>
    %325 = vector.extract_strided_slice %26 {offsets = [5, 0, 0], sizes = [1, 2, 32], strides = [1, 1, 1]} : vector<8x2x32xf32> to vector<1x2x32xf32>
    %326 = vector.shape_cast %325 : vector<1x2x32xf32> to vector<2x32xf32>
    %cst_90 = arith.constant dense<0.000000e+00> : vector<2x64xf32>
    %327 = tpu.matmul %326, %29, %cst_90 {dimension_numbers = #tpu.dot_dimension_numbers<[1], [0], [0], [1], [0, 0, 1, 1], [], []>} : vector<2x32xf32>, vector<32x64xf32>, vector<2x64xf32> -> vector<2x64xf32>
    %328 = vector.broadcast %31 : vector<1x64xf32> to vector<2x64xf32>
    %329 = arith.addf %327, %328 : vector<2x64xf32>
    %cst_91 = arith.constant dense<0.000000e+00> : vector<2x64xf32>
    %330 = tpu.matmul %257, %33, %cst_91 {dimension_numbers = #tpu.dot_dimension_numbers<[1], [0], [0], [1], [0, 0, 1, 1], [], []>} : vector<2x16xf32>, vector<16x64xf32>, vector<2x64xf32> -> vector<2x64xf32>
    %331 = arith.addf %329, %330 : vector<2x64xf32>
    %332 = vector.extract_strided_slice %331 {offsets = [0, 0], sizes = [2, 16], strides = [1, 1]} : vector<2x64xf32> to vector<2x16xf32>
    %cst_92 = arith.constant 0.000000e+00 : f32
    %333 = vector.broadcast %cst_92 : f32 to vector<2x16xf32>
    %334 = arith.subf %333, %332 : vector<2x16xf32>
    %335 = math.exp %334 : vector<2x16xf32>
    %cst_93 = arith.constant 1.000000e+00 : f32
    %336 = vector.broadcast %cst_93 : f32 to vector<2x16xf32>
    %337 = arith.addf %336, %335 : vector<2x16xf32>
    %cst_94 = arith.constant 1.000000e+00 : f32
    %338 = vector.broadcast %cst_94 : f32 to vector<2x16xf32>
    %339 = arith.divf %338, %337 : vector<2x16xf32>
    %340 = vector.extract_strided_slice %331 {offsets = [0, 16], sizes = [2, 16], strides = [1, 1]} : vector<2x64xf32> to vector<2x16xf32>
    %cst_95 = arith.constant 0.000000e+00 : f32
    %341 = vector.broadcast %cst_95 : f32 to vector<2x16xf32>
    %342 = arith.subf %341, %340 : vector<2x16xf32>
    %343 = math.exp %342 : vector<2x16xf32>
    %cst_96 = arith.constant 1.000000e+00 : f32
    %344 = vector.broadcast %cst_96 : f32 to vector<2x16xf32>
    %345 = arith.addf %344, %343 : vector<2x16xf32>
    %cst_97 = arith.constant 1.000000e+00 : f32
    %346 = vector.broadcast %cst_97 : f32 to vector<2x16xf32>
    %347 = arith.divf %346, %345 : vector<2x16xf32>
    %348 = vector.extract_strided_slice %331 {offsets = [0, 32], sizes = [2, 16], strides = [1, 1]} : vector<2x64xf32> to vector<2x16xf32>
    %349 = math.tanh %348 : vector<2x16xf32>
    %350 = vector.extract_strided_slice %331 {offsets = [0, 48], sizes = [2, 16], strides = [1, 1]} : vector<2x64xf32> to vector<2x16xf32>
    %cst_98 = arith.constant 0.000000e+00 : f32
    %351 = vector.broadcast %cst_98 : f32 to vector<2x16xf32>
    %352 = arith.subf %351, %350 : vector<2x16xf32>
    %353 = math.exp %352 : vector<2x16xf32>
    %cst_99 = arith.constant 1.000000e+00 : f32
    %354 = vector.broadcast %cst_99 : f32 to vector<2x16xf32>
    %355 = arith.addf %354, %353 : vector<2x16xf32>
    %cst_100 = arith.constant 1.000000e+00 : f32
    %356 = vector.broadcast %cst_100 : f32 to vector<2x16xf32>
    %357 = arith.divf %356, %355 : vector<2x16xf32>
    %358 = arith.mulf %347, %264 : vector<2x16xf32>
    %359 = arith.mulf %339, %349 : vector<2x16xf32>
    %360 = arith.addf %358, %359 : vector<2x16xf32>
    %361 = math.tanh %360 : vector<2x16xf32>
    %362 = arith.mulf %357, %361 : vector<2x16xf32>
    %c5_i32 = arith.constant 5 : i32
    %363 = vector.broadcast %c5_i32 : i32 to vector<2x1xi32>
    %364 = arith.cmpi sgt, %27, %363 : vector<2x1xi32>
    %365 = arith.extui %364 : vector<2x1xi1> to vector<2x1xi32>
    %366 = arith.sitofp %365 : vector<2x1xi32> to vector<2x1xf32>
    %367 = vector.broadcast %366 : vector<2x1xf32> to vector<2x16xf32>
    %368 = arith.mulf %367, %362 : vector<2x16xf32>
    %cst_101 = arith.constant 1.000000e+00 : f32
    %369 = vector.broadcast %cst_101 : f32 to vector<2x1xf32>
    %370 = arith.subf %369, %366 : vector<2x1xf32>
    %371 = vector.broadcast %370 : vector<2x1xf32> to vector<2x16xf32>
    %372 = arith.mulf %371, %257 : vector<2x16xf32>
    %373 = arith.addf %368, %372 : vector<2x16xf32>
    %374 = vector.broadcast %366 : vector<2x1xf32> to vector<2x16xf32>
    %375 = arith.mulf %374, %360 : vector<2x16xf32>
    %cst_102 = arith.constant 1.000000e+00 : f32
    %376 = vector.broadcast %cst_102 : f32 to vector<2x1xf32>
    %377 = arith.subf %376, %366 : vector<2x1xf32>
    %378 = vector.broadcast %377 : vector<2x1xf32> to vector<2x16xf32>
    %379 = arith.mulf %378, %264 : vector<2x16xf32>
    %380 = arith.addf %375, %379 : vector<2x16xf32>
    %381 = vector.broadcast %366 : vector<2x1xf32> to vector<2x16xf32>
    %382 = arith.mulf %381, %362 : vector<2x16xf32>
    %383 = vector.extract_strided_slice %26 {offsets = [3, 0, 0], sizes = [1, 2, 32], strides = [1, 1, 1]} : vector<8x2x32xf32> to vector<1x2x32xf32>
    %384 = vector.shape_cast %383 : vector<1x2x32xf32> to vector<2x32xf32>
    %cst_103 = arith.constant dense<0.000000e+00> : vector<2x64xf32>
    %385 = tpu.matmul %384, %28, %cst_103 {dimension_numbers = #tpu.dot_dimension_numbers<[1], [0], [0], [1], [0, 0, 1, 1], [], []>} : vector<2x32xf32>, vector<32x64xf32>, vector<2x64xf32> -> vector<2x64xf32>
    %386 = vector.broadcast %30 : vector<1x64xf32> to vector<2x64xf32>
    %387 = arith.addf %385, %386 : vector<2x64xf32>
    %cst_104 = arith.constant dense<0.000000e+00> : vector<2x64xf32>
    %388 = tpu.matmul %315, %32, %cst_104 {dimension_numbers = #tpu.dot_dimension_numbers<[1], [0], [0], [1], [0, 0, 1, 1], [], []>} : vector<2x16xf32>, vector<16x64xf32>, vector<2x64xf32> -> vector<2x64xf32>
    %389 = arith.addf %387, %388 : vector<2x64xf32>
    %390 = vector.extract_strided_slice %389 {offsets = [0, 0], sizes = [2, 16], strides = [1, 1]} : vector<2x64xf32> to vector<2x16xf32>
    %cst_105 = arith.constant 0.000000e+00 : f32
    %391 = vector.broadcast %cst_105 : f32 to vector<2x16xf32>
    %392 = arith.subf %391, %390 : vector<2x16xf32>
    %393 = math.exp %392 : vector<2x16xf32>
    %cst_106 = arith.constant 1.000000e+00 : f32
    %394 = vector.broadcast %cst_106 : f32 to vector<2x16xf32>
    %395 = arith.addf %394, %393 : vector<2x16xf32>
    %cst_107 = arith.constant 1.000000e+00 : f32
    %396 = vector.broadcast %cst_107 : f32 to vector<2x16xf32>
    %397 = arith.divf %396, %395 : vector<2x16xf32>
    %398 = vector.extract_strided_slice %389 {offsets = [0, 16], sizes = [2, 16], strides = [1, 1]} : vector<2x64xf32> to vector<2x16xf32>
    %cst_108 = arith.constant 0.000000e+00 : f32
    %399 = vector.broadcast %cst_108 : f32 to vector<2x16xf32>
    %400 = arith.subf %399, %398 : vector<2x16xf32>
    %401 = math.exp %400 : vector<2x16xf32>
    %cst_109 = arith.constant 1.000000e+00 : f32
    %402 = vector.broadcast %cst_109 : f32 to vector<2x16xf32>
    %403 = arith.addf %402, %401 : vector<2x16xf32>
    %cst_110 = arith.constant 1.000000e+00 : f32
    %404 = vector.broadcast %cst_110 : f32 to vector<2x16xf32>
    %405 = arith.divf %404, %403 : vector<2x16xf32>
    %406 = vector.extract_strided_slice %389 {offsets = [0, 32], sizes = [2, 16], strides = [1, 1]} : vector<2x64xf32> to vector<2x16xf32>
    %407 = math.tanh %406 : vector<2x16xf32>
    %408 = vector.extract_strided_slice %389 {offsets = [0, 48], sizes = [2, 16], strides = [1, 1]} : vector<2x64xf32> to vector<2x16xf32>
    %cst_111 = arith.constant 0.000000e+00 : f32
    %409 = vector.broadcast %cst_111 : f32 to vector<2x16xf32>
    %410 = arith.subf %409, %408 : vector<2x16xf32>
    %411 = math.exp %410 : vector<2x16xf32>
    %cst_112 = arith.constant 1.000000e+00 : f32
    %412 = vector.broadcast %cst_112 : f32 to vector<2x16xf32>
    %413 = arith.addf %412, %411 : vector<2x16xf32>
    %cst_113 = arith.constant 1.000000e+00 : f32
    %414 = vector.broadcast %cst_113 : f32 to vector<2x16xf32>
    %415 = arith.divf %414, %413 : vector<2x16xf32>
    %416 = arith.mulf %405, %322 : vector<2x16xf32>
    %417 = arith.mulf %397, %407 : vector<2x16xf32>
    %418 = arith.addf %416, %417 : vector<2x16xf32>
    %419 = math.tanh %418 : vector<2x16xf32>
    %420 = arith.mulf %415, %419 : vector<2x16xf32>
    %c3_i32 = arith.constant 3 : i32
    %421 = vector.broadcast %c3_i32 : i32 to vector<2x1xi32>
    %422 = arith.cmpi sgt, %27, %421 : vector<2x1xi32>
    %423 = arith.extui %422 : vector<2x1xi1> to vector<2x1xi32>
    %424 = arith.sitofp %423 : vector<2x1xi32> to vector<2x1xf32>
    %425 = vector.broadcast %424 : vector<2x1xf32> to vector<2x16xf32>
    %426 = arith.mulf %425, %420 : vector<2x16xf32>
    %cst_114 = arith.constant 1.000000e+00 : f32
    %427 = vector.broadcast %cst_114 : f32 to vector<2x1xf32>
    %428 = arith.subf %427, %424 : vector<2x1xf32>
    %429 = vector.broadcast %428 : vector<2x1xf32> to vector<2x16xf32>
    %430 = arith.mulf %429, %315 : vector<2x16xf32>
    %431 = arith.addf %426, %430 : vector<2x16xf32>
    %432 = vector.broadcast %424 : vector<2x1xf32> to vector<2x16xf32>
    %433 = arith.mulf %432, %418 : vector<2x16xf32>
    %cst_115 = arith.constant 1.000000e+00 : f32
    %434 = vector.broadcast %cst_115 : f32 to vector<2x1xf32>
    %435 = arith.subf %434, %424 : vector<2x1xf32>
    %436 = vector.broadcast %435 : vector<2x1xf32> to vector<2x16xf32>
    %437 = arith.mulf %436, %322 : vector<2x16xf32>
    %438 = arith.addf %433, %437 : vector<2x16xf32>
    %439 = vector.broadcast %424 : vector<2x1xf32> to vector<2x16xf32>
    %440 = arith.mulf %439, %420 : vector<2x16xf32>
    %441 = vector.extract_strided_slice %26 {offsets = [4, 0, 0], sizes = [1, 2, 32], strides = [1, 1, 1]} : vector<8x2x32xf32> to vector<1x2x32xf32>
    %442 = vector.shape_cast %441 : vector<1x2x32xf32> to vector<2x32xf32>
    %cst_116 = arith.constant dense<0.000000e+00> : vector<2x64xf32>
    %443 = tpu.matmul %442, %29, %cst_116 {dimension_numbers = #tpu.dot_dimension_numbers<[1], [0], [0], [1], [0, 0, 1, 1], [], []>} : vector<2x32xf32>, vector<32x64xf32>, vector<2x64xf32> -> vector<2x64xf32>
    %444 = vector.broadcast %31 : vector<1x64xf32> to vector<2x64xf32>
    %445 = arith.addf %443, %444 : vector<2x64xf32>
    %cst_117 = arith.constant dense<0.000000e+00> : vector<2x64xf32>
    %446 = tpu.matmul %373, %33, %cst_117 {dimension_numbers = #tpu.dot_dimension_numbers<[1], [0], [0], [1], [0, 0, 1, 1], [], []>} : vector<2x16xf32>, vector<16x64xf32>, vector<2x64xf32> -> vector<2x64xf32>
    %447 = arith.addf %445, %446 : vector<2x64xf32>
    %448 = vector.extract_strided_slice %447 {offsets = [0, 0], sizes = [2, 16], strides = [1, 1]} : vector<2x64xf32> to vector<2x16xf32>
    %cst_118 = arith.constant 0.000000e+00 : f32
    %449 = vector.broadcast %cst_118 : f32 to vector<2x16xf32>
    %450 = arith.subf %449, %448 : vector<2x16xf32>
    %451 = math.exp %450 : vector<2x16xf32>
    %cst_119 = arith.constant 1.000000e+00 : f32
    %452 = vector.broadcast %cst_119 : f32 to vector<2x16xf32>
    %453 = arith.addf %452, %451 : vector<2x16xf32>
    %cst_120 = arith.constant 1.000000e+00 : f32
    %454 = vector.broadcast %cst_120 : f32 to vector<2x16xf32>
    %455 = arith.divf %454, %453 : vector<2x16xf32>
    %456 = vector.extract_strided_slice %447 {offsets = [0, 16], sizes = [2, 16], strides = [1, 1]} : vector<2x64xf32> to vector<2x16xf32>
    %cst_121 = arith.constant 0.000000e+00 : f32
    %457 = vector.broadcast %cst_121 : f32 to vector<2x16xf32>
    %458 = arith.subf %457, %456 : vector<2x16xf32>
    %459 = math.exp %458 : vector<2x16xf32>
    %cst_122 = arith.constant 1.000000e+00 : f32
    %460 = vector.broadcast %cst_122 : f32 to vector<2x16xf32>
    %461 = arith.addf %460, %459 : vector<2x16xf32>
    %cst_123 = arith.constant 1.000000e+00 : f32
    %462 = vector.broadcast %cst_123 : f32 to vector<2x16xf32>
    %463 = arith.divf %462, %461 : vector<2x16xf32>
    %464 = vector.extract_strided_slice %447 {offsets = [0, 32], sizes = [2, 16], strides = [1, 1]} : vector<2x64xf32> to vector<2x16xf32>
    %465 = math.tanh %464 : vector<2x16xf32>
    %466 = vector.extract_strided_slice %447 {offsets = [0, 48], sizes = [2, 16], strides = [1, 1]} : vector<2x64xf32> to vector<2x16xf32>
    %cst_124 = arith.constant 0.000000e+00 : f32
    %467 = vector.broadcast %cst_124 : f32 to vector<2x16xf32>
    %468 = arith.subf %467, %466 : vector<2x16xf32>
    %469 = math.exp %468 : vector<2x16xf32>
    %cst_125 = arith.constant 1.000000e+00 : f32
    %470 = vector.broadcast %cst_125 : f32 to vector<2x16xf32>
    %471 = arith.addf %470, %469 : vector<2x16xf32>
    %cst_126 = arith.constant 1.000000e+00 : f32
    %472 = vector.broadcast %cst_126 : f32 to vector<2x16xf32>
    %473 = arith.divf %472, %471 : vector<2x16xf32>
    %474 = arith.mulf %463, %380 : vector<2x16xf32>
    %475 = arith.mulf %455, %465 : vector<2x16xf32>
    %476 = arith.addf %474, %475 : vector<2x16xf32>
    %477 = math.tanh %476 : vector<2x16xf32>
    %478 = arith.mulf %473, %477 : vector<2x16xf32>
    %c4_i32 = arith.constant 4 : i32
    %479 = vector.broadcast %c4_i32 : i32 to vector<2x1xi32>
    %480 = arith.cmpi sgt, %27, %479 : vector<2x1xi32>
    %481 = arith.extui %480 : vector<2x1xi1> to vector<2x1xi32>
    %482 = arith.sitofp %481 : vector<2x1xi32> to vector<2x1xf32>
    %483 = vector.broadcast %482 : vector<2x1xf32> to vector<2x16xf32>
    %484 = arith.mulf %483, %478 : vector<2x16xf32>
    %cst_127 = arith.constant 1.000000e+00 : f32
    %485 = vector.broadcast %cst_127 : f32 to vector<2x1xf32>
    %486 = arith.subf %485, %482 : vector<2x1xf32>
    %487 = vector.broadcast %486 : vector<2x1xf32> to vector<2x16xf32>
    %488 = arith.mulf %487, %373 : vector<2x16xf32>
    %489 = arith.addf %484, %488 : vector<2x16xf32>
    %490 = vector.broadcast %482 : vector<2x1xf32> to vector<2x16xf32>
    %491 = arith.mulf %490, %476 : vector<2x16xf32>
    %cst_128 = arith.constant 1.000000e+00 : f32
    %492 = vector.broadcast %cst_128 : f32 to vector<2x1xf32>
    %493 = arith.subf %492, %482 : vector<2x1xf32>
    %494 = vector.broadcast %493 : vector<2x1xf32> to vector<2x16xf32>
    %495 = arith.mulf %494, %380 : vector<2x16xf32>
    %496 = arith.addf %491, %495 : vector<2x16xf32>
    %497 = vector.broadcast %482 : vector<2x1xf32> to vector<2x16xf32>
    %498 = arith.mulf %497, %478 : vector<2x16xf32>
    %499 = vector.extract_strided_slice %26 {offsets = [4, 0, 0], sizes = [1, 2, 32], strides = [1, 1, 1]} : vector<8x2x32xf32> to vector<1x2x32xf32>
    %500 = vector.shape_cast %499 : vector<1x2x32xf32> to vector<2x32xf32>
    %cst_129 = arith.constant dense<0.000000e+00> : vector<2x64xf32>
    %501 = tpu.matmul %500, %28, %cst_129 {dimension_numbers = #tpu.dot_dimension_numbers<[1], [0], [0], [1], [0, 0, 1, 1], [], []>} : vector<2x32xf32>, vector<32x64xf32>, vector<2x64xf32> -> vector<2x64xf32>
    %502 = vector.broadcast %30 : vector<1x64xf32> to vector<2x64xf32>
    %503 = arith.addf %501, %502 : vector<2x64xf32>
    %cst_130 = arith.constant dense<0.000000e+00> : vector<2x64xf32>
    %504 = tpu.matmul %431, %32, %cst_130 {dimension_numbers = #tpu.dot_dimension_numbers<[1], [0], [0], [1], [0, 0, 1, 1], [], []>} : vector<2x16xf32>, vector<16x64xf32>, vector<2x64xf32> -> vector<2x64xf32>
    %505 = arith.addf %503, %504 : vector<2x64xf32>
    %506 = vector.extract_strided_slice %505 {offsets = [0, 0], sizes = [2, 16], strides = [1, 1]} : vector<2x64xf32> to vector<2x16xf32>
    %cst_131 = arith.constant 0.000000e+00 : f32
    %507 = vector.broadcast %cst_131 : f32 to vector<2x16xf32>
    %508 = arith.subf %507, %506 : vector<2x16xf32>
    %509 = math.exp %508 : vector<2x16xf32>
    %cst_132 = arith.constant 1.000000e+00 : f32
    %510 = vector.broadcast %cst_132 : f32 to vector<2x16xf32>
    %511 = arith.addf %510, %509 : vector<2x16xf32>
    %cst_133 = arith.constant 1.000000e+00 : f32
    %512 = vector.broadcast %cst_133 : f32 to vector<2x16xf32>
    %513 = arith.divf %512, %511 : vector<2x16xf32>
    %514 = vector.extract_strided_slice %505 {offsets = [0, 16], sizes = [2, 16], strides = [1, 1]} : vector<2x64xf32> to vector<2x16xf32>
    %cst_134 = arith.constant 0.000000e+00 : f32
    %515 = vector.broadcast %cst_134 : f32 to vector<2x16xf32>
    %516 = arith.subf %515, %514 : vector<2x16xf32>
    %517 = math.exp %516 : vector<2x16xf32>
    %cst_135 = arith.constant 1.000000e+00 : f32
    %518 = vector.broadcast %cst_135 : f32 to vector<2x16xf32>
    %519 = arith.addf %518, %517 : vector<2x16xf32>
    %cst_136 = arith.constant 1.000000e+00 : f32
    %520 = vector.broadcast %cst_136 : f32 to vector<2x16xf32>
    %521 = arith.divf %520, %519 : vector<2x16xf32>
    %522 = vector.extract_strided_slice %505 {offsets = [0, 32], sizes = [2, 16], strides = [1, 1]} : vector<2x64xf32> to vector<2x16xf32>
    %523 = math.tanh %522 : vector<2x16xf32>
    %524 = vector.extract_strided_slice %505 {offsets = [0, 48], sizes = [2, 16], strides = [1, 1]} : vector<2x64xf32> to vector<2x16xf32>
    %cst_137 = arith.constant 0.000000e+00 : f32
    %525 = vector.broadcast %cst_137 : f32 to vector<2x16xf32>
    %526 = arith.subf %525, %524 : vector<2x16xf32>
    %527 = math.exp %526 : vector<2x16xf32>
    %cst_138 = arith.constant 1.000000e+00 : f32
    %528 = vector.broadcast %cst_138 : f32 to vector<2x16xf32>
    %529 = arith.addf %528, %527 : vector<2x16xf32>
    %cst_139 = arith.constant 1.000000e+00 : f32
    %530 = vector.broadcast %cst_139 : f32 to vector<2x16xf32>
    %531 = arith.divf %530, %529 : vector<2x16xf32>
    %532 = arith.mulf %521, %438 : vector<2x16xf32>
    %533 = arith.mulf %513, %523 : vector<2x16xf32>
    %534 = arith.addf %532, %533 : vector<2x16xf32>
    %535 = math.tanh %534 : vector<2x16xf32>
    %536 = arith.mulf %531, %535 : vector<2x16xf32>
    %c4_i32_140 = arith.constant 4 : i32
    %537 = vector.broadcast %c4_i32_140 : i32 to vector<2x1xi32>
    %538 = arith.cmpi sgt, %27, %537 : vector<2x1xi32>
    %539 = arith.extui %538 : vector<2x1xi1> to vector<2x1xi32>
    %540 = arith.sitofp %539 : vector<2x1xi32> to vector<2x1xf32>
    %541 = vector.broadcast %540 : vector<2x1xf32> to vector<2x16xf32>
    %542 = arith.mulf %541, %536 : vector<2x16xf32>
    %cst_141 = arith.constant 1.000000e+00 : f32
    %543 = vector.broadcast %cst_141 : f32 to vector<2x1xf32>
    %544 = arith.subf %543, %540 : vector<2x1xf32>
    %545 = vector.broadcast %544 : vector<2x1xf32> to vector<2x16xf32>
    %546 = arith.mulf %545, %431 : vector<2x16xf32>
    %547 = arith.addf %542, %546 : vector<2x16xf32>
    %548 = vector.broadcast %540 : vector<2x1xf32> to vector<2x16xf32>
    %549 = arith.mulf %548, %534 : vector<2x16xf32>
    %cst_142 = arith.constant 1.000000e+00 : f32
    %550 = vector.broadcast %cst_142 : f32 to vector<2x1xf32>
    %551 = arith.subf %550, %540 : vector<2x1xf32>
    %552 = vector.broadcast %551 : vector<2x1xf32> to vector<2x16xf32>
    %553 = arith.mulf %552, %438 : vector<2x16xf32>
    %554 = arith.addf %549, %553 : vector<2x16xf32>
    %555 = vector.broadcast %540 : vector<2x1xf32> to vector<2x16xf32>
    %556 = arith.mulf %555, %536 : vector<2x16xf32>
    %557 = vector.extract_strided_slice %26 {offsets = [3, 0, 0], sizes = [1, 2, 32], strides = [1, 1, 1]} : vector<8x2x32xf32> to vector<1x2x32xf32>
    %558 = vector.shape_cast %557 : vector<1x2x32xf32> to vector<2x32xf32>
    %cst_143 = arith.constant dense<0.000000e+00> : vector<2x64xf32>
    %559 = tpu.matmul %558, %29, %cst_143 {dimension_numbers = #tpu.dot_dimension_numbers<[1], [0], [0], [1], [0, 0, 1, 1], [], []>} : vector<2x32xf32>, vector<32x64xf32>, vector<2x64xf32> -> vector<2x64xf32>
    %560 = vector.broadcast %31 : vector<1x64xf32> to vector<2x64xf32>
    %561 = arith.addf %559, %560 : vector<2x64xf32>
    %cst_144 = arith.constant dense<0.000000e+00> : vector<2x64xf32>
    %562 = tpu.matmul %489, %33, %cst_144 {dimension_numbers = #tpu.dot_dimension_numbers<[1], [0], [0], [1], [0, 0, 1, 1], [], []>} : vector<2x16xf32>, vector<16x64xf32>, vector<2x64xf32> -> vector<2x64xf32>
    %563 = arith.addf %561, %562 : vector<2x64xf32>
    %564 = vector.extract_strided_slice %563 {offsets = [0, 0], sizes = [2, 16], strides = [1, 1]} : vector<2x64xf32> to vector<2x16xf32>
    %cst_145 = arith.constant 0.000000e+00 : f32
    %565 = vector.broadcast %cst_145 : f32 to vector<2x16xf32>
    %566 = arith.subf %565, %564 : vector<2x16xf32>
    %567 = math.exp %566 : vector<2x16xf32>
    %cst_146 = arith.constant 1.000000e+00 : f32
    %568 = vector.broadcast %cst_146 : f32 to vector<2x16xf32>
    %569 = arith.addf %568, %567 : vector<2x16xf32>
    %cst_147 = arith.constant 1.000000e+00 : f32
    %570 = vector.broadcast %cst_147 : f32 to vector<2x16xf32>
    %571 = arith.divf %570, %569 : vector<2x16xf32>
    %572 = vector.extract_strided_slice %563 {offsets = [0, 16], sizes = [2, 16], strides = [1, 1]} : vector<2x64xf32> to vector<2x16xf32>
    %cst_148 = arith.constant 0.000000e+00 : f32
    %573 = vector.broadcast %cst_148 : f32 to vector<2x16xf32>
    %574 = arith.subf %573, %572 : vector<2x16xf32>
    %575 = math.exp %574 : vector<2x16xf32>
    %cst_149 = arith.constant 1.000000e+00 : f32
    %576 = vector.broadcast %cst_149 : f32 to vector<2x16xf32>
    %577 = arith.addf %576, %575 : vector<2x16xf32>
    %cst_150 = arith.constant 1.000000e+00 : f32
    %578 = vector.broadcast %cst_150 : f32 to vector<2x16xf32>
    %579 = arith.divf %578, %577 : vector<2x16xf32>
    %580 = vector.extract_strided_slice %563 {offsets = [0, 32], sizes = [2, 16], strides = [1, 1]} : vector<2x64xf32> to vector<2x16xf32>
    %581 = math.tanh %580 : vector<2x16xf32>
    %582 = vector.extract_strided_slice %563 {offsets = [0, 48], sizes = [2, 16], strides = [1, 1]} : vector<2x64xf32> to vector<2x16xf32>
    %cst_151 = arith.constant 0.000000e+00 : f32
    %583 = vector.broadcast %cst_151 : f32 to vector<2x16xf32>
    %584 = arith.subf %583, %582 : vector<2x16xf32>
    %585 = math.exp %584 : vector<2x16xf32>
    %cst_152 = arith.constant 1.000000e+00 : f32
    %586 = vector.broadcast %cst_152 : f32 to vector<2x16xf32>
    %587 = arith.addf %586, %585 : vector<2x16xf32>
    %cst_153 = arith.constant 1.000000e+00 : f32
    %588 = vector.broadcast %cst_153 : f32 to vector<2x16xf32>
    %589 = arith.divf %588, %587 : vector<2x16xf32>
    %590 = arith.mulf %579, %496 : vector<2x16xf32>
    %591 = arith.mulf %571, %581 : vector<2x16xf32>
    %592 = arith.addf %590, %591 : vector<2x16xf32>
    %593 = math.tanh %592 : vector<2x16xf32>
    %594 = arith.mulf %589, %593 : vector<2x16xf32>
    %c3_i32_154 = arith.constant 3 : i32
    %595 = vector.broadcast %c3_i32_154 : i32 to vector<2x1xi32>
    %596 = arith.cmpi sgt, %27, %595 : vector<2x1xi32>
    %597 = arith.extui %596 : vector<2x1xi1> to vector<2x1xi32>
    %598 = arith.sitofp %597 : vector<2x1xi32> to vector<2x1xf32>
    %599 = vector.broadcast %598 : vector<2x1xf32> to vector<2x16xf32>
    %600 = arith.mulf %599, %594 : vector<2x16xf32>
    %cst_155 = arith.constant 1.000000e+00 : f32
    %601 = vector.broadcast %cst_155 : f32 to vector<2x1xf32>
    %602 = arith.subf %601, %598 : vector<2x1xf32>
    %603 = vector.broadcast %602 : vector<2x1xf32> to vector<2x16xf32>
    %604 = arith.mulf %603, %489 : vector<2x16xf32>
    %605 = arith.addf %600, %604 : vector<2x16xf32>
    %606 = vector.broadcast %598 : vector<2x1xf32> to vector<2x16xf32>
    %607 = arith.mulf %606, %592 : vector<2x16xf32>
    %cst_156 = arith.constant 1.000000e+00 : f32
    %608 = vector.broadcast %cst_156 : f32 to vector<2x1xf32>
    %609 = arith.subf %608, %598 : vector<2x1xf32>
    %610 = vector.broadcast %609 : vector<2x1xf32> to vector<2x16xf32>
    %611 = arith.mulf %610, %496 : vector<2x16xf32>
    %612 = arith.addf %607, %611 : vector<2x16xf32>
    %613 = vector.broadcast %598 : vector<2x1xf32> to vector<2x16xf32>
    %614 = arith.mulf %613, %594 : vector<2x16xf32>
    %615 = vector.extract_strided_slice %26 {offsets = [5, 0, 0], sizes = [1, 2, 32], strides = [1, 1, 1]} : vector<8x2x32xf32> to vector<1x2x32xf32>
    %616 = vector.shape_cast %615 : vector<1x2x32xf32> to vector<2x32xf32>
    %cst_157 = arith.constant dense<0.000000e+00> : vector<2x64xf32>
    %617 = tpu.matmul %616, %28, %cst_157 {dimension_numbers = #tpu.dot_dimension_numbers<[1], [0], [0], [1], [0, 0, 1, 1], [], []>} : vector<2x32xf32>, vector<32x64xf32>, vector<2x64xf32> -> vector<2x64xf32>
    %618 = vector.broadcast %30 : vector<1x64xf32> to vector<2x64xf32>
    %619 = arith.addf %617, %618 : vector<2x64xf32>
    %cst_158 = arith.constant dense<0.000000e+00> : vector<2x64xf32>
    %620 = tpu.matmul %547, %32, %cst_158 {dimension_numbers = #tpu.dot_dimension_numbers<[1], [0], [0], [1], [0, 0, 1, 1], [], []>} : vector<2x16xf32>, vector<16x64xf32>, vector<2x64xf32> -> vector<2x64xf32>
    %621 = arith.addf %619, %620 : vector<2x64xf32>
    %622 = vector.extract_strided_slice %621 {offsets = [0, 0], sizes = [2, 16], strides = [1, 1]} : vector<2x64xf32> to vector<2x16xf32>
    %cst_159 = arith.constant 0.000000e+00 : f32
    %623 = vector.broadcast %cst_159 : f32 to vector<2x16xf32>
    %624 = arith.subf %623, %622 : vector<2x16xf32>
    %625 = math.exp %624 : vector<2x16xf32>
    %cst_160 = arith.constant 1.000000e+00 : f32
    %626 = vector.broadcast %cst_160 : f32 to vector<2x16xf32>
    %627 = arith.addf %626, %625 : vector<2x16xf32>
    %cst_161 = arith.constant 1.000000e+00 : f32
    %628 = vector.broadcast %cst_161 : f32 to vector<2x16xf32>
    %629 = arith.divf %628, %627 : vector<2x16xf32>
    %630 = vector.extract_strided_slice %621 {offsets = [0, 16], sizes = [2, 16], strides = [1, 1]} : vector<2x64xf32> to vector<2x16xf32>
    %cst_162 = arith.constant 0.000000e+00 : f32
    %631 = vector.broadcast %cst_162 : f32 to vector<2x16xf32>
    %632 = arith.subf %631, %630 : vector<2x16xf32>
    %633 = math.exp %632 : vector<2x16xf32>
    %cst_163 = arith.constant 1.000000e+00 : f32
    %634 = vector.broadcast %cst_163 : f32 to vector<2x16xf32>
    %635 = arith.addf %634, %633 : vector<2x16xf32>
    %cst_164 = arith.constant 1.000000e+00 : f32
    %636 = vector.broadcast %cst_164 : f32 to vector<2x16xf32>
    %637 = arith.divf %636, %635 : vector<2x16xf32>
    %638 = vector.extract_strided_slice %621 {offsets = [0, 32], sizes = [2, 16], strides = [1, 1]} : vector<2x64xf32> to vector<2x16xf32>
    %639 = math.tanh %638 : vector<2x16xf32>
    %640 = vector.extract_strided_slice %621 {offsets = [0, 48], sizes = [2, 16], strides = [1, 1]} : vector<2x64xf32> to vector<2x16xf32>
    %cst_165 = arith.constant 0.000000e+00 : f32
    %641 = vector.broadcast %cst_165 : f32 to vector<2x16xf32>
    %642 = arith.subf %641, %640 : vector<2x16xf32>
    %643 = math.exp %642 : vector<2x16xf32>
    %cst_166 = arith.constant 1.000000e+00 : f32
    %644 = vector.broadcast %cst_166 : f32 to vector<2x16xf32>
    %645 = arith.addf %644, %643 : vector<2x16xf32>
    %cst_167 = arith.constant 1.000000e+00 : f32
    %646 = vector.broadcast %cst_167 : f32 to vector<2x16xf32>
    %647 = arith.divf %646, %645 : vector<2x16xf32>
    %648 = arith.mulf %637, %554 : vector<2x16xf32>
    %649 = arith.mulf %629, %639 : vector<2x16xf32>
    %650 = arith.addf %648, %649 : vector<2x16xf32>
    %651 = math.tanh %650 : vector<2x16xf32>
    %652 = arith.mulf %647, %651 : vector<2x16xf32>
    %c5_i32_168 = arith.constant 5 : i32
    %653 = vector.broadcast %c5_i32_168 : i32 to vector<2x1xi32>
    %654 = arith.cmpi sgt, %27, %653 : vector<2x1xi32>
    %655 = arith.extui %654 : vector<2x1xi1> to vector<2x1xi32>
    %656 = arith.sitofp %655 : vector<2x1xi32> to vector<2x1xf32>
    %657 = vector.broadcast %656 : vector<2x1xf32> to vector<2x16xf32>
    %658 = arith.mulf %657, %652 : vector<2x16xf32>
    %cst_169 = arith.constant 1.000000e+00 : f32
    %659 = vector.broadcast %cst_169 : f32 to vector<2x1xf32>
    %660 = arith.subf %659, %656 : vector<2x1xf32>
    %661 = vector.broadcast %660 : vector<2x1xf32> to vector<2x16xf32>
    %662 = arith.mulf %661, %547 : vector<2x16xf32>
    %663 = arith.addf %658, %662 : vector<2x16xf32>
    %664 = vector.broadcast %656 : vector<2x1xf32> to vector<2x16xf32>
    %665 = arith.mulf %664, %650 : vector<2x16xf32>
    %cst_170 = arith.constant 1.000000e+00 : f32
    %666 = vector.broadcast %cst_170 : f32 to vector<2x1xf32>
    %667 = arith.subf %666, %656 : vector<2x1xf32>
    %668 = vector.broadcast %667 : vector<2x1xf32> to vector<2x16xf32>
    %669 = arith.mulf %668, %554 : vector<2x16xf32>
    %670 = arith.addf %665, %669 : vector<2x16xf32>
    %671 = vector.broadcast %656 : vector<2x1xf32> to vector<2x16xf32>
    %672 = arith.mulf %671, %652 : vector<2x16xf32>
    %673 = vector.extract_strided_slice %26 {offsets = [2, 0, 0], sizes = [1, 2, 32], strides = [1, 1, 1]} : vector<8x2x32xf32> to vector<1x2x32xf32>
    %674 = vector.shape_cast %673 : vector<1x2x32xf32> to vector<2x32xf32>
    %cst_171 = arith.constant dense<0.000000e+00> : vector<2x64xf32>
    %675 = tpu.matmul %674, %29, %cst_171 {dimension_numbers = #tpu.dot_dimension_numbers<[1], [0], [0], [1], [0, 0, 1, 1], [], []>} : vector<2x32xf32>, vector<32x64xf32>, vector<2x64xf32> -> vector<2x64xf32>
    %676 = vector.broadcast %31 : vector<1x64xf32> to vector<2x64xf32>
    %677 = arith.addf %675, %676 : vector<2x64xf32>
    %cst_172 = arith.constant dense<0.000000e+00> : vector<2x64xf32>
    %678 = tpu.matmul %605, %33, %cst_172 {dimension_numbers = #tpu.dot_dimension_numbers<[1], [0], [0], [1], [0, 0, 1, 1], [], []>} : vector<2x16xf32>, vector<16x64xf32>, vector<2x64xf32> -> vector<2x64xf32>
    %679 = arith.addf %677, %678 : vector<2x64xf32>
    %680 = vector.extract_strided_slice %679 {offsets = [0, 0], sizes = [2, 16], strides = [1, 1]} : vector<2x64xf32> to vector<2x16xf32>
    %cst_173 = arith.constant 0.000000e+00 : f32
    %681 = vector.broadcast %cst_173 : f32 to vector<2x16xf32>
    %682 = arith.subf %681, %680 : vector<2x16xf32>
    %683 = math.exp %682 : vector<2x16xf32>
    %cst_174 = arith.constant 1.000000e+00 : f32
    %684 = vector.broadcast %cst_174 : f32 to vector<2x16xf32>
    %685 = arith.addf %684, %683 : vector<2x16xf32>
    %cst_175 = arith.constant 1.000000e+00 : f32
    %686 = vector.broadcast %cst_175 : f32 to vector<2x16xf32>
    %687 = arith.divf %686, %685 : vector<2x16xf32>
    %688 = vector.extract_strided_slice %679 {offsets = [0, 16], sizes = [2, 16], strides = [1, 1]} : vector<2x64xf32> to vector<2x16xf32>
    %cst_176 = arith.constant 0.000000e+00 : f32
    %689 = vector.broadcast %cst_176 : f32 to vector<2x16xf32>
    %690 = arith.subf %689, %688 : vector<2x16xf32>
    %691 = math.exp %690 : vector<2x16xf32>
    %cst_177 = arith.constant 1.000000e+00 : f32
    %692 = vector.broadcast %cst_177 : f32 to vector<2x16xf32>
    %693 = arith.addf %692, %691 : vector<2x16xf32>
    %cst_178 = arith.constant 1.000000e+00 : f32
    %694 = vector.broadcast %cst_178 : f32 to vector<2x16xf32>
    %695 = arith.divf %694, %693 : vector<2x16xf32>
    %696 = vector.extract_strided_slice %679 {offsets = [0, 32], sizes = [2, 16], strides = [1, 1]} : vector<2x64xf32> to vector<2x16xf32>
    %697 = math.tanh %696 : vector<2x16xf32>
    %698 = vector.extract_strided_slice %679 {offsets = [0, 48], sizes = [2, 16], strides = [1, 1]} : vector<2x64xf32> to vector<2x16xf32>
    %cst_179 = arith.constant 0.000000e+00 : f32
    %699 = vector.broadcast %cst_179 : f32 to vector<2x16xf32>
    %700 = arith.subf %699, %698 : vector<2x16xf32>
    %701 = math.exp %700 : vector<2x16xf32>
    %cst_180 = arith.constant 1.000000e+00 : f32
    %702 = vector.broadcast %cst_180 : f32 to vector<2x16xf32>
    %703 = arith.addf %702, %701 : vector<2x16xf32>
    %cst_181 = arith.constant 1.000000e+00 : f32
    %704 = vector.broadcast %cst_181 : f32 to vector<2x16xf32>
    %705 = arith.divf %704, %703 : vector<2x16xf32>
    %706 = arith.mulf %695, %612 : vector<2x16xf32>
    %707 = arith.mulf %687, %697 : vector<2x16xf32>
    %708 = arith.addf %706, %707 : vector<2x16xf32>
    %709 = math.tanh %708 : vector<2x16xf32>
    %710 = arith.mulf %705, %709 : vector<2x16xf32>
    %c2_i32_182 = arith.constant 2 : i32
    %711 = vector.broadcast %c2_i32_182 : i32 to vector<2x1xi32>
    %712 = arith.cmpi sgt, %27, %711 : vector<2x1xi32>
    %713 = arith.extui %712 : vector<2x1xi1> to vector<2x1xi32>
    %714 = arith.sitofp %713 : vector<2x1xi32> to vector<2x1xf32>
    %715 = vector.broadcast %714 : vector<2x1xf32> to vector<2x16xf32>
    %716 = arith.mulf %715, %710 : vector<2x16xf32>
    %cst_183 = arith.constant 1.000000e+00 : f32
    %717 = vector.broadcast %cst_183 : f32 to vector<2x1xf32>
    %718 = arith.subf %717, %714 : vector<2x1xf32>
    %719 = vector.broadcast %718 : vector<2x1xf32> to vector<2x16xf32>
    %720 = arith.mulf %719, %605 : vector<2x16xf32>
    %721 = arith.addf %716, %720 : vector<2x16xf32>
    %722 = vector.broadcast %714 : vector<2x1xf32> to vector<2x16xf32>
    %723 = arith.mulf %722, %708 : vector<2x16xf32>
    %cst_184 = arith.constant 1.000000e+00 : f32
    %724 = vector.broadcast %cst_184 : f32 to vector<2x1xf32>
    %725 = arith.subf %724, %714 : vector<2x1xf32>
    %726 = vector.broadcast %725 : vector<2x1xf32> to vector<2x16xf32>
    %727 = arith.mulf %726, %612 : vector<2x16xf32>
    %728 = arith.addf %723, %727 : vector<2x16xf32>
    %729 = vector.broadcast %714 : vector<2x1xf32> to vector<2x16xf32>
    %730 = arith.mulf %729, %710 : vector<2x16xf32>
    %731 = vector.extract_strided_slice %26 {offsets = [6, 0, 0], sizes = [1, 2, 32], strides = [1, 1, 1]} : vector<8x2x32xf32> to vector<1x2x32xf32>
    %732 = vector.shape_cast %731 : vector<1x2x32xf32> to vector<2x32xf32>
    %cst_185 = arith.constant dense<0.000000e+00> : vector<2x64xf32>
    %733 = tpu.matmul %732, %28, %cst_185 {dimension_numbers = #tpu.dot_dimension_numbers<[1], [0], [0], [1], [0, 0, 1, 1], [], []>} : vector<2x32xf32>, vector<32x64xf32>, vector<2x64xf32> -> vector<2x64xf32>
    %734 = vector.broadcast %30 : vector<1x64xf32> to vector<2x64xf32>
    %735 = arith.addf %733, %734 : vector<2x64xf32>
    %cst_186 = arith.constant dense<0.000000e+00> : vector<2x64xf32>
    %736 = tpu.matmul %663, %32, %cst_186 {dimension_numbers = #tpu.dot_dimension_numbers<[1], [0], [0], [1], [0, 0, 1, 1], [], []>} : vector<2x16xf32>, vector<16x64xf32>, vector<2x64xf32> -> vector<2x64xf32>
    %737 = arith.addf %735, %736 : vector<2x64xf32>
    %738 = vector.extract_strided_slice %737 {offsets = [0, 0], sizes = [2, 16], strides = [1, 1]} : vector<2x64xf32> to vector<2x16xf32>
    %cst_187 = arith.constant 0.000000e+00 : f32
    %739 = vector.broadcast %cst_187 : f32 to vector<2x16xf32>
    %740 = arith.subf %739, %738 : vector<2x16xf32>
    %741 = math.exp %740 : vector<2x16xf32>
    %cst_188 = arith.constant 1.000000e+00 : f32
    %742 = vector.broadcast %cst_188 : f32 to vector<2x16xf32>
    %743 = arith.addf %742, %741 : vector<2x16xf32>
    %cst_189 = arith.constant 1.000000e+00 : f32
    %744 = vector.broadcast %cst_189 : f32 to vector<2x16xf32>
    %745 = arith.divf %744, %743 : vector<2x16xf32>
    %746 = vector.extract_strided_slice %737 {offsets = [0, 16], sizes = [2, 16], strides = [1, 1]} : vector<2x64xf32> to vector<2x16xf32>
    %cst_190 = arith.constant 0.000000e+00 : f32
    %747 = vector.broadcast %cst_190 : f32 to vector<2x16xf32>
    %748 = arith.subf %747, %746 : vector<2x16xf32>
    %749 = math.exp %748 : vector<2x16xf32>
    %cst_191 = arith.constant 1.000000e+00 : f32
    %750 = vector.broadcast %cst_191 : f32 to vector<2x16xf32>
    %751 = arith.addf %750, %749 : vector<2x16xf32>
    %cst_192 = arith.constant 1.000000e+00 : f32
    %752 = vector.broadcast %cst_192 : f32 to vector<2x16xf32>
    %753 = arith.divf %752, %751 : vector<2x16xf32>
    %754 = vector.extract_strided_slice %737 {offsets = [0, 32], sizes = [2, 16], strides = [1, 1]} : vector<2x64xf32> to vector<2x16xf32>
    %755 = math.tanh %754 : vector<2x16xf32>
    %756 = vector.extract_strided_slice %737 {offsets = [0, 48], sizes = [2, 16], strides = [1, 1]} : vector<2x64xf32> to vector<2x16xf32>
    %cst_193 = arith.constant 0.000000e+00 : f32
    %757 = vector.broadcast %cst_193 : f32 to vector<2x16xf32>
    %758 = arith.subf %757, %756 : vector<2x16xf32>
    %759 = math.exp %758 : vector<2x16xf32>
    %cst_194 = arith.constant 1.000000e+00 : f32
    %760 = vector.broadcast %cst_194 : f32 to vector<2x16xf32>
    %761 = arith.addf %760, %759 : vector<2x16xf32>
    %cst_195 = arith.constant 1.000000e+00 : f32
    %762 = vector.broadcast %cst_195 : f32 to vector<2x16xf32>
    %763 = arith.divf %762, %761 : vector<2x16xf32>
    %764 = arith.mulf %753, %670 : vector<2x16xf32>
    %765 = arith.mulf %745, %755 : vector<2x16xf32>
    %766 = arith.addf %764, %765 : vector<2x16xf32>
    %767 = math.tanh %766 : vector<2x16xf32>
    %768 = arith.mulf %763, %767 : vector<2x16xf32>
    %c6_i32_196 = arith.constant 6 : i32
    %769 = vector.broadcast %c6_i32_196 : i32 to vector<2x1xi32>
    %770 = arith.cmpi sgt, %27, %769 : vector<2x1xi32>
    %771 = arith.extui %770 : vector<2x1xi1> to vector<2x1xi32>
    %772 = arith.sitofp %771 : vector<2x1xi32> to vector<2x1xf32>
    %773 = vector.broadcast %772 : vector<2x1xf32> to vector<2x16xf32>
    %774 = arith.mulf %773, %768 : vector<2x16xf32>
    %cst_197 = arith.constant 1.000000e+00 : f32
    %775 = vector.broadcast %cst_197 : f32 to vector<2x1xf32>
    %776 = arith.subf %775, %772 : vector<2x1xf32>
    %777 = vector.broadcast %776 : vector<2x1xf32> to vector<2x16xf32>
    %778 = arith.mulf %777, %663 : vector<2x16xf32>
    %779 = arith.addf %774, %778 : vector<2x16xf32>
    %780 = vector.broadcast %772 : vector<2x1xf32> to vector<2x16xf32>
    %781 = arith.mulf %780, %766 : vector<2x16xf32>
    %cst_198 = arith.constant 1.000000e+00 : f32
    %782 = vector.broadcast %cst_198 : f32 to vector<2x1xf32>
    %783 = arith.subf %782, %772 : vector<2x1xf32>
    %784 = vector.broadcast %783 : vector<2x1xf32> to vector<2x16xf32>
    %785 = arith.mulf %784, %670 : vector<2x16xf32>
    %786 = arith.addf %781, %785 : vector<2x16xf32>
    %787 = vector.broadcast %772 : vector<2x1xf32> to vector<2x16xf32>
    %788 = arith.mulf %787, %768 : vector<2x16xf32>
    %789 = vector.extract_strided_slice %26 {offsets = [1, 0, 0], sizes = [1, 2, 32], strides = [1, 1, 1]} : vector<8x2x32xf32> to vector<1x2x32xf32>
    %790 = vector.shape_cast %789 : vector<1x2x32xf32> to vector<2x32xf32>
    %cst_199 = arith.constant dense<0.000000e+00> : vector<2x64xf32>
    %791 = tpu.matmul %790, %29, %cst_199 {dimension_numbers = #tpu.dot_dimension_numbers<[1], [0], [0], [1], [0, 0, 1, 1], [], []>} : vector<2x32xf32>, vector<32x64xf32>, vector<2x64xf32> -> vector<2x64xf32>
    %792 = vector.broadcast %31 : vector<1x64xf32> to vector<2x64xf32>
    %793 = arith.addf %791, %792 : vector<2x64xf32>
    %cst_200 = arith.constant dense<0.000000e+00> : vector<2x64xf32>
    %794 = tpu.matmul %721, %33, %cst_200 {dimension_numbers = #tpu.dot_dimension_numbers<[1], [0], [0], [1], [0, 0, 1, 1], [], []>} : vector<2x16xf32>, vector<16x64xf32>, vector<2x64xf32> -> vector<2x64xf32>
    %795 = arith.addf %793, %794 : vector<2x64xf32>
    %796 = vector.extract_strided_slice %795 {offsets = [0, 0], sizes = [2, 16], strides = [1, 1]} : vector<2x64xf32> to vector<2x16xf32>
    %cst_201 = arith.constant 0.000000e+00 : f32
    %797 = vector.broadcast %cst_201 : f32 to vector<2x16xf32>
    %798 = arith.subf %797, %796 : vector<2x16xf32>
    %799 = math.exp %798 : vector<2x16xf32>
    %cst_202 = arith.constant 1.000000e+00 : f32
    %800 = vector.broadcast %cst_202 : f32 to vector<2x16xf32>
    %801 = arith.addf %800, %799 : vector<2x16xf32>
    %cst_203 = arith.constant 1.000000e+00 : f32
    %802 = vector.broadcast %cst_203 : f32 to vector<2x16xf32>
    %803 = arith.divf %802, %801 : vector<2x16xf32>
    %804 = vector.extract_strided_slice %795 {offsets = [0, 16], sizes = [2, 16], strides = [1, 1]} : vector<2x64xf32> to vector<2x16xf32>
    %cst_204 = arith.constant 0.000000e+00 : f32
    %805 = vector.broadcast %cst_204 : f32 to vector<2x16xf32>
    %806 = arith.subf %805, %804 : vector<2x16xf32>
    %807 = math.exp %806 : vector<2x16xf32>
    %cst_205 = arith.constant 1.000000e+00 : f32
    %808 = vector.broadcast %cst_205 : f32 to vector<2x16xf32>
    %809 = arith.addf %808, %807 : vector<2x16xf32>
    %cst_206 = arith.constant 1.000000e+00 : f32
    %810 = vector.broadcast %cst_206 : f32 to vector<2x16xf32>
    %811 = arith.divf %810, %809 : vector<2x16xf32>
    %812 = vector.extract_strided_slice %795 {offsets = [0, 32], sizes = [2, 16], strides = [1, 1]} : vector<2x64xf32> to vector<2x16xf32>
    %813 = math.tanh %812 : vector<2x16xf32>
    %814 = vector.extract_strided_slice %795 {offsets = [0, 48], sizes = [2, 16], strides = [1, 1]} : vector<2x64xf32> to vector<2x16xf32>
    %cst_207 = arith.constant 0.000000e+00 : f32
    %815 = vector.broadcast %cst_207 : f32 to vector<2x16xf32>
    %816 = arith.subf %815, %814 : vector<2x16xf32>
    %817 = math.exp %816 : vector<2x16xf32>
    %cst_208 = arith.constant 1.000000e+00 : f32
    %818 = vector.broadcast %cst_208 : f32 to vector<2x16xf32>
    %819 = arith.addf %818, %817 : vector<2x16xf32>
    %cst_209 = arith.constant 1.000000e+00 : f32
    %820 = vector.broadcast %cst_209 : f32 to vector<2x16xf32>
    %821 = arith.divf %820, %819 : vector<2x16xf32>
    %822 = arith.mulf %811, %728 : vector<2x16xf32>
    %823 = arith.mulf %803, %813 : vector<2x16xf32>
    %824 = arith.addf %822, %823 : vector<2x16xf32>
    %825 = math.tanh %824 : vector<2x16xf32>
    %826 = arith.mulf %821, %825 : vector<2x16xf32>
    %c1_i32_210 = arith.constant 1 : i32
    %827 = vector.broadcast %c1_i32_210 : i32 to vector<2x1xi32>
    %828 = arith.cmpi sgt, %27, %827 : vector<2x1xi32>
    %829 = arith.extui %828 : vector<2x1xi1> to vector<2x1xi32>
    %830 = arith.sitofp %829 : vector<2x1xi32> to vector<2x1xf32>
    %831 = vector.broadcast %830 : vector<2x1xf32> to vector<2x16xf32>
    %832 = arith.mulf %831, %826 : vector<2x16xf32>
    %cst_211 = arith.constant 1.000000e+00 : f32
    %833 = vector.broadcast %cst_211 : f32 to vector<2x1xf32>
    %834 = arith.subf %833, %830 : vector<2x1xf32>
    %835 = vector.broadcast %834 : vector<2x1xf32> to vector<2x16xf32>
    %836 = arith.mulf %835, %721 : vector<2x16xf32>
    %837 = arith.addf %832, %836 : vector<2x16xf32>
    %838 = vector.broadcast %830 : vector<2x1xf32> to vector<2x16xf32>
    %839 = arith.mulf %838, %824 : vector<2x16xf32>
    %cst_212 = arith.constant 1.000000e+00 : f32
    %840 = vector.broadcast %cst_212 : f32 to vector<2x1xf32>
    %841 = arith.subf %840, %830 : vector<2x1xf32>
    %842 = vector.broadcast %841 : vector<2x1xf32> to vector<2x16xf32>
    %843 = arith.mulf %842, %728 : vector<2x16xf32>
    %844 = arith.addf %839, %843 : vector<2x16xf32>
    %845 = vector.broadcast %830 : vector<2x1xf32> to vector<2x16xf32>
    %846 = arith.mulf %845, %826 : vector<2x16xf32>
    %847 = vector.extract_strided_slice %26 {offsets = [7, 0, 0], sizes = [1, 2, 32], strides = [1, 1, 1]} : vector<8x2x32xf32> to vector<1x2x32xf32>
    %848 = vector.shape_cast %847 : vector<1x2x32xf32> to vector<2x32xf32>
    %cst_213 = arith.constant dense<0.000000e+00> : vector<2x64xf32>
    %849 = tpu.matmul %848, %28, %cst_213 {dimension_numbers = #tpu.dot_dimension_numbers<[1], [0], [0], [1], [0, 0, 1, 1], [], []>} : vector<2x32xf32>, vector<32x64xf32>, vector<2x64xf32> -> vector<2x64xf32>
    %850 = vector.broadcast %30 : vector<1x64xf32> to vector<2x64xf32>
    %851 = arith.addf %849, %850 : vector<2x64xf32>
    %cst_214 = arith.constant dense<0.000000e+00> : vector<2x64xf32>
    %852 = tpu.matmul %779, %32, %cst_214 {dimension_numbers = #tpu.dot_dimension_numbers<[1], [0], [0], [1], [0, 0, 1, 1], [], []>} : vector<2x16xf32>, vector<16x64xf32>, vector<2x64xf32> -> vector<2x64xf32>
    %853 = arith.addf %851, %852 : vector<2x64xf32>
    %854 = vector.extract_strided_slice %853 {offsets = [0, 0], sizes = [2, 16], strides = [1, 1]} : vector<2x64xf32> to vector<2x16xf32>
    %cst_215 = arith.constant 0.000000e+00 : f32
    %855 = vector.broadcast %cst_215 : f32 to vector<2x16xf32>
    %856 = arith.subf %855, %854 : vector<2x16xf32>
    %857 = math.exp %856 : vector<2x16xf32>
    %cst_216 = arith.constant 1.000000e+00 : f32
    %858 = vector.broadcast %cst_216 : f32 to vector<2x16xf32>
    %859 = arith.addf %858, %857 : vector<2x16xf32>
    %cst_217 = arith.constant 1.000000e+00 : f32
    %860 = vector.broadcast %cst_217 : f32 to vector<2x16xf32>
    %861 = arith.divf %860, %859 : vector<2x16xf32>
    %862 = vector.extract_strided_slice %853 {offsets = [0, 16], sizes = [2, 16], strides = [1, 1]} : vector<2x64xf32> to vector<2x16xf32>
    %cst_218 = arith.constant 0.000000e+00 : f32
    %863 = vector.broadcast %cst_218 : f32 to vector<2x16xf32>
    %864 = arith.subf %863, %862 : vector<2x16xf32>
    %865 = math.exp %864 : vector<2x16xf32>
    %cst_219 = arith.constant 1.000000e+00 : f32
    %866 = vector.broadcast %cst_219 : f32 to vector<2x16xf32>
    %867 = arith.addf %866, %865 : vector<2x16xf32>
    %cst_220 = arith.constant 1.000000e+00 : f32
    %868 = vector.broadcast %cst_220 : f32 to vector<2x16xf32>
    %869 = arith.divf %868, %867 : vector<2x16xf32>
    %870 = vector.extract_strided_slice %853 {offsets = [0, 32], sizes = [2, 16], strides = [1, 1]} : vector<2x64xf32> to vector<2x16xf32>
    %871 = math.tanh %870 : vector<2x16xf32>
    %872 = vector.extract_strided_slice %853 {offsets = [0, 48], sizes = [2, 16], strides = [1, 1]} : vector<2x64xf32> to vector<2x16xf32>
    %cst_221 = arith.constant 0.000000e+00 : f32
    %873 = vector.broadcast %cst_221 : f32 to vector<2x16xf32>
    %874 = arith.subf %873, %872 : vector<2x16xf32>
    %875 = math.exp %874 : vector<2x16xf32>
    %cst_222 = arith.constant 1.000000e+00 : f32
    %876 = vector.broadcast %cst_222 : f32 to vector<2x16xf32>
    %877 = arith.addf %876, %875 : vector<2x16xf32>
    %cst_223 = arith.constant 1.000000e+00 : f32
    %878 = vector.broadcast %cst_223 : f32 to vector<2x16xf32>
    %879 = arith.divf %878, %877 : vector<2x16xf32>
    %880 = arith.mulf %869, %786 : vector<2x16xf32>
    %881 = arith.mulf %861, %871 : vector<2x16xf32>
    %882 = arith.addf %880, %881 : vector<2x16xf32>
    %883 = math.tanh %882 : vector<2x16xf32>
    %884 = arith.mulf %879, %883 : vector<2x16xf32>
    %c7_i32_224 = arith.constant 7 : i32
    %885 = vector.broadcast %c7_i32_224 : i32 to vector<2x1xi32>
    %886 = arith.cmpi sgt, %27, %885 : vector<2x1xi32>
    %887 = arith.extui %886 : vector<2x1xi1> to vector<2x1xi32>
    %888 = arith.sitofp %887 : vector<2x1xi32> to vector<2x1xf32>
    %889 = vector.broadcast %888 : vector<2x1xf32> to vector<2x16xf32>
    %890 = arith.mulf %889, %884 : vector<2x16xf32>
    %891 = vector.extract_strided_slice %26 {offsets = [0, 0, 0], sizes = [1, 2, 32], strides = [1, 1, 1]} : vector<8x2x32xf32> to vector<1x2x32xf32>
    %892 = vector.shape_cast %891 : vector<1x2x32xf32> to vector<2x32xf32>
    %cst_225 = arith.constant dense<0.000000e+00> : vector<2x64xf32>
    %893 = tpu.matmul %892, %29, %cst_225 {dimension_numbers = #tpu.dot_dimension_numbers<[1], [0], [0], [1], [0, 0, 1, 1], [], []>} : vector<2x32xf32>, vector<32x64xf32>, vector<2x64xf32> -> vector<2x64xf32>
    %894 = vector.broadcast %31 : vector<1x64xf32> to vector<2x64xf32>
    %895 = arith.addf %893, %894 : vector<2x64xf32>
    %cst_226 = arith.constant dense<0.000000e+00> : vector<2x64xf32>
    %896 = tpu.matmul %837, %33, %cst_226 {dimension_numbers = #tpu.dot_dimension_numbers<[1], [0], [0], [1], [0, 0, 1, 1], [], []>} : vector<2x16xf32>, vector<16x64xf32>, vector<2x64xf32> -> vector<2x64xf32>
    %897 = arith.addf %895, %896 : vector<2x64xf32>
    %898 = vector.extract_strided_slice %897 {offsets = [0, 0], sizes = [2, 16], strides = [1, 1]} : vector<2x64xf32> to vector<2x16xf32>
    %cst_227 = arith.constant 0.000000e+00 : f32
    %899 = vector.broadcast %cst_227 : f32 to vector<2x16xf32>
    %900 = arith.subf %899, %898 : vector<2x16xf32>
    %901 = math.exp %900 : vector<2x16xf32>
    %cst_228 = arith.constant 1.000000e+00 : f32
    %902 = vector.broadcast %cst_228 : f32 to vector<2x16xf32>
    %903 = arith.addf %902, %901 : vector<2x16xf32>
    %cst_229 = arith.constant 1.000000e+00 : f32
    %904 = vector.broadcast %cst_229 : f32 to vector<2x16xf32>
    %905 = arith.divf %904, %903 : vector<2x16xf32>
    %906 = vector.extract_strided_slice %897 {offsets = [0, 16], sizes = [2, 16], strides = [1, 1]} : vector<2x64xf32> to vector<2x16xf32>
    %cst_230 = arith.constant 0.000000e+00 : f32
    %907 = vector.broadcast %cst_230 : f32 to vector<2x16xf32>
    %908 = arith.subf %907, %906 : vector<2x16xf32>
    %909 = math.exp %908 : vector<2x16xf32>
    %cst_231 = arith.constant 1.000000e+00 : f32
    %910 = vector.broadcast %cst_231 : f32 to vector<2x16xf32>
    %911 = arith.addf %910, %909 : vector<2x16xf32>
    %cst_232 = arith.constant 1.000000e+00 : f32
    %912 = vector.broadcast %cst_232 : f32 to vector<2x16xf32>
    %913 = arith.divf %912, %911 : vector<2x16xf32>
    %914 = vector.extract_strided_slice %897 {offsets = [0, 32], sizes = [2, 16], strides = [1, 1]} : vector<2x64xf32> to vector<2x16xf32>
    %915 = math.tanh %914 : vector<2x16xf32>
    %916 = vector.extract_strided_slice %897 {offsets = [0, 48], sizes = [2, 16], strides = [1, 1]} : vector<2x64xf32> to vector<2x16xf32>
    %cst_233 = arith.constant 0.000000e+00 : f32
    %917 = vector.broadcast %cst_233 : f32 to vector<2x16xf32>
    %918 = arith.subf %917, %916 : vector<2x16xf32>
    %919 = math.exp %918 : vector<2x16xf32>
    %cst_234 = arith.constant 1.000000e+00 : f32
    %920 = vector.broadcast %cst_234 : f32 to vector<2x16xf32>
    %921 = arith.addf %920, %919 : vector<2x16xf32>
    %cst_235 = arith.constant 1.000000e+00 : f32
    %922 = vector.broadcast %cst_235 : f32 to vector<2x16xf32>
    %923 = arith.divf %922, %921 : vector<2x16xf32>
    %924 = arith.mulf %913, %844 : vector<2x16xf32>
    %925 = arith.mulf %905, %915 : vector<2x16xf32>
    %926 = arith.addf %924, %925 : vector<2x16xf32>
    %927 = math.tanh %926 : vector<2x16xf32>
    %928 = arith.mulf %923, %927 : vector<2x16xf32>
    %c0_i32_236 = arith.constant 0 : i32
    %929 = vector.broadcast %c0_i32_236 : i32 to vector<2x1xi32>
    %930 = arith.cmpi sgt, %27, %929 : vector<2x1xi32>
    %931 = arith.extui %930 : vector<2x1xi1> to vector<2x1xi32>
    %932 = arith.sitofp %931 : vector<2x1xi32> to vector<2x1xf32>
    %933 = vector.broadcast %932 : vector<2x1xf32> to vector<2x16xf32>
    %934 = arith.mulf %933, %928 : vector<2x16xf32>
    %c0_237 = arith.constant 0 : index
    %c0_238 = arith.constant 0 : index
    %935 = vector.load %arg8[%c0_237, %c0_238] : memref<32x32xf32, #tpu.memory_space<vmem>>, vector<32x32xf32>
    %c0_239 = arith.constant 0 : index
    %c0_240 = arith.constant 0 : index
    %936 = vector.load %arg9[%c0_239, %c0_240] : memref<1x32xf32, #tpu.memory_space<vmem>>, vector<1x32xf32>
    %937 = vector.extract_strided_slice %92 {offsets = [0, 0], sizes = [1, 16], strides = [1, 1]} : vector<2x16xf32> to vector<1x16xf32>
    %938 = vector.extract_strided_slice %208 {offsets = [0, 0], sizes = [1, 16], strides = [1, 1]} : vector<2x16xf32> to vector<1x16xf32>
    %939 = vector.extract_strided_slice %324 {offsets = [0, 0], sizes = [1, 16], strides = [1, 1]} : vector<2x16xf32> to vector<1x16xf32>
    %940 = vector.extract_strided_slice %440 {offsets = [0, 0], sizes = [1, 16], strides = [1, 1]} : vector<2x16xf32> to vector<1x16xf32>
    %941 = vector.extract_strided_slice %556 {offsets = [0, 0], sizes = [1, 16], strides = [1, 1]} : vector<2x16xf32> to vector<1x16xf32>
    %942 = vector.extract_strided_slice %672 {offsets = [0, 0], sizes = [1, 16], strides = [1, 1]} : vector<2x16xf32> to vector<1x16xf32>
    %943 = vector.extract_strided_slice %788 {offsets = [0, 0], sizes = [1, 16], strides = [1, 1]} : vector<2x16xf32> to vector<1x16xf32>
    %944 = vector.extract_strided_slice %890 {offsets = [0, 0], sizes = [1, 16], strides = [1, 1]} : vector<2x16xf32> to vector<1x16xf32>
    %945 = tpu.concatenate %937, %938, %939, %940, %941, %942, %943, %944 in 0 : vector<1x16xf32>, vector<1x16xf32>, vector<1x16xf32>, vector<1x16xf32>, vector<1x16xf32>, vector<1x16xf32>, vector<1x16xf32>, vector<1x16xf32> -> vector<8x16xf32>
    %946 = vector.extract_strided_slice %934 {offsets = [0, 0], sizes = [1, 16], strides = [1, 1]} : vector<2x16xf32> to vector<1x16xf32>
    %947 = vector.extract_strided_slice %846 {offsets = [0, 0], sizes = [1, 16], strides = [1, 1]} : vector<2x16xf32> to vector<1x16xf32>
    %948 = vector.extract_strided_slice %730 {offsets = [0, 0], sizes = [1, 16], strides = [1, 1]} : vector<2x16xf32> to vector<1x16xf32>
    %949 = vector.extract_strided_slice %614 {offsets = [0, 0], sizes = [1, 16], strides = [1, 1]} : vector<2x16xf32> to vector<1x16xf32>
    %950 = vector.extract_strided_slice %498 {offsets = [0, 0], sizes = [1, 16], strides = [1, 1]} : vector<2x16xf32> to vector<1x16xf32>
    %951 = vector.extract_strided_slice %382 {offsets = [0, 0], sizes = [1, 16], strides = [1, 1]} : vector<2x16xf32> to vector<1x16xf32>
    %952 = vector.extract_strided_slice %266 {offsets = [0, 0], sizes = [1, 16], strides = [1, 1]} : vector<2x16xf32> to vector<1x16xf32>
    %953 = vector.extract_strided_slice %150 {offsets = [0, 0], sizes = [1, 16], strides = [1, 1]} : vector<2x16xf32> to vector<1x16xf32>
    %954 = tpu.concatenate %946, %947, %948, %949, %950, %951, %952, %953 in 0 : vector<1x16xf32>, vector<1x16xf32>, vector<1x16xf32>, vector<1x16xf32>, vector<1x16xf32>, vector<1x16xf32>, vector<1x16xf32>, vector<1x16xf32> -> vector<8x16xf32>
    %955 = tpu.concatenate %945, %954 in 1 : vector<8x16xf32>, vector<8x16xf32> -> vector<8x32xf32>
    %cst_241 = arith.constant dense<0.000000e+00> : vector<8x32xf32>
    %956 = tpu.matmul %955, %935, %cst_241 {dimension_numbers = #tpu.dot_dimension_numbers<[1], [0], [0], [1], [0, 0, 1, 1], [], []>} : vector<8x32xf32>, vector<32x32xf32>, vector<8x32xf32> -> vector<8x32xf32>
    %957 = vector.broadcast %936 : vector<1x32xf32> to vector<8x32xf32>
    %958 = arith.addf %956, %957 : vector<8x32xf32>
    %c0_242 = arith.constant 0 : index
    %c0_243 = arith.constant 0 : index
    %c0_244 = arith.constant 0 : index
    %959 = vector.load %arg10[%c0_242, %c0_243, %c0_244] : memref<2x8x32xf32, #tpu.memory_space<vmem>>, vector<1x8x32xf32>
    %960 = vector.shape_cast %959 : vector<1x8x32xf32> to vector<8x32xf32>
    %961 = vector.shape_cast %958 : vector<8x32xf32> to vector<1x8x32xf32>
    tpu.vector_store %arg10[%c0_242, %c0_243, %c0_244], %961 {strides = array<i32>} : memref<2x8x32xf32, #tpu.memory_space<vmem>>, vector<1x8x32xf32>,
    %962 = vector.extract_strided_slice %92 {offsets = [1, 0], sizes = [1, 16], strides = [1, 1]} : vector<2x16xf32> to vector<1x16xf32>
    %963 = vector.extract_strided_slice %208 {offsets = [1, 0], sizes = [1, 16], strides = [1, 1]} : vector<2x16xf32> to vector<1x16xf32>
    %964 = vector.extract_strided_slice %324 {offsets = [1, 0], sizes = [1, 16], strides = [1, 1]} : vector<2x16xf32> to vector<1x16xf32>
    %965 = vector.extract_strided_slice %440 {offsets = [1, 0], sizes = [1, 16], strides = [1, 1]} : vector<2x16xf32> to vector<1x16xf32>
    %966 = vector.extract_strided_slice %556 {offsets = [1, 0], sizes = [1, 16], strides = [1, 1]} : vector<2x16xf32> to vector<1x16xf32>
    %967 = vector.extract_strided_slice %672 {offsets = [1, 0], sizes = [1, 16], strides = [1, 1]} : vector<2x16xf32> to vector<1x16xf32>
    %968 = vector.extract_strided_slice %788 {offsets = [1, 0], sizes = [1, 16], strides = [1, 1]} : vector<2x16xf32> to vector<1x16xf32>
    %969 = vector.extract_strided_slice %890 {offsets = [1, 0], sizes = [1, 16], strides = [1, 1]} : vector<2x16xf32> to vector<1x16xf32>
    %970 = tpu.concatenate %962, %963, %964, %965, %966, %967, %968, %969 in 0 : vector<1x16xf32>, vector<1x16xf32>, vector<1x16xf32>, vector<1x16xf32>, vector<1x16xf32>, vector<1x16xf32>, vector<1x16xf32>, vector<1x16xf32> -> vector<8x16xf32>
    %971 = vector.extract_strided_slice %934 {offsets = [1, 0], sizes = [1, 16], strides = [1, 1]} : vector<2x16xf32> to vector<1x16xf32>
    %972 = vector.extract_strided_slice %846 {offsets = [1, 0], sizes = [1, 16], strides = [1, 1]} : vector<2x16xf32> to vector<1x16xf32>
    %973 = vector.extract_strided_slice %730 {offsets = [1, 0], sizes = [1, 16], strides = [1, 1]} : vector<2x16xf32> to vector<1x16xf32>
    %974 = vector.extract_strided_slice %614 {offsets = [1, 0], sizes = [1, 16], strides = [1, 1]} : vector<2x16xf32> to vector<1x16xf32>
    %975 = vector.extract_strided_slice %498 {offsets = [1, 0], sizes = [1, 16], strides = [1, 1]} : vector<2x16xf32> to vector<1x16xf32>
    %976 = vector.extract_strided_slice %382 {offsets = [1, 0], sizes = [1, 16], strides = [1, 1]} : vector<2x16xf32> to vector<1x16xf32>
    %977 = vector.extract_strided_slice %266 {offsets = [1, 0], sizes = [1, 16], strides = [1, 1]} : vector<2x16xf32> to vector<1x16xf32>
    %978 = vector.extract_strided_slice %150 {offsets = [1, 0], sizes = [1, 16], strides = [1, 1]} : vector<2x16xf32> to vector<1x16xf32>
    %979 = tpu.concatenate %971, %972, %973, %974, %975, %976, %977, %978 in 0 : vector<1x16xf32>, vector<1x16xf32>, vector<1x16xf32>, vector<1x16xf32>, vector<1x16xf32>, vector<1x16xf32>, vector<1x16xf32>, vector<1x16xf32> -> vector<8x16xf32>
    %980 = tpu.concatenate %970, %979 in 1 : vector<8x16xf32>, vector<8x16xf32> -> vector<8x32xf32>
    %cst_245 = arith.constant dense<0.000000e+00> : vector<8x32xf32>
    %981 = tpu.matmul %980, %935, %cst_245 {dimension_numbers = #tpu.dot_dimension_numbers<[1], [0], [0], [1], [0, 0, 1, 1], [], []>} : vector<8x32xf32>, vector<32x32xf32>, vector<8x32xf32> -> vector<8x32xf32>
    %982 = vector.broadcast %936 : vector<1x32xf32> to vector<8x32xf32>
    %983 = arith.addf %981, %982 : vector<8x32xf32>
    %c1 = arith.constant 1 : index
    %c0_246 = arith.constant 0 : index
    %c0_247 = arith.constant 0 : index
    %984 = vector.load %arg10[%c1, %c0_246, %c0_247] : memref<2x8x32xf32, #tpu.memory_space<vmem>>, vector<1x8x32xf32>
    %985 = vector.shape_cast %984 : vector<1x8x32xf32> to vector<8x32xf32>
    %986 = vector.shape_cast %983 : vector<8x32xf32> to vector<1x8x32xf32>
    tpu.vector_store %arg10[%c1, %c0_246, %c0_247], %986 {strides = array<i32>} : memref<2x8x32xf32, #tpu.memory_space<vmem>>, vector<1x8x32xf32>,
    return
  }
}

module attributes {stable_mosaic.version = 11 : i64} {
  func.func @_head_kernel(%arg0: memref<2x8x32xf32, #tpu.memory_space<vmem>>, %arg1: memref<4x32xf32, #tpu.memory_space<vmem>>, %arg2: memref<8x32xf32, #tpu.memory_space<vmem>>, %arg3: memref<32x32xf32, #tpu.memory_space<vmem>>, %arg4: memref<1x32xf32, #tpu.memory_space<vmem>>, %arg5: memref<1x32xf32, #tpu.memory_space<vmem>>, %arg6: memref<1x32xf32, #tpu.memory_space<vmem>>, %arg7: memref<32x64xf32, #tpu.memory_space<vmem>>, %arg8: memref<1x64xf32, #tpu.memory_space<vmem>>, %arg9: memref<32x128xf32, #tpu.memory_space<vmem>>, %arg10: memref<1x128xf32, #tpu.memory_space<vmem>>, %arg11: memref<64x32xf32, #tpu.memory_space<vmem>>, %arg12: memref<1x32xf32, #tpu.memory_space<vmem>>, %arg13: memref<1x32xf32, #tpu.memory_space<vmem>>, %arg14: memref<1x32xf32, #tpu.memory_space<vmem>>, %arg15: memref<32x128xf32, #tpu.memory_space<vmem>>, %arg16: memref<1x128xf32, #tpu.memory_space<vmem>>, %arg17: memref<128x32xf32, #tpu.memory_space<vmem>>, %arg18: memref<1x32xf32, #tpu.memory_space<vmem>>, %arg19: memref<1x32xf32, #tpu.memory_space<vmem>>, %arg20: memref<1x32xf32, #tpu.memory_space<vmem>>, %arg21: memref<8x32xf32, #tpu.memory_space<vmem>>, %arg22: memref<1x8xf32, #tpu.memory_space<vmem>>, %arg23: memref<2x8xf32, #tpu.memory_space<vmem>>) attributes {dimension_semantics = [], scalar_prefetch = 0 : i64, scratch_operands = 0 : i64, tpu.core_type = #tpu.core_type<tc>} {
    %c0 = arith.constant 0 : index
    %c0_0 = arith.constant 0 : index
    %0 = vector.load %arg1[%c0, %c0_0] : memref<4x32xf32, #tpu.memory_space<vmem>>, vector<4x32xf32>
    %c0_1 = arith.constant 0 : index
    %c0_2 = arith.constant 0 : index
    %1 = vector.load %arg2[%c0_1, %c0_2] : memref<8x32xf32, #tpu.memory_space<vmem>>, vector<8x32xf32>
    %c0_3 = arith.constant 0 : index
    %c0_4 = arith.constant 0 : index
    %2 = vector.load %arg3[%c0_3, %c0_4] : memref<32x32xf32, #tpu.memory_space<vmem>>, vector<32x32xf32>
    %cst = arith.constant dense<0.000000e+00> : vector<8x32xf32>
    %3 = tpu.matmul %1, %2, %cst {dimension_numbers = #tpu.dot_dimension_numbers<[1], [0], [0], [1], [0, 0, 1, 1], [], []>} : vector<8x32xf32>, vector<32x32xf32>, vector<8x32xf32> -> vector<8x32xf32>
    %c0_5 = arith.constant 0 : index
    %c0_6 = arith.constant 0 : index
    %4 = vector.load %arg4[%c0_5, %c0_6] : memref<1x32xf32, #tpu.memory_space<vmem>>, vector<1x32xf32>
    %5 = vector.broadcast %4 : vector<1x32xf32> to vector<8x32xf32>
    %6 = arith.addf %3, %5 : vector<8x32xf32>
    %cst_7 = arith.constant dense<0.000000e+00> : vector<4x8xf32>
    %7 = tpu.matmul %0, %6, %cst_7 {dimension_numbers = #tpu.dot_dimension_numbers<[1], [1], [0], [0], [0, 0, 1, 0], [], []>} : vector<4x32xf32>, vector<8x32xf32>, vector<4x8xf32> -> vector<4x8xf32>
    %cst_8 = arith.constant dense<0xFF800000> : vector<4xf32>
    %8 = vector.multi_reduction <maximumf>, %7, %cst_8 [1] : vector<4x8xf32> to vector<4xf32>
    %9 = vector.shape_cast %8 : vector<4xf32> to vector<4x1xf32>
    %10 = vector.broadcast %9 : vector<4x1xf32> to vector<4x8xf32>
    %11 = arith.subf %7, %10 : vector<4x8xf32>
    %12 = math.exp %11 : vector<4x8xf32>
    %cst_9 = arith.constant dense<0.000000e+00> : vector<4xf32>
    %13 = vector.multi_reduction <add>, %12, %cst_9 [1] : vector<4x8xf32> to vector<4xf32>
    %14 = vector.shape_cast %13 : vector<4xf32> to vector<4x1xf32>
    %15 = tpu.reciprocal %14 {approx = true} : vector<4x1xf32> -> vector<4x1xf32>
    %16 = vector.broadcast %15 : vector<4x1xf32> to vector<4x8xf32>
    %17 = arith.mulf %12, %16 : vector<4x8xf32>
    %cst_10 = arith.constant dense<0.000000e+00> : vector<4x32xf32>
    %18 = tpu.matmul %17, %6, %cst_10 {dimension_numbers = #tpu.dot_dimension_numbers<[1], [0], [0], [1], [0, 0, 1, 1], [], []>} : vector<4x8xf32>, vector<8x32xf32>, vector<4x32xf32> -> vector<4x32xf32>
    %19 = arith.addf %0, %18 : vector<4x32xf32>
    %c0_11 = arith.constant 0 : index
    %c0_12 = arith.constant 0 : index
    %20 = vector.load %arg5[%c0_11, %c0_12] : memref<1x32xf32, #tpu.memory_space<vmem>>, vector<1x32xf32>
    %c0_13 = arith.constant 0 : index
    %c0_14 = arith.constant 0 : index
    %21 = vector.load %arg6[%c0_13, %c0_14] : memref<1x32xf32, #tpu.memory_space<vmem>>, vector<1x32xf32>
    %cst_15 = arith.constant dense<0.000000e+00> : vector<4xf32>
    %22 = vector.multi_reduction <add>, %19, %cst_15 [1] : vector<4x32xf32> to vector<4xf32>
    %23 = vector.shape_cast %22 : vector<4xf32> to vector<4x1xf32>
    %cst_16 = arith.constant 3.200000e+01 : f32
    %24 = vector.broadcast %cst_16 : f32 to vector<4x1xf32>
    %25 = arith.divf %23, %24 : vector<4x1xf32>
    %26 = vector.broadcast %25 : vector<4x1xf32> to vector<4x32xf32>
    %27 = arith.subf %19, %26 : vector<4x32xf32>
    %28 = arith.mulf %27, %27 : vector<4x32xf32>
    %cst_17 = arith.constant dense<0.000000e+00> : vector<4xf32>
    %29 = vector.multi_reduction <add>, %28, %cst_17 [1] : vector<4x32xf32> to vector<4xf32>
    %30 = vector.shape_cast %29 : vector<4xf32> to vector<4x1xf32>
    %cst_18 = arith.constant 3.200000e+01 : f32
    %31 = vector.broadcast %cst_18 : f32 to vector<4x1xf32>
    %32 = arith.divf %30, %31 : vector<4x1xf32>
    %33 = vector.broadcast %25 : vector<4x1xf32> to vector<4x32xf32>
    %34 = arith.subf %19, %33 : vector<4x32xf32>
    %cst_19 = arith.constant 9.99999974E-6 : f32
    %35 = vector.broadcast %cst_19 : f32 to vector<4x1xf32>
    %36 = arith.addf %32, %35 : vector<4x1xf32>
    %37 = math.rsqrt %36 : vector<4x1xf32>
    %38 = vector.broadcast %37 : vector<4x1xf32> to vector<4x32xf32>
    %39 = arith.mulf %34, %38 : vector<4x32xf32>
    %40 = vector.broadcast %20 : vector<1x32xf32> to vector<4x32xf32>
    %41 = arith.mulf %39, %40 : vector<4x32xf32>
    %42 = vector.broadcast %21 : vector<1x32xf32> to vector<4x32xf32>
    %43 = arith.addf %41, %42 : vector<4x32xf32>
    %c0_20 = arith.constant 0 : index
    %c0_21 = arith.constant 0 : index
    %c0_22 = arith.constant 0 : index
    %44 = vector.load %arg0[%c0_20, %c0_21, %c0_22] : memref<2x8x32xf32, #tpu.memory_space<vmem>>, vector<2x8x32xf32>
    %c0_23 = arith.constant 0 : index
    %c0_24 = arith.constant 0 : index
    %45 = vector.load %arg7[%c0_23, %c0_24] : memref<32x64xf32, #tpu.memory_space<vmem>>, vector<32x64xf32>
    %cst_25 = arith.constant dense<0.000000e+00> : vector<4x64xf32>
    %46 = tpu.matmul %43, %45, %cst_25 {dimension_numbers = #tpu.dot_dimension_numbers<[1], [0], [0], [1], [0, 0, 1, 1], [], []>} : vector<4x32xf32>, vector<32x64xf32>, vector<4x64xf32> -> vector<4x64xf32>
    %c0_26 = arith.constant 0 : index
    %c0_27 = arith.constant 0 : index
    %47 = vector.load %arg8[%c0_26, %c0_27] : memref<1x64xf32, #tpu.memory_space<vmem>>, vector<1x64xf32>
    %48 = vector.broadcast %47 : vector<1x64xf32> to vector<4x64xf32>
    %49 = arith.addf %46, %48 : vector<4x64xf32>
    %c0_28 = arith.constant 0 : index
    %c0_29 = arith.constant 0 : index
    %50 = vector.load %arg9[%c0_28, %c0_29] : memref<32x128xf32, #tpu.memory_space<vmem>>, vector<32x128xf32>
    %c0_30 = arith.constant 0 : index
    %c0_31 = arith.constant 0 : index
    %51 = vector.load %arg10[%c0_30, %c0_31] : memref<1x128xf32, #tpu.memory_space<vmem>>, vector<1x128xf32>
    %52 = vector.extract_strided_slice %44 {offsets = [0, 0, 0], sizes = [1, 8, 32], strides = [1, 1, 1]} : vector<2x8x32xf32> to vector<1x8x32xf32>
    %53 = vector.shape_cast %52 : vector<1x8x32xf32> to vector<8x32xf32>
    %cst_32 = arith.constant dense<0.000000e+00> : vector<8x128xf32>
    %54 = tpu.matmul %53, %50, %cst_32 {dimension_numbers = #tpu.dot_dimension_numbers<[1], [0], [0], [1], [0, 0, 1, 1], [], []>} : vector<8x32xf32>, vector<32x128xf32>, vector<8x128xf32> -> vector<8x128xf32>
    %55 = vector.broadcast %51 : vector<1x128xf32> to vector<8x128xf32>
    %56 = arith.addf %54, %55 : vector<8x128xf32>
    %57 = vector.extract_strided_slice %49 {offsets = [0, 0], sizes = [4, 32], strides = [1, 1]} : vector<4x64xf32> to vector<4x32xf32>
    %58 = vector.extract_strided_slice %56 {offsets = [0, 0], sizes = [8, 32], strides = [1, 1]} : vector<8x128xf32> to vector<8x32xf32>
    %59 = vector.extract_strided_slice %56 {offsets = [0, 32], sizes = [8, 32], strides = [1, 1]} : vector<8x128xf32> to vector<8x32xf32>
    %cst_33 = arith.constant dense<0.000000e+00> : vector<4x8xf32>
    %60 = tpu.matmul %57, %58, %cst_33 {dimension_numbers = #tpu.dot_dimension_numbers<[1], [1], [0], [0], [0, 0, 1, 0], [], []>} : vector<4x32xf32>, vector<8x32xf32>, vector<4x8xf32> -> vector<4x8xf32>
    %cst_34 = arith.constant 0.176776692 : f32
    %61 = vector.broadcast %cst_34 : f32 to vector<4x8xf32>
    %62 = arith.mulf %60, %61 : vector<4x8xf32>
    %cst_35 = arith.constant dense<0xFF800000> : vector<4xf32>
    %63 = vector.multi_reduction <maximumf>, %62, %cst_35 [1] : vector<4x8xf32> to vector<4xf32>
    %64 = vector.shape_cast %63 : vector<4xf32> to vector<4x1xf32>
    %65 = vector.broadcast %64 : vector<4x1xf32> to vector<4x8xf32>
    %66 = arith.subf %62, %65 : vector<4x8xf32>
    %67 = math.exp %66 : vector<4x8xf32>
    %cst_36 = arith.constant dense<0.000000e+00> : vector<4xf32>
    %68 = vector.multi_reduction <add>, %67, %cst_36 [1] : vector<4x8xf32> to vector<4xf32>
    %69 = vector.shape_cast %68 : vector<4xf32> to vector<4x1xf32>
    %70 = tpu.reciprocal %69 {approx = true} : vector<4x1xf32> -> vector<4x1xf32>
    %71 = vector.broadcast %70 : vector<4x1xf32> to vector<4x8xf32>
    %72 = arith.mulf %67, %71 : vector<4x8xf32>
    %cst_37 = arith.constant dense<0.000000e+00> : vector<4x32xf32>
    %73 = tpu.matmul %72, %59, %cst_37 {dimension_numbers = #tpu.dot_dimension_numbers<[1], [0], [0], [1], [0, 0, 1, 1], [], []>} : vector<4x8xf32>, vector<8x32xf32>, vector<4x32xf32> -> vector<4x32xf32>
    %74 = vector.extract_strided_slice %49 {offsets = [0, 32], sizes = [4, 32], strides = [1, 1]} : vector<4x64xf32> to vector<4x32xf32>
    %75 = vector.extract_strided_slice %56 {offsets = [0, 64], sizes = [8, 32], strides = [1, 1]} : vector<8x128xf32> to vector<8x32xf32>
    %76 = vector.extract_strided_slice %56 {offsets = [0, 96], sizes = [8, 32], strides = [1, 1]} : vector<8x128xf32> to vector<8x32xf32>
    %cst_38 = arith.constant dense<0.000000e+00> : vector<4x8xf32>
    %77 = tpu.matmul %74, %75, %cst_38 {dimension_numbers = #tpu.dot_dimension_numbers<[1], [1], [0], [0], [0, 0, 1, 0], [], []>} : vector<4x32xf32>, vector<8x32xf32>, vector<4x8xf32> -> vector<4x8xf32>
    %cst_39 = arith.constant 0.176776692 : f32
    %78 = vector.broadcast %cst_39 : f32 to vector<4x8xf32>
    %79 = arith.mulf %77, %78 : vector<4x8xf32>
    %cst_40 = arith.constant dense<0xFF800000> : vector<4xf32>
    %80 = vector.multi_reduction <maximumf>, %79, %cst_40 [1] : vector<4x8xf32> to vector<4xf32>
    %81 = vector.shape_cast %80 : vector<4xf32> to vector<4x1xf32>
    %82 = vector.broadcast %81 : vector<4x1xf32> to vector<4x8xf32>
    %83 = arith.subf %79, %82 : vector<4x8xf32>
    %84 = math.exp %83 : vector<4x8xf32>
    %cst_41 = arith.constant dense<0.000000e+00> : vector<4xf32>
    %85 = vector.multi_reduction <add>, %84, %cst_41 [1] : vector<4x8xf32> to vector<4xf32>
    %86 = vector.shape_cast %85 : vector<4xf32> to vector<4x1xf32>
    %87 = tpu.reciprocal %86 {approx = true} : vector<4x1xf32> -> vector<4x1xf32>
    %88 = vector.broadcast %87 : vector<4x1xf32> to vector<4x8xf32>
    %89 = arith.mulf %84, %88 : vector<4x8xf32>
    %cst_42 = arith.constant dense<0.000000e+00> : vector<4x32xf32>
    %90 = tpu.matmul %89, %76, %cst_42 {dimension_numbers = #tpu.dot_dimension_numbers<[1], [0], [0], [1], [0, 0, 1, 1], [], []>} : vector<4x8xf32>, vector<8x32xf32>, vector<4x32xf32> -> vector<4x32xf32>
    %91 = tpu.concatenate %73, %90 in 1 : vector<4x32xf32>, vector<4x32xf32> -> vector<4x64xf32>
    %92 = vector.extract_strided_slice %44 {offsets = [1, 0, 0], sizes = [1, 8, 32], strides = [1, 1, 1]} : vector<2x8x32xf32> to vector<1x8x32xf32>
    %93 = vector.shape_cast %92 : vector<1x8x32xf32> to vector<8x32xf32>
    %cst_43 = arith.constant dense<0.000000e+00> : vector<8x128xf32>
    %94 = tpu.matmul %93, %50, %cst_43 {dimension_numbers = #tpu.dot_dimension_numbers<[1], [0], [0], [1], [0, 0, 1, 1], [], []>} : vector<8x32xf32>, vector<32x128xf32>, vector<8x128xf32> -> vector<8x128xf32>
    %95 = vector.broadcast %51 : vector<1x128xf32> to vector<8x128xf32>
    %96 = arith.addf %94, %95 : vector<8x128xf32>
    %97 = vector.extract_strided_slice %49 {offsets = [0, 0], sizes = [4, 32], strides = [1, 1]} : vector<4x64xf32> to vector<4x32xf32>
    %98 = vector.extract_strided_slice %96 {offsets = [0, 0], sizes = [8, 32], strides = [1, 1]} : vector<8x128xf32> to vector<8x32xf32>
    %99 = vector.extract_strided_slice %96 {offsets = [0, 32], sizes = [8, 32], strides = [1, 1]} : vector<8x128xf32> to vector<8x32xf32>
    %cst_44 = arith.constant dense<0.000000e+00> : vector<4x8xf32>
    %100 = tpu.matmul %97, %98, %cst_44 {dimension_numbers = #tpu.dot_dimension_numbers<[1], [1], [0], [0], [0, 0, 1, 0], [], []>} : vector<4x32xf32>, vector<8x32xf32>, vector<4x8xf32> -> vector<4x8xf32>
    %cst_45 = arith.constant 0.176776692 : f32
    %101 = vector.broadcast %cst_45 : f32 to vector<4x8xf32>
    %102 = arith.mulf %100, %101 : vector<4x8xf32>
    %cst_46 = arith.constant dense<0xFF800000> : vector<4xf32>
    %103 = vector.multi_reduction <maximumf>, %102, %cst_46 [1] : vector<4x8xf32> to vector<4xf32>
    %104 = vector.shape_cast %103 : vector<4xf32> to vector<4x1xf32>
    %105 = vector.broadcast %104 : vector<4x1xf32> to vector<4x8xf32>
    %106 = arith.subf %102, %105 : vector<4x8xf32>
    %107 = math.exp %106 : vector<4x8xf32>
    %cst_47 = arith.constant dense<0.000000e+00> : vector<4xf32>
    %108 = vector.multi_reduction <add>, %107, %cst_47 [1] : vector<4x8xf32> to vector<4xf32>
    %109 = vector.shape_cast %108 : vector<4xf32> to vector<4x1xf32>
    %110 = tpu.reciprocal %109 {approx = true} : vector<4x1xf32> -> vector<4x1xf32>
    %111 = vector.broadcast %110 : vector<4x1xf32> to vector<4x8xf32>
    %112 = arith.mulf %107, %111 : vector<4x8xf32>
    %cst_48 = arith.constant dense<0.000000e+00> : vector<4x32xf32>
    %113 = tpu.matmul %112, %99, %cst_48 {dimension_numbers = #tpu.dot_dimension_numbers<[1], [0], [0], [1], [0, 0, 1, 1], [], []>} : vector<4x8xf32>, vector<8x32xf32>, vector<4x32xf32> -> vector<4x32xf32>
    %114 = vector.extract_strided_slice %49 {offsets = [0, 32], sizes = [4, 32], strides = [1, 1]} : vector<4x64xf32> to vector<4x32xf32>
    %115 = vector.extract_strided_slice %96 {offsets = [0, 64], sizes = [8, 32], strides = [1, 1]} : vector<8x128xf32> to vector<8x32xf32>
    %116 = vector.extract_strided_slice %96 {offsets = [0, 96], sizes = [8, 32], strides = [1, 1]} : vector<8x128xf32> to vector<8x32xf32>
    %cst_49 = arith.constant dense<0.000000e+00> : vector<4x8xf32>
    %117 = tpu.matmul %114, %115, %cst_49 {dimension_numbers = #tpu.dot_dimension_numbers<[1], [1], [0], [0], [0, 0, 1, 0], [], []>} : vector<4x32xf32>, vector<8x32xf32>, vector<4x8xf32> -> vector<4x8xf32>
    %cst_50 = arith.constant 0.176776692 : f32
    %118 = vector.broadcast %cst_50 : f32 to vector<4x8xf32>
    %119 = arith.mulf %117, %118 : vector<4x8xf32>
    %cst_51 = arith.constant dense<0xFF800000> : vector<4xf32>
    %120 = vector.multi_reduction <maximumf>, %119, %cst_51 [1] : vector<4x8xf32> to vector<4xf32>
    %121 = vector.shape_cast %120 : vector<4xf32> to vector<4x1xf32>
    %122 = vector.broadcast %121 : vector<4x1xf32> to vector<4x8xf32>
    %123 = arith.subf %119, %122 : vector<4x8xf32>
    %124 = math.exp %123 : vector<4x8xf32>
    %cst_52 = arith.constant dense<0.000000e+00> : vector<4xf32>
    %125 = vector.multi_reduction <add>, %124, %cst_52 [1] : vector<4x8xf32> to vector<4xf32>
    %126 = vector.shape_cast %125 : vector<4xf32> to vector<4x1xf32>
    %127 = tpu.reciprocal %126 {approx = true} : vector<4x1xf32> -> vector<4x1xf32>
    %128 = vector.broadcast %127 : vector<4x1xf32> to vector<4x8xf32>
    %129 = arith.mulf %124, %128 : vector<4x8xf32>
    %cst_53 = arith.constant dense<0.000000e+00> : vector<4x32xf32>
    %130 = tpu.matmul %129, %116, %cst_53 {dimension_numbers = #tpu.dot_dimension_numbers<[1], [0], [0], [1], [0, 0, 1, 1], [], []>} : vector<4x8xf32>, vector<8x32xf32>, vector<4x32xf32> -> vector<4x32xf32>
    %131 = tpu.concatenate %113, %130 in 1 : vector<4x32xf32>, vector<4x32xf32> -> vector<4x64xf32>
    %132 = tpu.concatenate %91, %131 in 0 : vector<4x64xf32>, vector<4x64xf32> -> vector<8x64xf32>
    %c0_54 = arith.constant 0 : index
    %c0_55 = arith.constant 0 : index
    %133 = vector.load %arg11[%c0_54, %c0_55] : memref<64x32xf32, #tpu.memory_space<vmem>>, vector<64x32xf32>
    %cst_56 = arith.constant dense<0.000000e+00> : vector<8x32xf32>
    %134 = tpu.matmul %132, %133, %cst_56 {dimension_numbers = #tpu.dot_dimension_numbers<[1], [0], [0], [1], [0, 0, 1, 1], [], []>} : vector<8x64xf32>, vector<64x32xf32>, vector<8x32xf32> -> vector<8x32xf32>
    %c0_57 = arith.constant 0 : index
    %c0_58 = arith.constant 0 : index
    %135 = vector.load %arg12[%c0_57, %c0_58] : memref<1x32xf32, #tpu.memory_space<vmem>>, vector<1x32xf32>
    %136 = vector.broadcast %135 : vector<1x32xf32> to vector<8x32xf32>
    %137 = arith.addf %134, %136 : vector<8x32xf32>
    %138 = tpu.concatenate %43, %43 in 0 : vector<4x32xf32>, vector<4x32xf32> -> vector<8x32xf32>
    %139 = arith.addf %138, %137 : vector<8x32xf32>
    %c0_59 = arith.constant 0 : index
    %c0_60 = arith.constant 0 : index
    %140 = vector.load %arg13[%c0_59, %c0_60] : memref<1x32xf32, #tpu.memory_space<vmem>>, vector<1x32xf32>
    %c0_61 = arith.constant 0 : index
    %c0_62 = arith.constant 0 : index
    %141 = vector.load %arg14[%c0_61, %c0_62] : memref<1x32xf32, #tpu.memory_space<vmem>>, vector<1x32xf32>
    %cst_63 = arith.constant dense<0.000000e+00> : vector<8xf32>
    %142 = vector.multi_reduction <add>, %139, %cst_63 [1] : vector<8x32xf32> to vector<8xf32>
    %143 = vector.shape_cast %142 : vector<8xf32> to vector<8x1xf32>
    %cst_64 = arith.constant 3.200000e+01 : f32
    %144 = vector.broadcast %cst_64 : f32 to vector<8x1xf32>
    %145 = arith.divf %143, %144 : vector<8x1xf32>
    %146 = vector.broadcast %145 : vector<8x1xf32> to vector<8x32xf32>
    %147 = arith.subf %139, %146 : vector<8x32xf32>
    %148 = arith.mulf %147, %147 : vector<8x32xf32>
    %cst_65 = arith.constant dense<0.000000e+00> : vector<8xf32>
    %149 = vector.multi_reduction <add>, %148, %cst_65 [1] : vector<8x32xf32> to vector<8xf32>
    %150 = vector.shape_cast %149 : vector<8xf32> to vector<8x1xf32>
    %cst_66 = arith.constant 3.200000e+01 : f32
    %151 = vector.broadcast %cst_66 : f32 to vector<8x1xf32>
    %152 = arith.divf %150, %151 : vector<8x1xf32>
    %153 = vector.broadcast %145 : vector<8x1xf32> to vector<8x32xf32>
    %154 = arith.subf %139, %153 : vector<8x32xf32>
    %cst_67 = arith.constant 9.99999974E-6 : f32
    %155 = vector.broadcast %cst_67 : f32 to vector<8x1xf32>
    %156 = arith.addf %152, %155 : vector<8x1xf32>
    %157 = math.rsqrt %156 : vector<8x1xf32>
    %158 = vector.broadcast %157 : vector<8x1xf32> to vector<8x32xf32>
    %159 = arith.mulf %154, %158 : vector<8x32xf32>
    %160 = vector.broadcast %140 : vector<1x32xf32> to vector<8x32xf32>
    %161 = arith.mulf %159, %160 : vector<8x32xf32>
    %162 = vector.broadcast %141 : vector<1x32xf32> to vector<8x32xf32>
    %163 = arith.addf %161, %162 : vector<8x32xf32>
    %c0_68 = arith.constant 0 : index
    %c0_69 = arith.constant 0 : index
    %164 = vector.load %arg15[%c0_68, %c0_69] : memref<32x128xf32, #tpu.memory_space<vmem>>, vector<32x128xf32>
    %cst_70 = arith.constant dense<0.000000e+00> : vector<8x128xf32>
    %165 = tpu.matmul %163, %164, %cst_70 {dimension_numbers = #tpu.dot_dimension_numbers<[1], [0], [0], [1], [0, 0, 1, 1], [], []>} : vector<8x32xf32>, vector<32x128xf32>, vector<8x128xf32> -> vector<8x128xf32>
    %c0_71 = arith.constant 0 : index
    %c0_72 = arith.constant 0 : index
    %166 = vector.load %arg16[%c0_71, %c0_72] : memref<1x128xf32, #tpu.memory_space<vmem>>, vector<1x128xf32>
    %167 = vector.broadcast %166 : vector<1x128xf32> to vector<8x128xf32>
    %168 = arith.addf %165, %167 : vector<8x128xf32>
    %cst_73 = arith.constant 0.000000e+00 : f32
    %169 = vector.broadcast %cst_73 : f32 to vector<8x128xf32>
    %170 = arith.maximumf %168, %169 : vector<8x128xf32>
    %c0_74 = arith.constant 0 : index
    %c0_75 = arith.constant 0 : index
    %171 = vector.load %arg17[%c0_74, %c0_75] : memref<128x32xf32, #tpu.memory_space<vmem>>, vector<128x32xf32>
    %cst_76 = arith.constant dense<0.000000e+00> : vector<8x32xf32>
    %172 = tpu.matmul %170, %171, %cst_76 {dimension_numbers = #tpu.dot_dimension_numbers<[1], [0], [0], [1], [0, 0, 1, 1], [], []>} : vector<8x128xf32>, vector<128x32xf32>, vector<8x32xf32> -> vector<8x32xf32>
    %c0_77 = arith.constant 0 : index
    %c0_78 = arith.constant 0 : index
    %173 = vector.load %arg18[%c0_77, %c0_78] : memref<1x32xf32, #tpu.memory_space<vmem>>, vector<1x32xf32>
    %174 = vector.broadcast %173 : vector<1x32xf32> to vector<8x32xf32>
    %175 = arith.addf %172, %174 : vector<8x32xf32>
    %176 = arith.addf %163, %175 : vector<8x32xf32>
    %c0_79 = arith.constant 0 : index
    %c0_80 = arith.constant 0 : index
    %177 = vector.load %arg19[%c0_79, %c0_80] : memref<1x32xf32, #tpu.memory_space<vmem>>, vector<1x32xf32>
    %c0_81 = arith.constant 0 : index
    %c0_82 = arith.constant 0 : index
    %178 = vector.load %arg20[%c0_81, %c0_82] : memref<1x32xf32, #tpu.memory_space<vmem>>, vector<1x32xf32>
    %cst_83 = arith.constant dense<0.000000e+00> : vector<8xf32>
    %179 = vector.multi_reduction <add>, %176, %cst_83 [1] : vector<8x32xf32> to vector<8xf32>
    %180 = vector.shape_cast %179 : vector<8xf32> to vector<8x1xf32>
    %cst_84 = arith.constant 3.200000e+01 : f32
    %181 = vector.broadcast %cst_84 : f32 to vector<8x1xf32>
    %182 = arith.divf %180, %181 : vector<8x1xf32>
    %183 = vector.broadcast %182 : vector<8x1xf32> to vector<8x32xf32>
    %184 = arith.subf %176, %183 : vector<8x32xf32>
    %185 = arith.mulf %184, %184 : vector<8x32xf32>
    %cst_85 = arith.constant dense<0.000000e+00> : vector<8xf32>
    %186 = vector.multi_reduction <add>, %185, %cst_85 [1] : vector<8x32xf32> to vector<8xf32>
    %187 = vector.shape_cast %186 : vector<8xf32> to vector<8x1xf32>
    %cst_86 = arith.constant 3.200000e+01 : f32
    %188 = vector.broadcast %cst_86 : f32 to vector<8x1xf32>
    %189 = arith.divf %187, %188 : vector<8x1xf32>
    %190 = vector.broadcast %182 : vector<8x1xf32> to vector<8x32xf32>
    %191 = arith.subf %176, %190 : vector<8x32xf32>
    %cst_87 = arith.constant 9.99999974E-6 : f32
    %192 = vector.broadcast %cst_87 : f32 to vector<8x1xf32>
    %193 = arith.addf %189, %192 : vector<8x1xf32>
    %194 = math.rsqrt %193 : vector<8x1xf32>
    %195 = vector.broadcast %194 : vector<8x1xf32> to vector<8x32xf32>
    %196 = arith.mulf %191, %195 : vector<8x32xf32>
    %197 = vector.broadcast %177 : vector<1x32xf32> to vector<8x32xf32>
    %198 = arith.mulf %196, %197 : vector<8x32xf32>
    %199 = vector.broadcast %178 : vector<1x32xf32> to vector<8x32xf32>
    %200 = arith.addf %198, %199 : vector<8x32xf32>
    %c0_88 = arith.constant 0 : index
    %c0_89 = arith.constant 0 : index
    %201 = vector.load %arg21[%c0_88, %c0_89] : memref<8x32xf32, #tpu.memory_space<vmem>>, vector<8x32xf32>
    %202 = vector.extract_strided_slice %200 {offsets = [0, 0], sizes = [4, 32], strides = [1, 1]} : vector<8x32xf32> to vector<4x32xf32>
    %cst_90 = arith.constant dense<0.000000e+00> : vector<4x8xf32>
    %203 = tpu.matmul %202, %201, %cst_90 {dimension_numbers = #tpu.dot_dimension_numbers<[1], [1], [0], [0], [0, 0, 1, 0], [], []>} : vector<4x32xf32>, vector<8x32xf32>, vector<4x8xf32> -> vector<4x8xf32>
    %204 = arith.mulf %17, %203 : vector<4x8xf32>
    %cst_91 = arith.constant dense<0.000000e+00> : vector<8xf32>
    %205 = vector.multi_reduction <add>, %204, %cst_91 [0] : vector<4x8xf32> to vector<8xf32>
    %206 = vector.shape_cast %205 : vector<8xf32> to vector<1x8xf32>
    %207 = vector.extract_strided_slice %200 {offsets = [4, 0], sizes = [4, 32], strides = [1, 1]} : vector<8x32xf32> to vector<4x32xf32>
    %cst_92 = arith.constant dense<0.000000e+00> : vector<4x8xf32>
    %208 = tpu.matmul %207, %201, %cst_92 {dimension_numbers = #tpu.dot_dimension_numbers<[1], [1], [0], [0], [0, 0, 1, 0], [], []>} : vector<4x32xf32>, vector<8x32xf32>, vector<4x8xf32> -> vector<4x8xf32>
    %209 = arith.mulf %17, %208 : vector<4x8xf32>
    %cst_93 = arith.constant dense<0.000000e+00> : vector<8xf32>
    %210 = vector.multi_reduction <add>, %209, %cst_93 [0] : vector<4x8xf32> to vector<8xf32>
    %211 = vector.shape_cast %210 : vector<8xf32> to vector<1x8xf32>
    %212 = tpu.concatenate %206, %211 in 0 : vector<1x8xf32>, vector<1x8xf32> -> vector<2x8xf32>
    %c0_94 = arith.constant 0 : index
    %c0_95 = arith.constant 0 : index
    %213 = vector.load %arg22[%c0_94, %c0_95] : memref<1x8xf32, #tpu.memory_space<vmem>>, vector<1x8xf32>
    %214 = vector.broadcast %213 : vector<1x8xf32> to vector<2x8xf32>
    %215 = arith.addf %212, %214 : vector<2x8xf32>
    %c0_96 = arith.constant 0 : index
    %c0_97 = arith.constant 0 : index
    %216 = vector.load %arg23[%c0_96, %c0_97] : memref<2x8xf32, #tpu.memory_space<vmem>>, vector<2x8xf32>
    tpu.vector_store %arg23[%c0_96, %c0_97], %215 {strides = array<i32>} : memref<2x8xf32, #tpu.memory_space<vmem>>, vector<2x8xf32>,
    return
  }
}

</mosaic_0001>

<bundles_post_ra>
// kernel: forward.3
= control target key start
LH: loop header
LB: loop body
LE: loop exit
PB: predicated region body
PF: predicated region fallthrough
CT: control target
= control target key end

     0   :  { %s2651_s0 = inlined_call_operand.vmem [shape: f32[2,8,32], index: 0, kind: input, shape index: {}]   ;;  %s2652_s1 = inlined_call_operand.vmem [shape: f32[4,32], index: 1, kind: input, shape index: {}]   ;;  %s2653_s2 = inlined_call_operand.vmem [shape: f32[8,32], index: 2, kind: input, shape index: {}]   ;;  %s2654_s3 = inlined_call_operand.vmem [shape: f32[32,32], index: 3, kind: input, shape index: {}]   ;;  %s2655_s4 = inlined_call_operand.vmem [shape: f32[1,32], index: 4, kind: input, shape index: {}]   ;;  %s2656_s5 = inlined_call_operand.vmem [shape: f32[1,32], index: 5, kind: input, shape index: {}]   ;;  %s2657_s6 = inlined_call_operand.vmem [shape: f32[1,32], index: 6, kind: input, shape index: {}]   ;;  %s2658_s7 = inlined_call_operand.vmem [shape: f32[32,64], index: 7, kind: input, shape index: {}]   ;;  %s2659_s8 = inlined_call_operand.vmem [shape: f32[1,64], index: 8, kind: input, shape index: {}]   ;;  %s2660_s9 = inlined_call_operand.vmem [shape: f32[32,128], index: 9, kind: input, shape index: {}]   ;;  %s2661_s10 = inlined_call_operand.vmem [shape: f32[1,128], index: 10, kind: input, shape index: {}]   ;;  %s2662_s11 = inlined_call_operand.vmem [shape: f32[64,32], index: 11, kind: input, shape index: {}]   ;;  %s2663_s12 = inlined_call_operand.vmem [shape: f32[1,32], index: 12, kind: input, shape index: {}]   ;;  %s2664_s13 = inlined_call_operand.vmem [shape: f32[1,32], index: 13, kind: input, shape index: {}]   ;;  %s2665_s14 = inlined_call_operand.vmem [shape: f32[1,32], index: 14, kind: input, shape index: {}]   ;;  %s2666_s15 = inlined_call_operand.vmem [shape: f32[32,128], index: 15, kind: input, shape index: {}]   ;;  %s2667_s16 = inlined_call_operand.vmem [shape: f32[1,128], index: 16, kind: input, shape index: {}]   ;;  %s2668_s17 = inlined_call_operand.vmem [shape: f32[128,32], index: 17, kind: input, shape index: {}]   ;;  %s2669_s18 = inlined_call_operand.vmem [shape: f32[1,32], index: 18, kind: input, shape index: {}]   ;;  %s2670_s19 = inlined_call_operand.vmem [shape: f32[1,32], index: 19, kind: input, shape index: {}]   ;;  %s2671_s20 = inlined_call_operand.vmem [shape: f32[1,32], index: 20, kind: input, shape index: {}]   ;;  %s2672_s21 = inlined_call_operand.vmem [shape: f32[8,32], index: 21, kind: input, shape index: {}]   ;;  %s2673_s22 = inlined_call_operand.vmem [shape: f32[1,8], index: 22, kind: input, shape index: {}]   ;;  %s2674_s23 = inlined_call_operand.hbm [shape: f32[2,8], index: 23, kind: output, shape index: {}]  }
   0x1   :  { %2678 = sst [smem:[#allocation5_spill]] %s2651_s0 }
   0x2   :  { %2679 = sst [smem:[#allocation6_spill]] %s2652_s1 }
   0x3   :  { %2680 = sst [smem:[#allocation7_spill]] %s2653_s2 }
   0x4   :  { %2681 = sst [smem:[#allocation8_spill]] %s2654_s3 }
   0x5   :  { %2682 = sst [smem:[#allocation9_spill]] %s2655_s4 }
   0x6   :  { %2683 = sst [smem:[#allocation10_spill]] %s2656_s5 }
   0x7   :  { %2684 = sst [smem:[#allocation11_spill]] %s2657_s6 }
   0x8   :  { %2685 = sst [smem:[#allocation12_spill]] %s2658_s7 }
   0x9   :  { %s2686_s24 = sld [smem:[#allocation8_spill]]  ;;  %v2194_v3 = vmov 0.0|0.0   ;;  %vm2195_vm0 = vmmov 0   ;;  %v2196_v6 = vmov 0.0  }
   0xa   :  { %2071 = vmatprep.subr.bf16.mxu0 %v2194_v3  ;;  %1910 = vmatprep.mubr.msk.f32.mxu0 %vm2195_vm0, %v2196_v6 }
   0xb   :  { %1913 = vmatprep.subr.mxu1 %v2196_v6  ;;  %1915 = vmatprep.mubr.msk.f32.mxu1 %vm2195_vm0, %v2196_v6 }
   0xf   :  { %v77_v0 = vld [vmem:[%s2686_s24] sm:$0xff]  ;;  %v78_v1 = vld [vmem:[%s2686_s24 + $0x8] sm:$0xff]  ;;  %v79_v2 = vld [vmem:[%s2686_s24 + $0x10] sm:$0xff] }
  0x10   :  { %v2072_v4 = vpack.c.bf16 %v78_v1, %v77_v0  ;;  %v80_v5 = vld [vmem:[%s2686_s24 + $0x18] sm:$0xff] }
  0x11   :  { %28 = vsyncpa [#allocation3], 0  ;;  %v2075_v7 = vpack.c.bf16 %v80_v5, %v79_v2  ;;  %s2687_s28 = sld [smem:[#allocation7_spill]]  ;;  %vm88_vm1 = vcmask 261120   ;;  %s2688_s0 = sld [smem:[#allocation9_spill]]  ;;  %vm238_vm2 = vcmask 60416  }
  0x12   :  { %2073 = vmatpush3.bf16.msra.mxu0 %v2072_v4  ;;  %s2689_s24 = sld [smem:[#allocation6_spill]]  ;;  %vm250_vm3 = vcmask 64512   ;;  %vm327_vm4 = vcmask 257024   ;;  %s2690_s1 = sld [smem:[#allocation12_spill]]  ;;  %v442_v46 = vld [vmem:[%s2660_s9] sm:$0xff]  ;;  %v443_v47 = vld [vmem:[%s2660_s9 + $0x8] sm:$0xff] }
  0x13   :  { %2074 = vmatprep.subr.bf16.mxu0 %v2194_v3  ;;  %s2692_s26 = sld [smem:[#allocation11_spill]]  ;;  %v2084_v50 = vpack.c.bf16 %v443_v47, %v442_v46  ;;  %v444_v52 = vld [vmem:[%s2660_s9 + $0x10] sm:$0xff]  ;;  %v445_v53 = vld [vmem:[%s2660_s9 + $0x18] sm:$0xff]  ;;  %s2693_s3 = sld [smem:[#allocation5_spill]]  ;;  %v1796_v56 = vld [vmem:[%s2659_s8] ss:$0 sm:$0xff] }
  0x14   :  { %v2087_v54 = vpack.c.bf16 %v445_v53, %v444_v52  ;;  %s2197_s4 = smov 96   ;;  %v1798_v60 = vld [vmem:[%s2661_s10] ss:$0 sm:$0xff]  ;;  %s2198_s25 = smov 64   ;;  %vm1282_vm5 = vcmask 523264   ;;  %vm1265_vm6 = vcmask 1043456  }
  0x15   :  { %s2199_s5 = smov 32   ;;  %vm1763_vm7 = vcmask 1040384   ;;  %vm1773_vm8 = vcmask 58368  }
  0x16   :  { %2076 = vmatpush3.bf16.msra.mxu0 %v2075_v7 }
  0x17   :  { %v76_v8 = vld [vmem:[%s2687_s28] sm:$0xff]  ;;  %2077 = vmatprep.subr.bf16.mxu0 %v2194_v3 }
  0x18   :  { %v1789_v9 = vld [vmem:[%s2688_s0] ss:$0 sm:$0xff]  ;;  %v359_v35 = vld [vmem:[%s2690_s1 + $0x8] sm:$0xff]  ;;  %v360_v37 = vld [vmem:[%s2690_s1 + $0x10] sm:$0xff]  ;;  %s2691_s0 = sld [smem:[#allocation10_spill]] }
  0x19   :  { %1911 = vmatmul.mubr.msk.f32.vlgmr.msra.gmra.mrb[0].mxu0 %vm88_vm1, %v76_v8  ;;  %v75_v13 = vld [vmem:[%s2689_s24] sm:$0xf]  ;;  %v361_v38 = vld [vmem:[%s2690_s1 + $0x18] sm:$0xff]  ;;  %v357_v2 = vld [vmem:[%s2693_s3 + $0x8] sm:$0xff] }
  0x1a   :  { %1931 = vmatprep.mubr.msk.f32.mxu0 %vm2195_vm0, %v2196_v6  ;;  %v358_v34 = vld [vmem:[%s2690_s1] sm:$0xff]  ;;  %v2081_v39 = vpack.c.bf16 %v361_v38, %v360_v37 }
  0x1b   :  { %v2078_v36 = vpack.c.bf16 %v359_v35, %v358_v34  ;;  %v1795_v48 = vld [vmem:[%s2692_s26] ss:$0 sm:$0xff] }
  0x1c   :  { %v356_v55 = vld [vmem:[%s2693_s3] sm:$0xff] }
  0x1d   :  { %2079 = vmatpush3.bf16.msra.mxu0 %v2078_v36 }
  0x1e   :  { %2080 = vmatprep.subr.bf16.mxu0 %v2194_v3  ;;  %v1794_v44 = vld [vmem:[%s2691_s0] ss:$0 sm:$0xff] }
  0x21   :  { %2082 = vmatpush3.bf16.msra.mxu0 %v2081_v39 }
  0x22   :  { %2083 = vmatprep.subr.bf16.mxu0 %v2194_v3 }
  0xec   :  { %v158_v10 = vpop.f32.mrb[0].mxu0 }
  0xed   :  { %v159_v11 = vadd.f32 %v1789_v9, %v158_v10  ;;  %v1912_v12 = vpop.f32.mrb[1].mxu0 }
  0xef   :  { %1914 = vmatpush3.xpose.msk.msra.mxu1 %vm88_vm1, %v159_v11 }
  0xf0   :  { %1918 = vmatprep.subr.mxu1 %v2196_v6 }
  0xf2   :  { %1916 = vmatmul.mubr.msk.f32.vlgmr.msra.gmra.mrb[0].mxu1 %vm88_vm1, %v75_v13 }
  0xf3   :  { %1919 = vmatpush3.msra.mxu1 %v159_v11  ;;  %1920 = vmatprep.mubr.msk.f32.mxu1 %vm2195_vm0, %v2196_v6 }
  0xf4   :  { %1950 = vmatprep.subr.mxu1 %v2196_v6 }
 0x1c5   :  { %v234_v14 = vpop.f32.mrb[0].mxu1 }
 0x1c6   :  { %v1917_v15 = vpop.f32.mrb[1].mxu1  ;;  %v239_v16 = vsel %vm238_vm2, %v234_v14, -inf }
 0x1c7   :  { %240 = vmax.xlane.f32.xlu0 %v239_v16 }
 0x254   :  { %v241_v17 = vpop.xlane.xlu0 %240 }
 0x255   :  { %v242_v18 = vsub.f32 %v234_v14, %v241_v17 }
 0x257   :  { %v243_v19 = vmul.f32 1.442695, %v242_v18 }
 0x259   :  { %2144 = vpow2.f32 %v243_v19 }
 0x263   :  { %v2145_v20 = vpop.eup %2144 }
 0x264   :  { %v245_v21 = vsel %vm238_vm2, %v2145_v20, 0.0 }
 0x265   :  { %246 = vadd.xlane.f32.xlu0 %v245_v21 }
 0x2f2   :  { %v247_v22 = vpop.xlane.xlu0 %246 }
 0x2f3   :  { %2146 = vrcp.f32 %v247_v22 }
 0x2fd   :  { %v2147_v23 = vpop.eup %2146 }
 0x2fe   :  { %v2361_v24 = vmul.f32 %v2147_v23, %v2145_v20 }
 0x300   :  { %1921 = vmatmul.mubr.msk.f32.vlgmr.msra.gmra.mrb[2].mxu1 %vm250_vm3, %v2361_v24 }
 0x301   :  { %1952 = vmatprep.mubr.msk.f32.mxu1 %vm2195_vm0, %v2196_v6 }
 0x3d3   :  { %v320_v25 = vpop.f32.mrb[2].mxu1 }
 0x3d4   :  { %v324_v26 = vadd.f32 %v320_v25, %v75_v13  ;;  %v1922_v27 = vpop.f32.mrb[3].mxu1 }
 0x3d6   :  { %v328_v28 = vsel %vm327_vm4, %v324_v26, 0.0 }
 0x3d7   :  { %329 = vadd.xlane.f32.xlu1 %v328_v28 }
 0x464   :  { %v330_v29 = vpop.xlane.xlu1 %329 }
 0x465   :  { %v332_v30 = vmul.f32 0.03125, %v330_v29 }
 0x467   :  { %v333_v31 = vsub.f32 %v324_v26, %v332_v30 }
 0x469   :  { %v334_v32 = vmul.f32 %v333_v31, %v333_v31 }
 0x46b   :  { %v335_v33 = vsel %vm327_vm4, %v334_v32, 0.0 }
 0x46c   :  { %336 = vadd.xlane.f32.xlu1 %v335_v33 }
 0x4f9   :  { %v337_v40 = vpop.xlane.xlu1 %336 }
 0x4fa   :  { %v338_v41 = vmul.f32 0.03125, %v337_v40 }
 0x4fc   :  { %v339_v42 = vadd.f32 1e-05, %v338_v41 }
 0x4fe   :  { %2148 = vrsqrt.f32 %v339_v42 }
 0x508   :  { %v2149_v43 = vpop.eup %2148 }
 0x509   :  { %v341_v45 = vmul.f32 %v2149_v43, %v333_v31 }
 0x50b   :  { %v348_v49 = vmul.f32 %v1794_v44, %v341_v45 }
 0x50d   :  { %v2393_v51 = vadd.f32 %v1795_v48, %v348_v49 }
 0x50f   :  { %1932 = vmatmul.mubr.msk.f32.vlgmr.msra.gmra.mrb[2].mxu0 %vm88_vm1, %v2393_v51 }
 0x510   :  { %2085 = vmatpush3.bf16.msra.mxu0 %v2084_v50  ;;  %1942 = vmatprep.mubr.msk.f32.mxu0 %vm2195_vm0, %v2196_v6 }
 0x511   :  { %2086 = vmatprep.subr.bf16.mxu0 %v2194_v3 }
 0x514   :  { %2088 = vmatpush3.bf16.msra.mxu0 %v2087_v54 }
 0x515   :  { %1945 = vmatprep.subr.mxu0 %v2196_v6 }
 0x517   :  { %1943 = vmatmul.mubr.msk.f32.vlgmr.msra.gmra.mrb[4].mxu0 %vm88_vm1, %v356_v55 }
 0x518   :  { %1947 = vmatprep.mubr.msk.f32.mxu0 %vm2195_vm0, %v2196_v6 }
 0x5e2   :  { %v438_v57 = vpop.f32.mrb[2].mxu0 }
 0x5e3   :  { %v2416_v58 = vadd.f32 %v1796_v56, %v438_v57  ;;  %v1933_v59 = vpop.f32.mrb[3].mxu0 }
 0x5e5   :  { %690 = vrot.lane.b32.xlu1 %v2416_v58, %s2197_s4 }
 0x5ea   :  { %v522_v61 = vpop.f32.mrb[4].mxu0 }
 0x5eb   :  { %v523_v62 = vadd.f32 %v1798_v60, %v522_v61  ;;  %v1944_v63 = vpop.f32.mrb[5].mxu0 }
 0x5ed   :  { %692 = vrot.lane.b32.xlu0 %v523_v62, %s2198_s25  ;;  %1946 = vmatpush3.xpose.msk.msra.mxu0 %vm88_vm1, %v523_v62 }
 0x5ee   :  { %1955 = vmatprep.subr.mxu0 %v2196_v6 }
 0x5f0   :  { %1948 = vmatmul.mubr.msk.f32.vlgmr.msra.gmra.mrb[6].mxu0 %vm88_vm1, %v2416_v58 }
 0x5f1   :  { %1957 = vmatprep.mubr.msk.f32.mxu0 %vm2195_vm0, %v2196_v6 }
 0x657   :  { %v691_v1 = vpop.permute.xlu1 %690 }
 0x65f   :  { %v693_v0 = vpop.permute.xlu0 %692 }
 0x660   :  { %1956 = vmatpush3.xpose.msk.msra.mxu0 %vm88_vm1, %v693_v0 }
 0x661   :  { %2089 = vmatprep.subr.bf16.mxu0 %v2194_v3 }
 0x663   :  { %1958 = vmatmul.mubr.msk.f32.vlgmr.msra.gmra.mrb[8].mxu0 %vm88_vm1, %v691_v1 }
 0x664   :  { %2091 = vmatpush3.bf16.msra.mxu0 %v2084_v50  ;;  %1973 = vmatprep.mubr.msk.f32.mxu0 %vm2195_vm0, %v2196_v6 }
 0x665   :  { %2092 = vmatprep.subr.bf16.mxu0 %v2194_v3 }
 0x668   :  { %2094 = vmatpush3.bf16.msra.mxu0 %v2087_v54 }
 0x669   :  { %1986 = vmatprep.subr.mxu0 %v2196_v6 }
 0x66b   :  { %1974 = vmatmul.mubr.msk.f32.vlgmr.msra.gmra.mrb[10].mxu0 %vm88_vm1, %v357_v2 }
 0x66c   :  { %1988 = vmatprep.mubr.msk.f32.mxu0 %vm2195_vm0, %v2196_v6 }
 0x6c3   :  { %v598_v4 = vpop.f32.mrb[6].mxu0 }
 0x6c4   :  { %v602_v5 = vmul.f32 0.17677669, %v598_v4  ;;  %v1949_v7 = vpop.f32.mrb[7].mxu0  ;;  %v1267_v4 = vld [vmem:[%s2662_s11] sm:$0xff] }
 0x6c5   :  { %v1269_v7 = vld [vmem:[%s2662_s11 + $0x10] sm:$0xff] }
 0x6c6   :  { %v603_v8 = vsel %vm238_vm2, %v602_v5, -inf }
 0x6c7   :  { %604 = vmax.xlane.f32.xlu1 %v603_v8 }
 0x6d8   :  { %780 = vrot.lane.b32.xlu1 %v523_v62, %s2199_s5 }
 0x736   :  { %v764_v9 = vpop.f32.mrb[8].mxu0 }
 0x737   :  { %v768_v10 = vmul.f32 0.17677669, %v764_v9  ;;  %v1959_v11 = vpop.f32.mrb[9].mxu0  ;;  %v1270_v9 = vld [vmem:[%s2662_s11 + $0x18] sm:$0xff] }
 0x738   :  { %v1271_v11 = vld [vmem:[%s2662_s11 + $0x20] sm:$0xff] }
 0x739   :  { %v769_v12 = vsel %vm238_vm2, %v768_v10, -inf }
 0x73a   :  { %770 = vmax.xlane.f32.xlu0 %v769_v12  ;;  %v1272_v12 = vld [vmem:[%s2662_s11 + $0x28] sm:$0xff] }
 0x73e   :  { %v930_v18 = vpop.f32.mrb[10].mxu0 }
 0x73f   :  { %v1975_v19 = vpop.f32.mrb[11].mxu0  ;;  %v931_v26 = vadd.f32 %v1798_v60, %v930_v18 }
 0x754   :  { %v605_v13 = vpop.xlane.xlu1 %604 }
 0x755   :  { %v606_v14 = vsub.f32 %v602_v5, %v605_v13  ;;  %v1268_v5 = vld [vmem:[%s2662_s11 + $0x8] sm:$0xff]  ;;  %v2102_v13 = vpack.c.bf16 %v1272_v12, %v1271_v11  ;;  %v1486_v12 = vld [vmem:[%s2668_s17 + $0x60] sm:$0xff] }
 0x756   :  { %v2096_v8 = vpack.c.bf16 %v1268_v5, %v1267_v4  ;;  %v1482_v5 = vld [vmem:[%s2668_s17 + $0x40] sm:$0xff] }
 0x757   :  { %v607_v15 = vmul.f32 1.442695, %v606_v14  ;;  %v1273_v14 = vld [vmem:[%s2662_s11 + $0x30] sm:$0xff] }
 0x758   :  { %v781_v31 = vpop.permute.xlu1 %780 }
 0x759   :  { %2150 = vpow2.f32 %v607_v15  ;;  %v1274_v15 = vld [vmem:[%s2662_s11 + $0x38] sm:$0xff] }
 0x763   :  { %v2151_v16 = vpop.eup %2150 }
 0x764   :  { %v609_v17 = vsel %vm238_vm2, %v2151_v16, 0.0 }
 0x765   :  { %610 = vadd.xlane.f32.xlu0 %v609_v17 }
 0x77b   :  { %614 = vrot.lane.b32.xlu0 %v523_v62, %s2197_s4 }
 0x7c7   :  { %v771_v20 = vpop.xlane.xlu0 %770 }
 0x7c8   :  { %v772_v21 = vsub.f32 %v768_v10, %v771_v20  ;;  %v2099_v10 = vpack.c.bf16 %v1270_v9, %v1269_v7  ;;  %v1483_v7 = vld [vmem:[%s2668_s17 + $0x48] sm:$0xff]  ;;  %v1484_v9 = vld [vmem:[%s2668_s17 + $0x50] sm:$0xff] }
 0x7ca   :  { %v773_v22 = vmul.f32 1.442695, %v772_v21 }
 0x7cc   :  { %2152 = vpow2.f32 %v773_v22 }
 0x7d6   :  { %v2153_v23 = vpop.eup %2152 }
 0x7d7   :  { %v775_v25 = vsel %vm238_vm2, %v2153_v23, 0.0 }
 0x7d8   :  { %776 = vadd.xlane.f32.xlu1 %v775_v25 }
 0x7e9   :  { %1095 = vrot.lane.b32.xlu1 %v931_v26, %s2198_s25 }
 0x7f2   :  { %v611_v27 = vpop.xlane.xlu0 %610 }
 0x7f3   :  { %2154 = vrcp.f32 %v611_v27 }
 0x7f6   :  { %v615_v28 = vpop.permute.xlu0 %614 }
 0x7f7   :  { %1951 = vmatpush3.msra.mxu1 %v615_v28  ;;  %v1813_v28 = vld [vmem:[%s2663_s12] ss:$0 sm:$0xff] }
 0x7f8   :  { %1960 = vmatprep.subr.mxu1 %v2196_v6 }
 0x7fd   :  { %v2155_v29 = vpop.eup %2154 }
 0x7fe   :  { %v613_v30 = vmul.f32 %v2155_v29, %v2151_v16  ;;  %v2105_v16 = vpack.c.bf16 %v1274_v15, %v1273_v14  ;;  %v1356_v29 = vrot.slane %v2393_v51, 4  ;;  %v1488_v15 = vld [vmem:[%s2668_s17 + $0x70] sm:$0xff] }
 0x800   :  { %1953 = vmatmul.mubr.msk.f32.vlgmr.msra.gmra.mrb[4].mxu1 %vm250_vm3, %v613_v30 }
 0x801   :  { %1961 = vmatpush3.msra.mxu1 %v781_v31  ;;  %1962 = vmatprep.mubr.msk.f32.mxu1 %vm2195_vm0, %v2196_v6 }
 0x802   :  { %1976 = vmatprep.subr.mxu1 %v2196_v6 }
 0x865   :  { %v777_v32 = vpop.xlane.xlu1 %776 }
 0x866   :  { %2156 = vrcp.f32 %v777_v32 }
 0x869   :  { %v1096_v33 = vpop.permute.xlu1 %1095 }
 0x86a   :  { %1987 = vmatpush3.xpose.msk.msra.mxu0 %vm88_vm1, %v1096_v33  ;;  %v1358_v33 = vsel %vm1265_vm6, %v2393_v51, %v1356_v29 }
 0x86b   :  { %2095 = vmatprep.subr.bf16.mxu0 %v2194_v3 }
 0x86d   :  { %1989 = vmatmul.mubr.msk.f32.vlgmr.msra.gmra.mrb[12].mxu0 %vm88_vm1, %v691_v1 }
 0x86e   :  { %2012 = vmatprep.mubr.msk.f32.mxu0 %vm2195_vm0, %v2196_v6  ;;  %2097 = vmatpush3.bf16.msra.mxu0 %v2096_v8  ;;  %v2126_v8 = vpack.c.bf16 %v1483_v7, %v1482_v5 }
 0x86f   :  { %2098 = vmatprep.subr.bf16.mxu0 %v2194_v3 }
 0x870   :  { %v2157_v34 = vpop.eup %2156 }
 0x871   :  { %v779_v35 = vmul.f32 %v2157_v34, %v2153_v23 }
 0x872   :  { %2100 = vmatpush3.bf16.msra.mxu0 %v2099_v10  ;;  %v1485_v10 = vld [vmem:[%s2668_s17 + $0x58] sm:$0xff] }
 0x873   :  { %1963 = vmatmul.mubr.msk.f32.vlgmr.msra.gmra.mrb[6].mxu1 %vm250_vm3, %v779_v35  ;;  %2101 = vmatprep.subr.bf16.mxu0 %v2194_v3  ;;  %v2129_v11 = vpack.c.bf16 %v1485_v10, %v1484_v9 }
 0x874   :  { %1977 = vmatpush3.xpose.msk.msra.mxu1 %vm88_vm1, %v931_v26  ;;  %1978 = vmatprep.mubr.msk.f32.mxu1 %vm2195_vm0, %v2196_v6 }
 0x875   :  { %1981 = vmatprep.subr.mxu1 %v2196_v6 }
 0x876   :  { %2103 = vmatpush3.bf16.msra.mxu0 %v2102_v13  ;;  %v1487_v13 = vld [vmem:[%s2668_s17 + $0x68] sm:$0xff] }
 0x877   :  { %1979 = vmatmul.mubr.msk.f32.vlgmr.msra.gmra.mrb[8].mxu1 %vm88_vm1, %v2416_v58  ;;  %2104 = vmatprep.subr.bf16.mxu0 %v2194_v3  ;;  %v2132_v14 = vpack.c.bf16 %v1487_v13, %v1486_v12 }
 0x878   :  { %1983 = vmatprep.mubr.msk.f32.mxu1 %vm2195_vm0, %v2196_v6 }
 0x87a   :  { %2106 = vmatpush3.bf16.msra.mxu0 %v2105_v16  ;;  %v1489_v16 = vld [vmem:[%s2668_s17 + $0x78] sm:$0xff] }
 0x87b   :  { %2061 = vmatprep.subr.mxu0 %v2196_v6 }
 0x8d3   :  { %v2469_v36 = vpop.f32.mrb[4].mxu1 }
 0x8d4   :  { %v1954_v37 = vpop.f32.mrb[5].mxu1 }
 0x940   :  { %v1165_v38 = vpop.f32.mrb[12].mxu0 }
 0x941   :  { %v1169_v39 = vmul.f32 0.17677669, %v1165_v38  ;;  %v1990_v40 = vpop.f32.mrb[13].mxu0 }
 0x943   :  { %v1170_v41 = vsel %vm238_vm2, %v1169_v39, -inf }
 0x944   :  { %1171 = vmax.xlane.f32.xlu0 %v1170_v41  ;;  %v1389_v41 = vld [vmem:[%s2666_s15] sm:$0xff] }
 0x946   :  { %v2472_v42 = vpop.f32.mrb[6].mxu1 }
 0x947   :  { %v1964_v43 = vpop.f32.mrb[7].mxu1 }
 0x948   :  { %v1391_v43 = vld [vmem:[%s2666_s15 + $0x10] sm:$0xff] }
 0x94a   :  { %v1003_v44 = vpop.f32.mrb[8].mxu1 }
 0x94b   :  { %v1007_v45 = vmul.f32 0.17677669, %v1003_v44  ;;  %v1980_v46 = vpop.f32.mrb[9].mxu1  ;;  %v1392_v44 = vld [vmem:[%s2666_s15 + $0x18] sm:$0xff] }
 0x94d   :  { %v1008_v47 = vsel %vm238_vm2, %v1007_v45, -inf }
 0x94e   :  { %1009 = vmax.xlane.f32.xlu1 %v1008_v47 }
 0x95f   :  { %1019 = vrot.lane.b32.xlu1 %v931_v26, %s2197_s4 }
 0x9d1   :  { %v1172_v48 = vpop.xlane.xlu0 %1171 }
 0x9d2   :  { %v1173_v49 = vsub.f32 %v1169_v39, %v1172_v48 }
 0x9d4   :  { %v1174_v50 = vmul.f32 1.442695, %v1173_v49 }
 0x9d6   :  { %2158 = vpow2.f32 %v1174_v50  ;;  %v1815_v50 = vld [vmem:[%s2664_s13] ss:$0 sm:$0xff] }
 0x9db   :  { %v1010_v52 = vpop.xlane.xlu1 %1009 }
 0x9dc   :  { %v1011_v53 = vsub.f32 %v1007_v45, %v1010_v52  ;;  %v2111_v45 = vpack.c.bf16 %v1392_v44, %v1391_v43 }
 0x9de   :  { %v1012_v54 = vmul.f32 1.442695, %v1011_v53  ;;  %v1474_v53 = vld [vmem:[%s2668_s17] sm:$0xff] }
 0x9df   :  { %v1020_v55 = vpop.permute.xlu1 %1019 }
 0x9e0   :  { %v2159_v56 = vpop.eup %2158  ;;  %2160 = vpow2.f32 %v1012_v54  ;;  %1982 = vmatpush3.msra.mxu1 %v1020_v55  ;;  %v1475_v54 = vld [vmem:[%s2668_s17 + $0x8] sm:$0xff]  ;;  %v1816_v55 = vld [vmem:[%s2665_s14] ss:$0 sm:$0xff] }
 0x9e1   :  { %v1176_v57 = vsel %vm238_vm2, %v2159_v56, 0.0  ;;  %1991 = vmatprep.subr.mxu1 %v2196_v6 }
 0x9e2   :  { %1177 = vadd.xlane.f32.xlu0 %v1176_v57  ;;  %v2114_v57 = vpack.c.bf16 %v1475_v54, %v1474_v53 }
 0x9ea   :  { %v2161_v58 = vpop.eup %2160 }
 0x9eb   :  { %v1014_v59 = vsel %vm238_vm2, %v2161_v58, 0.0 }
 0x9ec   :  { %1015 = vadd.xlane.f32.xlu0 %v1014_v59  ;;  %v1476_v59 = vld [vmem:[%s2668_s17 + $0x10] sm:$0xff] }
 0xa02   :  { %1181 = vrot.lane.b32.xlu0 %v931_v26, %s2199_s5 }
 0xa6f   :  { %v1178_v60 = vpop.xlane.xlu0 %1177 }
 0xa79   :  { %v1016_v61 = vpop.xlane.xlu0 %1015 }
 0xa7a   :  { %2162 = vrcp.f32 %v1016_v61 }
 0xa7b   :  { %2164 = vrcp.f32 %v1178_v60  ;;  %v1477_v60 = vld [vmem:[%s2668_s17 + $0x18] sm:$0xff] }
 0xa7c   :  { %v2117_v61 = vpack.c.bf16 %v1477_v60, %v1476_v59 }
 0xa7d   :  { %v1182_v1 = vpop.permute.xlu0 %1181 }
 0xa84   :  { %v2163_v62 = vpop.eup %2162 }
 0xa85   :  { %v1018_v63 = vmul.f32 %v2163_v62, %v2161_v58  ;;  %v2165_v0 = vpop.eup %2164  ;;  %v1478_v62 = vld [vmem:[%s2668_s17 + $0x20] sm:$0xff] }
 0xa86   :  { %v1180_v2 = vmul.f32 %v2165_v0, %v2159_v56 }
 0xa87   :  { %1984 = vmatmul.mubr.msk.f32.vlgmr.msra.gmra.mrb[10].mxu1 %vm250_vm3, %v1018_v63  ;;  %v1479_v63 = vld [vmem:[%s2668_s17 + $0x28] sm:$0xff] }
 0xa88   :  { %1992 = vmatpush3.msra.mxu1 %v1182_v1  ;;  %1993 = vmatprep.mubr.msk.f32.mxu1 %vm2195_vm0, %v2196_v6  ;;  %v2120_v0 = vpack.c.bf16 %v1479_v63, %v1478_v62  ;;  %v1480_v1 = vld [vmem:[%s2668_s17 + $0x30] sm:$0xff] }
 0xa89   :  { %2107 = vmatprep.subr.bf16.mxu1 %v2194_v3 }
 0xa8b   :  { %1994 = vmatmul.mubr.msk.f32.vlgmr.msra.gmra.mrb[12].mxu1 %vm250_vm3, %v1180_v2  ;;  %v1481_v2 = vld [vmem:[%s2668_s17 + $0x38] sm:$0xff] }
 0xa8c   :  { %2023 = vmatprep.mubr.msk.f32.mxu1 %vm2195_vm0, %v2196_v6  ;;  %v2123_v4 = vpack.c.bf16 %v1481_v2, %v1480_v1 }
 0xb5a   :  { %v1091_v17 = vpop.f32.mrb[10].mxu1 }
 0xb5b   :  { %v1985_v18 = vpop.f32.mrb[11].mxu1 }
 0xb5c   :  { %v1817_v18 = vld [vmem:[%s2667_s16] ss:$0 sm:$0xff] }
 0xb5e   :  { %v1253_v19 = vpop.f32.mrb[12].mxu1 }
 0xb5f   :  { %1258 = vrot.lane.b32.xlu1 %v1253_v19, %s2199_s5  ;;  %v1995_v20 = vpop.f32.mrb[13].mxu1 }
 0xb63   :  { %857 = vrot.lane.b32.xlu1 %v2472_v42, %s2199_s5  ;;  %v1390_v42 = vld [vmem:[%s2666_s15 + $0x8] sm:$0xff] }
 0xb64   :  { %v2108_v51 = vpack.c.bf16 %v1390_v42, %v1389_v41  ;;  %v1821_v41 = vld [vmem:[%s2671_s20] ss:$0 sm:$0xff] }
 0xb66   :  { %2109 = vmatpush3.bf16.msra.mxu1 %v2108_v51 }
 0xb67   :  { %2110 = vmatprep.subr.bf16.mxu1 %v2194_v3 }
 0xb6a   :  { %2112 = vmatpush3.bf16.msra.mxu1 %v2111_v45 }
 0xb6b   :  { %2113 = vmatprep.subr.bf16.mxu1 %v2194_v3 }
 0xbd1   :  { %v1259_v21 = vpop.permute.xlu1 %1258 }
 0xbd2   :  { %v1261_v22 = vsel %vm88_vm1, %v1091_v17, %v1259_v21  ;;  %v2135_v17 = vpack.c.bf16 %v1489_v16, %v1488_v15 }
 0xbd3   :  { %v1263_v23 = vrot.slane %v1261_v22, 4 }
 0xbd5   :  { %v858_v25 = vpop.permute.xlu1 %857 }
 0xbd6   :  { %v860_v26 = vsel %vm88_vm1, %v2469_v36, %v858_v25 }
 0xbd7   :  { %v1266_v27 = vsel %vm1265_vm6, %v860_v26, %v1263_v23 }
 0xbd8   :  { %2013 = vmatmul.mubr.msk.f32.vlgmr.msra.gmra.mrb[14].mxu0 %vm1282_vm5, %v1266_v27 }
 0xbd9   :  { %2063 = vmatprep.mubr.msk.f32.mxu0 %vm2195_vm0, %v2196_v6 }
 0xcab   :  { %v1352_v30 = vpop.f32.mrb[14].mxu0 }
 0xcac   :  { %v1353_v31 = vadd.f32 %v1813_v28, %v1352_v30  ;;  %v2014_v32 = vpop.f32.mrb[15].mxu0 }
 0xcae   :  { %v1359_v34 = vadd.f32 %v1358_v33, %v1353_v31 }
 0xcb0   :  { %v1362_v35 = vsel %vm88_vm1, %v1359_v34, 0.0 }
 0xcb1   :  { %1363 = vadd.xlane.f32.xlu1 %v1362_v35 }
 0xd3e   :  { %v1364_v36 = vpop.xlane.xlu1 %1363 }
 0xd3f   :  { %v1365_v37 = vmul.f32 0.03125, %v1364_v36 }
 0xd41   :  { %v1366_v38 = vsub.f32 %v1359_v34, %v1365_v37  ;;  %v1597_v34 = vld [vmem:[%s2672_s21] sm:$0xff]  ;;  %s2200_s21 = smov [#allocation2]  }
 0xd42   :  { %2062 = vmatpush3.xpose.msk.msra.mxu0 %vm88_vm1, %v1597_v34  ;;  %s1781_s6 = sshll.u32 %s2200_s21, 4  ;;  %s1782_s6 = int_to_ptr.vmem [resolvable:$true] %s1781_s6 }
 0xd43   :  { %v1367_v39 = vmul.f32 %v1366_v38, %v1366_v38  ;;  %2066 = vmatprep.subr.mxu0 %v2196_v6  ;;  %s2170_s27 = scalar_lea.vmem %s1782_s6, 32  ;;  %p2175_p1 = scmp.lt.s32.totalorder %s1782_s6, %s1782_s6 }
 0xd44   :  { %p2171_p0 = scmp.ne.s32.totalorder %s1782_s6, %s2170_s27  ;;  %p2176_p2 = scmp.lt.s32.totalorder %s2170_s27, %s2170_s27 }
 0xd45   :  { %v1368_v40 = vsel %vm88_vm1, %v1367_v39, 0.0  ;;  %v1820_v39 = vld [vmem:[%s2670_s19] ss:$0 sm:$0xff] }
 0xd46   :  { %1369 = vadd.xlane.f32.xlu0 %v1368_v40  ;;  %p2177_p3 = por %p2176_p2, %p2175_p1 }
 0xd48   :  { %p2178_p4 = pnand %p2177_p3, %p2171_p0 }
 0xdd3   :  { %v1370_v46 = vpop.xlane.xlu0 %1369 }
 0xdd4   :  { %v1371_v47 = vmul.f32 0.03125, %v1370_v46 }
 0xdd6   :  { %v1372_v48 = vadd.f32 1e-05, %v1371_v47 }
 0xdd8   :  { %2166 = vrsqrt.f32 %v1372_v48 }
 0xde2   :  { %v2167_v49 = vpop.eup %2166 }
 0xde3   :  { %v1374_v52 = vmul.f32 %v2167_v49, %v1366_v38 }
 0xde5   :  { %v1381_v56 = vmul.f32 %v1815_v50, %v1374_v52 }
 0xde7   :  { %v1388_v58 = vadd.f32 %v1816_v55, %v1381_v56 }
 0xde9   :  { %2024 = vmatmul.mubr.msk.f32.vlgmr.msra.gmra.mrb[14].mxu1 %vm88_vm1, %v1388_v58 }
 0xdea   :  { %2115 = vmatpush3.bf16.msra.mxu1 %v2114_v57  ;;  %2058 = vmatprep.mubr.msk.f32.mxu1 %vm2195_vm0, %v2196_v6 }
 0xdeb   :  { %2116 = vmatprep.subr.bf16.mxu1 %v2194_v3 }
 0xdee   :  { %2118 = vmatpush3.bf16.msra.mxu1 %v2117_v61 }
 0xdef   :  { %2119 = vmatprep.subr.bf16.mxu1 %v2194_v3 }
 0xdf2   :  { %2121 = vmatpush3.bf16.msra.mxu1 %v2120_v0  ;;  %v1826_v0 = vld [vmem:[%s2673_s22] ss:$0 sm:$0xff] }
 0xdf3   :  { %2122 = vmatprep.subr.bf16.mxu1 %v2194_v3 }
 0xdf6   :  { %2124 = vmatpush3.bf16.msra.mxu1 %v2123_v4 }
 0xdf7   :  { %2125 = vmatprep.subr.bf16.mxu1 %v2194_v3 }
 0xdfa   :  { %2127 = vmatpush3.bf16.msra.mxu1 %v2126_v8 }
 0xdfb   :  { %2128 = vmatprep.subr.bf16.mxu1 %v2194_v3 }
 0xdfe   :  { %2130 = vmatpush3.bf16.msra.mxu1 %v2129_v11 }
 0xdff   :  { %2131 = vmatprep.subr.bf16.mxu1 %v2194_v3 }
 0xe02   :  { %2133 = vmatpush3.bf16.msra.mxu1 %v2132_v14 }
 0xe03   :  { %2134 = vmatprep.subr.bf16.mxu1 %v2194_v3  ;;  %v1819_v3 = vld [vmem:[%s2669_s18] ss:$0 sm:$0xff] }
 0xe06   :  { %2136 = vmatpush3.bf16.msra.mxu1 %v2135_v17 }
 0xebc   :  { %v1469_v19 = vpop.f32.mrb[14].mxu1 }
 0xebd   :  { %v1470_v20 = vadd.f32 %v1817_v18, %v1469_v19  ;;  %v2025_v21 = vpop.f32.mrb[15].mxu1 }
 0xebf   :  { %v1473_v22 = vmax.f32 %v1470_v20, 0.0 }
 0xec1   :  { %2059 = vmatmul.mubr.f32.vlgmr.msra.gmra.mrb[16].mxu1 %v1473_v22 }
 0xf94   :  { %v1563_v23 = vpop.f32.mrb[16].mxu1 }
 0xf95   :  { %v1564_v25 = vadd.f32 %v1819_v3, %v1563_v23  ;;  %v2060_v26 = vpop.f32.mrb[17].mxu1 }
 0xf97   :  { %v1567_v27 = vadd.f32 %v1564_v25, %v1388_v58 }
 0xf99   :  { %v1570_v28 = vsel %vm88_vm1, %v1567_v27, 0.0 }
 0xf9a   :  { %1571 = vadd.xlane.f32.xlu0 %v1570_v28 }
0x1027   :  { %v1572_v29 = vpop.xlane.xlu0 %1571 }
0x1028   :  { %v1573_v30 = vmul.f32 0.03125, %v1572_v29 }
0x102a   :  { %v1574_v31 = vsub.f32 %v1567_v27, %v1573_v30 }
0x102c   :  { %v1575_v32 = vmul.f32 %v1574_v31, %v1574_v31 }
0x102e   :  { %v1576_v33 = vsel %vm88_vm1, %v1575_v32, 0.0 }
0x102f   :  { %1577 = vadd.xlane.f32.xlu0 %v1576_v33 }
0x10bc   :  { %v1578_v35 = vpop.xlane.xlu0 %1577 }
0x10bd   :  { %v1579_v36 = vmul.f32 0.03125, %v1578_v35 }
0x10bf   :  { %v1580_v37 = vadd.f32 1e-05, %v1579_v36 }
0x10c1   :  { %2168 = vrsqrt.f32 %v1580_v37 }
0x10cb   :  { %v2169_v38 = vpop.eup %2168 }
0x10cc   :  { %v1582_v40 = vmul.f32 %v2169_v38, %v1574_v31 }
0x10ce   :  { %v1589_v42 = vmul.f32 %v1820_v39, %v1582_v40 }
0x10d0   :  { %v1596_v51 = vadd.f32 %v1821_v41, %v1589_v42 }
0x10d2   :  { %2064 = vmatmul.mubr.msk.f32.vlgmr.msra.gmra.mrb[16].mxu0 %vm88_vm1, %v1596_v51  ;;  %v1682_v43 = vrot.slane %v1596_v51, 4 }
0x10d3   :  { %2067 = vmatpush3.xpose.msk.msra.mxu0 %vm88_vm1, %v1597_v34  ;;  %2068 = vmatprep.mubr.msk.f32.mxu0 %vm2195_vm0, %v2196_v6 }
0x10d6   :  { %2069 = vmatmul.mubr.msk.f32.vlgmr.msra.gmra.mrb[18].mxu0 %vm88_vm1, %v1682_v43 }
0x11a5   :  { %v1670_v44 = vpop.f32.mrb[16].mxu0 }
0x11a6   :  { %v1674_v45 = vmul.f32 %v1670_v44, %v2361_v24  ;;  %v2065_v46 = vpop.f32.mrb[17].mxu0 }
0x11a8   :  { %v1675_v47 = vsel %vm238_vm2, %v1674_v45, 0.0 }
0x11a9   :  { %v1676_v48 = vrot.slane %v1675_v47, 4  ;;  %v1751_v49 = vpop.f32.mrb[18].mxu0 }
0x11aa   :  { %v1755_v50 = vmul.f32 %v1751_v49, %v2361_v24  ;;  %v2070_v52 = vpop.f32.mrb[19].mxu0 }
0x11ab   :  { %v1677_v53 = vadd.f32 %v1676_v48, %v1675_v47 }
0x11ac   :  { %v1756_v54 = vsel %vm238_vm2, %v1755_v50, 0.0 }
0x11ad   :  { %v1678_v55 = vrot.slane %v1677_v53, 2  ;;  %v1757_v56 = vrot.slane %v1756_v54, 4 }
0x11af   :  { %v1679_v6 = vadd.f32 %v1678_v55, %v1677_v53  ;;  %v1758_v57 = vadd.f32 %v1757_v56, %v1756_v54 }
0x11b1   :  { %v1759_v58 = vrot.slane %v1758_v57, 2  ;;  %v1680_v59 = vrot.slane %v1679_v6, 1 }
0x11b3   :  { %v1760_v60 = vadd.f32 %v1759_v58, %v1758_v57  ;;  %v1681_v62 = vadd.f32 %v1680_v59, %v1679_v6 }
0x11b5   :  { %v1761_v61 = vrot.slane %v1760_v60, 1 }
0x11b7   :  { %v1762_v63 = vadd.f32 %v1761_v61, %v1760_v60 }
0x11b9   :  { %v1764_v24 = vsel %vm1763_vm7, %v1681_v62, %v1762_v63 }
0x11ba   :  { %v1772_v1 = vadd.f32 %v1826_v0, %v1764_v24 }
0x11bc   :  { %1774 = vst.msk [vmem:[#allocation2] sm:$0x3] %vm1773_vm8, %v1772_v1 }
0x11bd   :  { %2181 = shalt.err (!%p2178_p4)
}
0x11be   :  { %s2182_s29 = scalar_lea.hbm %s2674_s23, 32 }
0x11bf   :  { %p2183_p5 = scmp.ne.s32.totalorder %s2674_s23, %s2182_s29  ;;  %p2186_p6 = scmp.lt.u32.totalorder %s2182_s29, %s2674_s23 }
0x11c1   :  { %p2188_p7 = pnand %p2186_p6, %p2183_p5 }
0x11c3   :  { %2191 = shalt.err (!%p2188_p7)
}
0x11c4   :  { %1784 = dma.vmem_to_hbm [thread:$0]  %s1782_s6, 32, %s2674_s23, [#allocation3]  }
0x11c5   :  { %2192 = dma.done.wait [#allocation3], 32  }
0x11c6   :  { %2193 = vsyncadd [#allocation3], 4294967264 }
0x11c7   :  { %1788 = vsyncpa [#allocation3], 1 }

// kernel: forward.2
= control target key start
LH: loop header
LB: loop body
LE: loop exit
PB: predicated region body
PF: predicated region fallthrough
CT: control target
= control target key end

     0   :  { %vm43_vm0 = vcmask 254976   ;;  %vm77_vm1 = vcmask 1041408   ;;  %vm4258_vm2 = vmmov 0   ;;  %vm190_vm3 = vcmask 261120   ;;  %s4261_s13 = smov 96   ;;  %s4263_s14 = smov 32   ;;  %s5198_s0 = inlined_call_operand.vmem [shape: f32[8,2,32], index: 0, kind: input, shape index: {}]   ;;  %s5199_s3 = inlined_call_operand.vmem [shape: f32[32,64], index: 3, kind: input, shape index: {}]   ;;  %s5200_s2 = inlined_call_operand.vmem [shape: f32[32,64], index: 2, kind: input, shape index: {}]   ;;  %s5201_s7 = inlined_call_operand.vmem [shape: f32[16,64], index: 7, kind: input, shape index: {}]   ;;  %s5202_s6 = inlined_call_operand.vmem [shape: f32[16,64], index: 6, kind: input, shape index: {}]   ;;  %s5203_s4 = inlined_call_operand.vmem [shape: f32[1,64], index: 4, kind: input, shape index: {}]   ;;  %s5204_s5 = inlined_call_operand.vmem [shape: f32[1,64], index: 5, kind: input, shape index: {}]   ;;  %s5205_s1 = inlined_call_operand.vmem [shape: s32[2,1], index: 1, kind: input, shape index: {}]   ;;  %s5206_s8 = inlined_call_operand.vmem [shape: f32[32,32], index: 8, kind: input, shape index: {}]   ;;  %s5207_s9 = inlined_call_operand.vmem [shape: f32[1,32], index: 9, kind: input, shape index: {}]   ;;  %s5208_s10 = inlined_call_operand.vmem [shape: f32[2,8,32], index: 10, kind: output, shape index: {}]  }
   0x1   :  { %v35_v0 = vld [vmem:[%s5198_s0] sm:$0x3]  ;;  %v37_v1 = vld [vmem:[%s5198_s0 + $0x4] sm:$0x3]  ;;  %v36_v2 = vld [vmem:[%s5198_s0 + $0x2] sm:$0x3] }
   0x2   :  { %v44_v3 = vsel %vm43_vm0, %v35_v0, 0.0  ;;  %v50_v4 = vsel %vm43_vm0, %v37_v1, 0.0  ;;  %v38_v5 = vld [vmem:[%s5198_s0 + $0x6] sm:$0x3]  ;;  %v47_v6 = vsel %vm43_vm0, %v36_v2, 0.0  ;;  %s4264_s15 = smov 80  }
   0x3   :  { %45 = vadd.xlane.f32.xlu0 %v44_v3  ;;  %51 = vadd.xlane.f32.xlu1 %v50_v4  ;;  %v53_v7 = vsel %vm43_vm0, %v38_v5, 0.0  ;;  %v39_v8 = vld [vmem:[%s5198_s0 + $0x8] sm:$0x3]  ;;  %v40_v9 = vld [vmem:[%s5198_s0 + $0xa] sm:$0x3]  ;;  %vm264_vm6 = vcmask 130048  }
   0x4   :  { %v56_v10 = vsel %vm43_vm0, %v39_v8, 0.0  ;;  %v59_v11 = vsel %vm43_vm0, %v40_v9, 0.0  ;;  %v41_v12 = vld [vmem:[%s5198_s0 + $0xc] sm:$0x3]  ;;  %v42_v13 = vld [vmem:[%s5198_s0 + $0xe] sm:$0x3] }
   0x5   :  { %v62_v14 = vsel %vm43_vm0, %v41_v12, 0.0  ;;  %v65_v15 = vsel %vm43_vm0, %v42_v13, 0.0  ;;  %vm3157_vm11 = vcmask 1040384   ;;  %vm3160_vm14 = vcmask 1042432  }
   0x6   :  { %vm3162_vm15 = vcmask 1043456  }
   0x7   :  { %48 = vadd.xlane.f32.xlu0 %v47_v6  ;;  %54 = vadd.xlane.f32.xlu1 %v53_v7 }
   0xb   :  { %57 = vadd.xlane.f32.xlu0 %v56_v10  ;;  %60 = vadd.xlane.f32.xlu1 %v59_v11  ;;  %v175_v10 = vld [vmem:[%s5199_s3 + $0x8] sm:$0xff]  ;;  %v170_v11 = vld [vmem:[%s5200_s2] sm:$0xff] }
   0xf   :  { %63 = vadd.xlane.f32.xlu0 %v62_v14  ;;  %66 = vadd.xlane.f32.xlu1 %v65_v15  ;;  %v176_v14 = vld [vmem:[%s5199_s3 + $0x10] sm:$0xff]  ;;  %v177_v15 = vld [vmem:[%s5199_s3 + $0x18] sm:$0xff] }
  0x90   :  { %v46_v16 = vpop.xlane.xlu0 %45  ;;  %v52_v17 = vpop.xlane.xlu1 %51 }
  0x91   :  { %v69_v18 = vmul.f32 0.03125, %v46_v16  ;;  %v71_v21 = vmul.f32 0.03125, %v52_v17  ;;  %v4259_v16 = vmov 0.0  }
  0x92   :  { %3609 = vmatprep.mubr.msk.f32.mxu0 %vm4258_vm2, %v4259_v16  ;;  %3627 = vmatprep.mubr.msk.f32.mxu1 %vm4258_vm2, %v4259_v16 }
  0x93   :  { %v78_v24 = vsel %vm77_vm1, %v69_v18, 0.0  ;;  %v81_v29 = vsel %vm77_vm1, %v71_v21, 0.0  ;;  %v172_v18 = vld [vmem:[%s5200_s2 + $0x10] sm:$0xff] }
  0x94   :  { %v49_v19 = vpop.xlane.xlu0 %48  ;;  %v55_v20 = vpop.xlane.xlu1 %54 }
  0x95   :  { %v70_v22 = vmul.f32 0.03125, %v49_v19  ;;  %v72_v23 = vmul.f32 0.03125, %v55_v20  ;;  %v173_v19 = vld [vmem:[%s5200_s2 + $0x18] sm:$0xff]  ;;  %v4435_v20 = vpack.c.bf16 %v177_v15, %v176_v14 }
  0x96   :  { %v4439_v21 = vpack.c.bf16 %v173_v19, %v172_v18  ;;  %v4541_v19 = vld [vmem:[%s5205_s1] sm:$0x3]  ;;  %s4262_s1 = smov 16  }
  0x97   :  { %v79_v25 = vsel %vm77_vm1, %v70_v22, 0.0  ;;  %v83_v30 = vsel %vm77_vm1, %v72_v23, 0.0  ;;  %vm556_vm4 = vcmp.gt.s32.totalorder %v4541_v19, 7  ;;  %vm363_vm5 = vcmp.gt.s32.totalorder %v4541_v19, 0 }
  0x98   :  { %v80_v26 = vadd.f32 %v79_v25, %v78_v24  ;;  %v58_v27 = vpop.xlane.xlu0 %57  ;;  %v61_v28 = vpop.xlane.xlu1 %60  ;;  %vm941_vm7 = vcmp.gt.s32.totalorder %v4541_v19, 6  ;;  %vm748_vm8 = vcmp.gt.s32.totalorder %v4541_v19, 1  ;;  %vm1327_vm9 = vcmp.gt.s32.totalorder %v4541_v19, 5 }
  0x99   :  { %v73_v31 = vmul.f32 0.03125, %v58_v27  ;;  %v74_v32 = vmul.f32 0.03125, %v61_v28  ;;  %vm1134_vm10 = vcmp.gt.s32.totalorder %v4541_v19, 2  ;;  %vm1713_vm12 = vcmp.gt.s32.totalorder %v4541_v19, 4 }
  0x9a   :  { %v82_v33 = vadd.f32 %v81_v29, %v80_v26  ;;  %vm1520_vm13 = vcmp.gt.s32.totalorder %v4541_v19, 3 }
  0x9b   :  { %v85_v34 = vsel %vm77_vm1, %v73_v31, 0.0  ;;  %v87_v38 = vsel %vm77_vm1, %v74_v32, 0.0 }
  0x9c   :  { %v84_v35 = vadd.f32 %v83_v30, %v82_v33  ;;  %v64_v36 = vpop.xlane.xlu0 %63  ;;  %v67_v37 = vpop.xlane.xlu1 %66 }
  0x9d   :  { %v75_v39 = vmul.f32 0.03125, %v64_v36  ;;  %v76_v40 = vmul.f32 0.03125, %v67_v37 }
  0x9e   :  { %v86_v41 = vadd.f32 %v85_v34, %v84_v35 }
  0x9f   :  { %v89_v42 = vsel %vm77_vm1, %v75_v39, 0.0  ;;  %v91_v44 = vsel %vm77_vm1, %v76_v40, 0.0 }
  0xa0   :  { %v88_v43 = vadd.f32 %v87_v38, %v86_v41 }
  0xa2   :  { %v90_v45 = vadd.f32 %v89_v42, %v88_v43 }
  0xa4   :  { %v92_v46 = vadd.f32 %v91_v44, %v90_v45 }
  0xa6   :  { %v94_v47 = vmul.f32 0.125, %v92_v46 }
  0xa8   :  { %v4360_v48 = vsub.f32 %v36_v2, %v94_v47  ;;  %v4362_v49 = vsub.f32 %v35_v0, %v94_v47  ;;  %v4364_v50 = vsub.f32 %v38_v5, %v94_v47  ;;  %v4366_v51 = vsub.f32 %v37_v1, %v94_v47 }
  0xa9   :  { %v4372_v54 = vsub.f32 %v40_v9, %v94_v47  ;;  %v4374_v55 = vsub.f32 %v39_v8, %v94_v47  ;;  %v4382_v60 = vsub.f32 %v42_v13, %v94_v47  ;;  %v4384_v61 = vsub.f32 %v41_v12, %v94_v47  ;;  %v174_v9 = vld [vmem:[%s5199_s3] sm:$0xff]  ;;  %v171_v13 = vld [vmem:[%s5200_s2 + $0x8] sm:$0xff] }
  0xaa   :  { %v104_v52 = vmul.f32 %v4360_v48, %v4360_v48  ;;  %v103_v53 = vmul.f32 %v4362_v49, %v4362_v49  ;;  %v106_v58 = vmul.f32 %v4364_v50, %v4364_v50  ;;  %v105_v59 = vmul.f32 %v4366_v51, %v4366_v51 }
  0xab   :  { %v108_v0 = vmul.f32 %v4372_v54, %v4372_v54  ;;  %v107_v1 = vmul.f32 %v4374_v55, %v4374_v55  ;;  %v110_v4 = vmul.f32 %v4382_v60, %v4382_v60  ;;  %v109_v5 = vmul.f32 %v4384_v61, %v4384_v61 }
  0xac   :  { %v114_v56 = vsel %vm43_vm0, %v104_v52, 0.0  ;;  %v111_v57 = vsel %vm43_vm0, %v103_v53, 0.0  ;;  %v120_v62 = vsel %vm43_vm0, %v106_v58, 0.0  ;;  %v117_v63 = vsel %vm43_vm0, %v105_v59, 0.0 }
  0xad   :  { %115 = vadd.xlane.f32.xlu1 %v114_v56  ;;  %112 = vadd.xlane.f32.xlu0 %v111_v57  ;;  %v126_v2 = vsel %vm43_vm0, %v108_v0, 0.0  ;;  %v123_v3 = vsel %vm43_vm0, %v107_v1, 0.0  ;;  %v132_v6 = vsel %vm43_vm0, %v110_v4, 0.0  ;;  %v129_v7 = vsel %vm43_vm0, %v109_v5, 0.0  ;;  %v183_v0 = vld [vmem:[%s5201_s7 + $0x8] sm:$0xff]  ;;  %v180_v1 = vld [vmem:[%s5202_s6] sm:$0xff] }
  0xae   :  { %v4257_v8 = vmov 0.0|0.0   ;;  %v4411_v12 = vpack.c.bf16 %v175_v10, %v174_v9  ;;  %v4426_v17 = vpack.c.bf16 %v171_v13, %v170_v11  ;;  %v4534_v9 = vld [vmem:[%s5204_s5] ss:$0 sm:$0xff]  ;;  %vm3164_vm0 = vcmask 1044480  }
  0xaf   :  { %3920 = vmatprep.subr.bf16.mxu1 %v4257_v8  ;;  %3911 = vmatprep.subr.bf16.mxu0 %v4257_v8 }
  0xb0   :  { %3922 = vmatpush3.bf16.msra.mxu1 %v4411_v12  ;;  %3913 = vmatpush3.bf16.msra.mxu0 %v4426_v17 }
  0xb1   :  { %121 = vadd.xlane.f32.xlu1 %v120_v62  ;;  %118 = vadd.xlane.f32.xlu0 %v117_v63  ;;  %v182_v63 = vld [vmem:[%s5201_s7] sm:$0xff] }
  0xb2   :  { %3923 = vmatprep.subr.bf16.mxu1 %v4257_v8  ;;  %3914 = vmatprep.subr.bf16.mxu0 %v4257_v8  ;;  %v4468_v4 = vpack.c.bf16 %v183_v0, %v182_v63 }
  0xb4   :  { %3925 = vmatpush3.bf16.msra.mxu1 %v4435_v20  ;;  %3916 = vmatpush3.bf16.msra.mxu0 %v4439_v21 }
  0xb5   :  { %127 = vadd.xlane.f32.xlu1 %v126_v2  ;;  %124 = vadd.xlane.f32.xlu0 %v123_v3  ;;  %v181_v2 = vld [vmem:[%s5202_s6 + $0x8] sm:$0xff] }
  0xb6   :  { %3926 = vmatprep.subr.bf16.mxu1 %v4257_v8  ;;  %3917 = vmatprep.subr.bf16.mxu0 %v4257_v8  ;;  %v4470_v5 = vpack.c.bf16 %v181_v2, %v180_v1 }
  0xb9   :  { %133 = vadd.xlane.f32.xlu1 %v132_v6  ;;  %130 = vadd.xlane.f32.xlu0 %v129_v7 }
 0x13a   :  { %v116_v22 = vpop.xlane.xlu1 %115  ;;  %v113_v23 = vpop.xlane.xlu0 %112 }
 0x13b   :  { %v136_v24 = vmul.f32 0.03125, %v116_v22  ;;  %v135_v25 = vmul.f32 0.03125, %v113_v23 }
 0x13d   :  { %v144_v26 = vsel %vm77_vm1, %v136_v24, 0.0  ;;  %v143_v27 = vsel %vm77_vm1, %v135_v25, 0.0  ;;  %v3424_v24 = vsel %vm556_vm4, 1.0, %v4259_v16  ;;  %v3421_v25 = vsel %vm363_vm5, 1.0, %v4259_v16 }
 0x13e   :  { %v122_v28 = vpop.xlane.xlu1 %121  ;;  %v119_v29 = vpop.xlane.xlu0 %118  ;;  %v145_v32 = vadd.f32 %v144_v26, %v143_v27  ;;  %vm3166_vm4 = vcmask 1045504  }
 0x13f   :  { %v138_v30 = vmul.f32 0.03125, %v122_v28  ;;  %v137_v31 = vmul.f32 0.03125, %v119_v29 }
 0x141   :  { %v146_v33 = vsel %vm77_vm1, %v137_v31, 0.0  ;;  %v148_v37 = vsel %vm77_vm1, %v138_v30, 0.0 }
 0x142   :  { %v147_v34 = vadd.f32 %v146_v33, %v145_v32  ;;  %v128_v35 = vpop.xlane.xlu1 %127  ;;  %v125_v36 = vpop.xlane.xlu0 %124 }
 0x143   :  { %v140_v38 = vmul.f32 0.03125, %v128_v35  ;;  %v139_v39 = vmul.f32 0.03125, %v125_v36 }
 0x144   :  { %v149_v40 = vadd.f32 %v148_v37, %v147_v34 }
 0x145   :  { %v150_v41 = vsel %vm77_vm1, %v139_v39, 0.0  ;;  %v152_v45 = vsel %vm77_vm1, %v140_v38, 0.0 }
 0x146   :  { %v151_v42 = vadd.f32 %v150_v41, %v149_v40  ;;  %v134_v43 = vpop.xlane.xlu1 %133  ;;  %v131_v44 = vpop.xlane.xlu0 %130  ;;  %v565_v40 = vsub.f32 1.0, %v3424_v24 }
 0x147   :  { %v142_v46 = vmul.f32 0.03125, %v134_v43  ;;  %v141_v47 = vmul.f32 0.03125, %v131_v44 }
 0x148   :  { %v153_v52 = vadd.f32 %v152_v45, %v151_v42 }
 0x149   :  { %v154_v53 = vsel %vm77_vm1, %v141_v47, 0.0  ;;  %v156_v57 = vsel %vm77_vm1, %v142_v46, 0.0 }
 0x14a   :  { %v155_v56 = vadd.f32 %v154_v53, %v153_v52  ;;  %v372_v52 = vsub.f32 1.0, %v3421_v25 }
 0x14c   :  { %v157_v58 = vadd.f32 %v156_v57, %v155_v56 }
 0x14e   :  { %v158_v59 = vmul.f32 0.125, %v157_v58 }
 0x150   :  { %v159_v62 = vadd.f32 1e-05, %v158_v59 }
 0x152   :  { %4125 = vrsqrt.f32 %v159_v62 }
 0x15c   :  { %v4466_v3 = vpop.eup %4125 }
 0x15d   :  { %v4474_v6 = vmul.f32 %v4466_v3, %v4362_v49  ;;  %v4478_v7 = vmul.f32 %v4466_v3, %v4382_v60  ;;  %v4506_v49 = vmul.f32 %v4466_v3, %v4360_v48  ;;  %v4510_v60 = vmul.f32 %v4466_v3, %v4384_v61  ;;  %v4529_v61 = vld [vmem:[%s5203_s4] ss:$0 sm:$0xff] }
 0x15e   :  { %v4260_v48 = vmov 0  }
 0x15f   :  { %3610 = vmatmul.mubr.msk.f32.vlgmr.msra.gmra.mrb[0].mxu0 %vm190_vm3, %v4474_v6  ;;  %3628 = vmatmul.mubr.msk.f32.vlgmr.msra.gmra.mrb[0].mxu1 %vm190_vm3, %v4478_v7 }
 0x160   :  { %3928 = vmatpush3.bf16.msra.mxu1 %v4468_v4  ;;  %3919 = vmatpush3.bf16.msra.mxu0 %v4470_v5 }
 0x161   :  { %3616 = vmatprep.mubr.msk.f32.mxu0 %vm4258_vm2, %v4259_v16  ;;  %3634 = vmatprep.mubr.msk.f32.mxu1 %vm4258_vm2, %v4259_v16 }
 0x162   :  { %3929 = vmatprep.subr.bf16.mxu0 %v4257_v8  ;;  %3938 = vmatprep.subr.bf16.mxu1 %v4257_v8 }
 0x163   :  { %4123 = vset.pattern.permute.xlu0 %v4260_v48  ;;  %4124 = vset.pattern.permute.xlu1 %v4260_v48 }
 0x167   :  { %3617 = vmatmul.mubr.f32.vlgmr.msra.gmra.mrb[0].mxu0 %v4259_v16  ;;  %3635 = vmatmul.mubr.f32.vlgmr.msra.gmra.mrb[0].mxu1 %v4259_v16 }
 0x168   :  { %3931 = vmatpush3.bf16.msra.mxu0 %v4426_v17  ;;  %3940 = vmatpush3.bf16.msra.mxu1 %v4411_v12 }
 0x169   :  { %3932 = vmatprep.subr.bf16.mxu0 %v4257_v8  ;;  %3941 = vmatprep.subr.bf16.mxu1 %v4257_v8 }
 0x16a   :  { %3645 = vmatprep.mubr.msk.f32.mxu0 %vm4258_vm2, %v4259_v16  ;;  %3663 = vmatprep.mubr.msk.f32.mxu1 %vm4258_vm2, %v4259_v16 }
 0x16c   :  { %3934 = vmatpush3.bf16.msra.mxu0 %v4439_v21  ;;  %3943 = vmatpush3.bf16.msra.mxu1 %v4435_v20 }
 0x16d   :  { %3944 = vmatprep.subr.bf16.mxu1 %v4257_v8  ;;  %3935 = vmatprep.subr.bf16.mxu0 %v4257_v8 }
 0x16f   :  { %3646 = vmatmul.mubr.msk.f32.vlgmr.msra.gmra.mrb[2].mxu0 %vm190_vm3, %v4506_v49  ;;  %3664 = vmatmul.mubr.msk.f32.vlgmr.msra.gmra.mrb[2].mxu1 %vm190_vm3, %v4510_v60 }
 0x170   :  { %3946 = vmatpush3.bf16.msra.mxu1 %v4468_v4  ;;  %3670 = vmatprep.mubr.msk.f32.mxu1 %vm4258_vm2, %v4259_v16 }
 0x171   :  { %3956 = vmatprep.subr.bf16.mxu1 %v4257_v8  ;;  %3937 = vmatpush3.bf16.msra.mxu0 %v4470_v5 }
 0x172   :  { %3652 = vmatprep.mubr.msk.f32.mxu0 %vm4258_vm2, %v4259_v16  ;;  %3947 = vmatprep.subr.bf16.mxu0 %v4257_v8 }
 0x23a   :  { %v334_v10 = vpop.f32.mrb[0].mxu0  ;;  %v527_v11 = vpop.f32.mrb[0].mxu1 }
 0x23b   :  { %v4067_v13 = vadd.f32 %v4529_v61, %v334_v10  ;;  %v4068_v14 = vadd.f32 %v4534_v9, %v527_v11  ;;  %v3618_v15 = vpop.f32.mrb[1].mxu0  ;;  %v3636_v18 = vpop.f32.mrb[1].mxu1 }
 0x23d   :  { %4127 = vtanh.f32 %v4067_v13  ;;  %v532_v26 = vsub.f32 0.0, %v4068_v14  ;;  %v339_v27 = vsub.f32 0.0, %v4067_v13 }
 0x23e   :  { %4129 = vtanh.f32 %v4068_v14 }
 0x23f   :  { %v533_v28 = vmul.f32 1.442695, %v532_v26  ;;  %v340_v29 = vmul.f32 1.442695, %v339_v27 }
 0x241   :  { %4131 = vpow2.f32 %v533_v28 }
 0x242   :  { %4133 = vpow2.f32 %v340_v29 }
 0x247   :  { %v4128_v22 = vpop.eup %4127 }
 0x248   :  { %v4130_v23 = vpop.eup %4129  ;;  %348 = vrot.lane.b32.xlu1 %v4128_v22, %s4261_s13 }
 0x249   :  { %541 = vrot.lane.b32.xlu0 %v4130_v23, %s4261_s13  ;;  %v4590_v23 = vmul.f32 %v4466_v3, %v4372_v54  ;;  %v4607_v54 = vmul.f32 %v4466_v3, %v4366_v51 }
 0x24b   :  { %v4132_v30 = vpop.eup %4131 }
 0x24c   :  { %v535_v31 = vadd.f32 1.0, %v4132_v30  ;;  %v4134_v32 = vpop.eup %4133 }
 0x24d   :  { %561 = vperm.xlu0 %4123, %v3424_v24   ;;  %v342_v33 = vadd.f32 1.0, %v4134_v32 }
 0x24e   :  { %4135 = vrcp.f32 %v535_v31 }
 0x24f   :  { %4137 = vrcp.f32 %v342_v33 }
 0x251   :  { %368 = vperm.xlu0 %4123, %v3421_v25  }
 0x258   :  { %v4136_v34 = vpop.eup %4135 }
 0x259   :  { %v4138_v38 = vpop.eup %4137  ;;  %v539_v41 = vmul.f32 0.0, %v4136_v34 }
 0x25a   :  { %v346_v44 = vmul.f32 0.0, %v4138_v38 }
 0x2ba   :  { %v349_v37 = vpop.permute.xlu1 %348 }
 0x2bb   :  { %v542_v35 = vpop.permute.xlu0 %541  ;;  %v351_v39 = vmul.f32 %v4138_v38, %v349_v37 }
 0x2bc   :  { %v544_v36 = vmul.f32 %v4136_v34, %v542_v35 }
 0x2be   :  { %546 = vrot.lane.b32.xlu1 %v544_v36, %s4262_s1 }
 0x2c2   :  { %353 = vrot.lane.b32.xlu1 %v351_v39, %s4262_s1 }
 0x2c6   :  { %568 = vperm.xlu1 %4124, %v565_v40  }
 0x2cc   :  { %v4556_v58 = vpop.permute.xlu0 %561 }
 0x2d0   :  { %v4567_v1 = vpop.permute.xlu0 %368 }
 0x330   :  { %v547_v42 = vpop.permute.xlu1 %546 }
 0x331   :  { %v4551_v43 = vadd.f32 %v547_v42, %v539_v41 }
 0x333   :  { %4139 = vtanh.f32 %v4551_v43 }
 0x334   :  { %v354_v45 = vpop.permute.xlu1 %353 }
 0x335   :  { %v356_v46 = vadd.f32 %v354_v45, %v346_v44  ;;  %v3430_v44 = vsel %vm941_vm7, 1.0, %v4259_v16 }
 0x337   :  { %4141 = vtanh.f32 %v356_v46  ;;  %v380_v11 = vmul.f32 %v4567_v1, %v356_v46 }
 0x33d   :  { %v4140_v47 = vpop.eup %4139 }
 0x33e   :  { %552 = vrot.lane.b32.xlu1 %v4140_v47, %s4263_s14 }
 0x341   :  { %v4142_v53 = vpop.eup %4141 }
 0x342   :  { %375 = vperm.xlu1 %4124, %v372_v52   ;;  %359 = vrot.lane.b32.xlu0 %v4142_v53, %s4263_s14  ;;  %v950_v52 = vsub.f32 1.0, %v3430_v44  ;;  %v3427_v53 = vsel %vm748_vm8, 1.0, %v4259_v16 }
 0x345   :  { %v569_v56 = vpop.permute.xlu1 %568 }
 0x346   :  { %v4558_v62 = vmul.f32 0.0, %v569_v56  ;;  %v573_v56 = vmul.f32 %v4556_v58, %v4551_v43 }
 0x3b0   :  { %v553_v57 = vpop.permute.xlu1 %552 }
 0x3b1   :  { %v555_v59 = vmul.f32 %v4136_v34, %v553_v57  ;;  %v4629_v57 = vadd.f32 %v573_v56, %v4558_v62 }
 0x3b3   :  { %v4561_v63 = vmul.f32 %v4556_v58, %v555_v59 }
 0x3b4   :  { %v360_v2 = vpop.permute.xlu0 %359 }
 0x3b5   :  { %v4565_v0 = vadd.f32 %v4558_v62, %v4561_v63  ;;  %v362_v48 = vmul.f32 %v4138_v38, %v360_v2 }
 0x3b7   :  { %842 = vrot.lane.b32.xlu1 %v4565_v0, %s4264_s15  ;;  %v4573_v13 = vmul.f32 %v4567_v1, %v362_v48 }
 0x3c1   :  { %v376_v10 = vpop.permute.xlu1 %375 }
 0x3c2   :  { %v378_v14 = vmul.f32 0.0, %v376_v10 }
 0x3c4   :  { %v4576_v15 = vadd.f32 %v378_v14, %v4573_v13  ;;  %v4578_v18 = vadd.f32 %v380_v11, %v378_v14  ;;  %v757_v11 = vsub.f32 1.0, %v3427_v53 }
 0x3c6   :  { %649 = vrot.lane.b32.xlu0 %v4576_v15, %s4264_s15 }
 0x429   :  { %v843_v22 = vpop.permute.xlu1 %842 }
 0x42a   :  { %3671 = vmatmul.mubr.msk.f32.vlgmr.msra.gmra.mrb[2].mxu1 %vm264_vm6, %v843_v22 }
 0x42b   :  { %3958 = vmatpush3.bf16.msra.mxu1 %v4411_v12  ;;  %3699 = vmatprep.mubr.msk.f32.mxu1 %vm4258_vm2, %v4259_v16 }
 0x42c   :  { %3959 = vmatprep.subr.bf16.mxu1 %v4257_v8 }
 0x42f   :  { %3961 = vmatpush3.bf16.msra.mxu1 %v4435_v20 }
 0x430   :  { %3962 = vmatprep.subr.bf16.mxu1 %v4257_v8 }
 0x432   :  { %3700 = vmatmul.mubr.msk.f32.vlgmr.msra.gmra.mrb[4].mxu1 %vm190_vm3, %v4590_v23 }
 0x433   :  { %3964 = vmatpush3.bf16.msra.mxu1 %v4468_v4  ;;  %3706 = vmatprep.mubr.msk.f32.mxu1 %vm4258_vm2, %v4259_v16 }
 0x434   :  { %3974 = vmatprep.subr.bf16.mxu1 %v4257_v8 }
 0x438   :  { %v650_v24 = vpop.permute.xlu0 %649 }
 0x439   :  { %3653 = vmatmul.mubr.msk.f32.vlgmr.msra.gmra.mrb[2].mxu0 %vm264_vm6, %v650_v24 }
 0x43a   :  { %3949 = vmatpush3.bf16.msra.mxu0 %v4426_v17  ;;  %3681 = vmatprep.mubr.msk.f32.mxu0 %vm4258_vm2, %v4259_v16 }
 0x43b   :  { %3950 = vmatprep.subr.bf16.mxu0 %v4257_v8 }
 0x43e   :  { %3952 = vmatpush3.bf16.msra.mxu0 %v4439_v21 }
 0x43f   :  { %3953 = vmatprep.subr.bf16.mxu0 %v4257_v8 }
 0x441   :  { %3682 = vmatmul.mubr.msk.f32.vlgmr.msra.gmra.mrb[4].mxu0 %vm190_vm3, %v4607_v54 }
 0x442   :  { %3955 = vmatpush3.bf16.msra.mxu0 %v4470_v5  ;;  %3688 = vmatprep.mubr.msk.f32.mxu0 %vm4258_vm2, %v4259_v16 }
 0x443   :  { %3965 = vmatprep.subr.bf16.mxu0 %v4257_v8 }
 0x4fd   :  { %v912_v25 = vpop.f32.mrb[2].mxu1 }
 0x4fe   :  { %v4070_v26 = vadd.f32 %v4534_v9, %v912_v25  ;;  %v3672_v27 = vpop.f32.mrb[3].mxu1 }
 0x500   :  { %4143 = vtanh.f32 %v4070_v26  ;;  %v917_v32 = vsub.f32 0.0, %v4070_v26 }
 0x502   :  { %v918_v33 = vmul.f32 1.442695, %v917_v32 }
 0x50a   :  { %v4144_v28 = vpop.eup %4143 }
 0x50b   :  { %926 = vrot.lane.b32.xlu1 %v4144_v28, %s4261_s13 }
 0x50c   :  { %v719_v51 = vpop.f32.mrb[2].mxu0 }
 0x50d   :  { %v4069_v29 = vadd.f32 %v4529_v61, %v719_v51  ;;  %v3654_v30 = vpop.f32.mrb[3].mxu0 }
 0x50f   :  { %4145 = vtanh.f32 %v4069_v29  ;;  %v724_v34 = vsub.f32 0.0, %v4069_v29 }
 0x510   :  { %4147 = vpow2.f32 %v918_v33 }
 0x511   :  { %v725_v36 = vmul.f32 1.442695, %v724_v34 }
 0x513   :  { %4149 = vpow2.f32 %v725_v36 }
 0x519   :  { %v4146_v31 = vpop.eup %4145 }
 0x51a   :  { %733 = vrot.lane.b32.xlu0 %v4146_v31, %s4261_s13  ;;  %v4148_v35 = vpop.eup %4147 }
 0x51b   :  { %v920_v37 = vadd.f32 1.0, %v4148_v35 }
 0x51d   :  { %4151 = vrcp.f32 %v920_v37  ;;  %v4150_v38 = vpop.eup %4149 }
 0x51e   :  { %v727_v41 = vadd.f32 1.0, %v4150_v38 }
 0x520   :  { %4153 = vrcp.f32 %v727_v41 }
 0x527   :  { %v4152_v39 = vpop.eup %4151 }
 0x528   :  { %v924_v59 = vmul.f32 %v4152_v39, %v4629_v57 }
 0x52a   :  { %v4154_v45 = vpop.eup %4153 }
 0x52b   :  { %v731_v14 = vmul.f32 %v4154_v45, %v4578_v18 }
 0x57d   :  { %v927_v40 = vpop.permute.xlu1 %926 }
 0x57e   :  { %v929_v42 = vmul.f32 %v4152_v39, %v927_v40 }
 0x580   :  { %931 = vrot.lane.b32.xlu1 %v929_v42, %s4262_s1 }
 0x584   :  { %946 = vperm.xlu1 %4124, %v3430_v44  }
 0x58c   :  { %v734_v46 = vpop.permute.xlu0 %733 }
 0x58d   :  { %v736_v47 = vmul.f32 %v4154_v45, %v734_v46 }
 0x58f   :  { %738 = vrot.lane.b32.xlu0 %v736_v47, %s4262_s1 }
 0x593   :  { %953 = vperm.xlu0 %4123, %v950_v52  }
 0x597   :  { %753 = vperm.xlu0 %4123, %v3427_v53  }
 0x5f2   :  { %v932_v2 = vpop.permute.xlu1 %931 }
 0x5f3   :  { %v4632_v48 = vadd.f32 %v932_v2, %v924_v59 }
 0x5f5   :  { %4155 = vtanh.f32 %v4632_v48 }
 0x5ff   :  { %v4156_v10 = vpop.eup %4155 }
 0x600   :  { %937 = vrot.lane.b32.xlu1 %v4156_v10, %s4263_s14 }
 0x601   :  { %v739_v22 = vpop.permute.xlu0 %738 }
 0x602   :  { %v4637_v24 = vadd.f32 %v739_v22, %v731_v14  ;;  %v3436_v22 = vsel %vm1327_vm9, 1.0, %v4259_v16 }
 0x603   :  { %v4641_v62 = vpop.permute.xlu1 %946 }
 0x604   :  { %4157 = vtanh.f32 %v4637_v24  ;;  %760 = vperm.xlu1 %4124, %v757_v11  }
 0x60e   :  { %v4158_v43 = vpop.eup %4157 }
 0x60f   :  { %744 = vrot.lane.b32.xlu0 %v4158_v43, %s4263_s14 }
 0x612   :  { %v4643_v25 = vpop.permute.xlu0 %953 }
 0x613   :  { %v956_v28 = vmul.f32 %v4643_v25, %v4565_v0 }
 0x616   :  { %v4655_v30 = vpop.permute.xlu0 %753 }
 0x672   :  { %v938_v26 = vpop.permute.xlu1 %937 }
 0x673   :  { %v940_v27 = vmul.f32 %v4152_v39, %v938_v26 }
 0x675   :  { %v4648_v51 = vmul.f32 %v4641_v62, %v940_v27 }
 0x677   :  { %v4651_v29 = vadd.f32 %v956_v28, %v4648_v51  ;;  %v1336_v28 = vsub.f32 1.0, %v3436_v22 }
 0x679   :  { %1228 = vrot.lane.b32.xlu1 %v4651_v29, %s4264_s15 }
 0x681   :  { %v745_v31 = vpop.permute.xlu0 %744 }
 0x682   :  { %v747_v32 = vmul.f32 %v4154_v45, %v745_v31  ;;  %v3433_v31 = vsel %vm1134_vm10, 1.0, %v4259_v16 }
 0x683   :  { %v4657_v33 = vpop.permute.xlu1 %760 }
 0x684   :  { %v4660_v34 = vmul.f32 %v4655_v30, %v747_v32  ;;  %v763_v0 = vmul.f32 %v4657_v33, %v4576_v15  ;;  %v4677_v15 = vmul.f32 %v4466_v3, %v4374_v55  ;;  %v4694_v55 = vmul.f32 %v4466_v3, %v4364_v50 }
 0x685   :  { %v959_v32 = vmul.f32 %v4643_v25, %v4629_v57 }
 0x686   :  { %v4665_v35 = vadd.f32 %v763_v0, %v4660_v34  ;;  %v958_v0 = vmul.f32 %v4641_v62, %v4632_v48 }
 0x688   :  { %1035 = vrot.lane.b32.xlu0 %v4665_v35, %s4264_s15 }
 0x6eb   :  { %v1229_v36 = vpop.permute.xlu1 %1228 }
 0x6ec   :  { %3707 = vmatmul.mubr.msk.f32.vlgmr.msra.gmra.mrb[4].mxu1 %vm264_vm6, %v1229_v36  ;;  %v4717_v36 = vadd.f32 %v959_v32, %v958_v0 }
 0x6ed   :  { %3976 = vmatpush3.bf16.msra.mxu1 %v4411_v12  ;;  %3735 = vmatprep.mubr.msk.f32.mxu1 %vm4258_vm2, %v4259_v16 }
 0x6ee   :  { %3977 = vmatprep.subr.bf16.mxu1 %v4257_v8 }
 0x6f1   :  { %3979 = vmatpush3.bf16.msra.mxu1 %v4435_v20 }
 0x6f2   :  { %3980 = vmatprep.subr.bf16.mxu1 %v4257_v8 }
 0x6f4   :  { %3736 = vmatmul.mubr.msk.f32.vlgmr.msra.gmra.mrb[6].mxu1 %vm190_vm3, %v4677_v15 }
 0x6f5   :  { %3982 = vmatpush3.bf16.msra.mxu1 %v4468_v4  ;;  %3742 = vmatprep.mubr.msk.f32.mxu1 %vm4258_vm2, %v4259_v16 }
 0x6f6   :  { %3992 = vmatprep.subr.bf16.mxu1 %v4257_v8 }
 0x6fa   :  { %v1036_v37 = vpop.permute.xlu0 %1035 }
 0x6fb   :  { %3689 = vmatmul.mubr.msk.f32.vlgmr.msra.gmra.mrb[4].mxu0 %vm264_vm6, %v1036_v37 }
 0x6fc   :  { %3967 = vmatpush3.bf16.msra.mxu0 %v4426_v17  ;;  %3717 = vmatprep.mubr.msk.f32.mxu0 %vm4258_vm2, %v4259_v16 }
 0x6fd   :  { %3968 = vmatprep.subr.bf16.mxu0 %v4257_v8 }
 0x700   :  { %3970 = vmatpush3.bf16.msra.mxu0 %v4439_v21 }
 0x701   :  { %3971 = vmatprep.subr.bf16.mxu0 %v4257_v8 }
 0x703   :  { %3718 = vmatmul.mubr.msk.f32.vlgmr.msra.gmra.mrb[6].mxu0 %vm190_vm3, %v4694_v55 }
 0x704   :  { %3973 = vmatpush3.bf16.msra.mxu0 %v4470_v5  ;;  %3724 = vmatprep.mubr.msk.f32.mxu0 %vm4258_vm2, %v4259_v16 }
 0x705   :  { %3983 = vmatprep.subr.bf16.mxu0 %v4257_v8 }
 0x7bf   :  { %v1298_v38 = vpop.f32.mrb[4].mxu1 }
 0x7c0   :  { %v4072_v39 = vadd.f32 %v4534_v9, %v1298_v38  ;;  %v3708_v40 = vpop.f32.mrb[5].mxu1 }
 0x7c1   :  { %v766_v40 = vmul.f32 %v4657_v33, %v4578_v18 }
 0x7c2   :  { %4159 = vtanh.f32 %v4072_v39  ;;  %v1303_v45 = vsub.f32 0.0, %v4072_v39 }
 0x7c4   :  { %v1304_v46 = vmul.f32 1.442695, %v1303_v45 }
 0x7cc   :  { %v4160_v41 = vpop.eup %4159 }
 0x7cd   :  { %1312 = vrot.lane.b32.xlu1 %v4160_v41, %s4261_s13  ;;  %v765_v41 = vmul.f32 %v4655_v30, %v4637_v24 }
 0x7ce   :  { %v1105_v50 = vpop.f32.mrb[4].mxu0 }
 0x7cf   :  { %v4071_v3 = vadd.f32 %v4529_v61, %v1105_v50  ;;  %v3690_v42 = vpop.f32.mrb[5].mxu0  ;;  %v4727_v50 = vadd.f32 %v766_v40, %v765_v41 }
 0x7d1   :  { %4161 = vtanh.f32 %v4071_v3  ;;  %v1110_v47 = vsub.f32 0.0, %v4071_v3  ;;  %v1143_v3 = vsub.f32 1.0, %v3433_v31 }
 0x7d2   :  { %4163 = vpow2.f32 %v1304_v46 }
 0x7d3   :  { %v1111_v53 = vmul.f32 1.442695, %v1110_v47 }
 0x7d5   :  { %4165 = vpow2.f32 %v1111_v53 }
 0x7db   :  { %v4162_v44 = vpop.eup %4161 }
 0x7dc   :  { %1119 = vrot.lane.b32.xlu0 %v4162_v44, %s4261_s13  ;;  %v4164_v52 = vpop.eup %4163 }
 0x7dd   :  { %v1306_v56 = vadd.f32 1.0, %v4164_v52 }
 0x7df   :  { %4167 = vrcp.f32 %v1306_v56  ;;  %v4166_v59 = vpop.eup %4165 }
 0x7e0   :  { %v1113_v11 = vadd.f32 1.0, %v4166_v59 }
 0x7e2   :  { %4169 = vrcp.f32 %v1113_v11 }
 0x7e9   :  { %v4168_v2 = vpop.eup %4167 }
 0x7ea   :  { %v1310_v37 = vmul.f32 %v4168_v2, %v4717_v36 }
 0x7ec   :  { %v4170_v43 = vpop.eup %4169 }
 0x7ed   :  { %v1117_v48 = vmul.f32 %v4170_v43, %v4727_v50 }
 0x83f   :  { %v1313_v10 = vpop.permute.xlu1 %1312 }
 0x840   :  { %v1315_v14 = vmul.f32 %v4168_v2, %v1313_v10 }
 0x842   :  { %1317 = vrot.lane.b32.xlu1 %v1315_v14, %s4262_s1  ;;  %v3137_v14 = vrot.slane %v4660_v34, 7 }
 0x844   :  { %v3158_v32 = vsel %vm3157_vm11, %v4573_v13, %v3137_v14 }
 0x846   :  { %1332 = vperm.xlu1 %4124, %v3436_v22  }
 0x84e   :  { %v1120_v26 = vpop.permute.xlu0 %1119 }
 0x84f   :  { %v1122_v27 = vmul.f32 %v4170_v43, %v1120_v26  ;;  %v3288_v26 = vrot.slane %v4573_v13, 1 }
 0x851   :  { %1124 = vrot.lane.b32.xlu0 %v1122_v27, %s4262_s1 }
 0x855   :  { %1339 = vperm.xlu0 %4123, %v1336_v28  }
 0x859   :  { %1139 = vperm.xlu0 %4123, %v3433_v31  }
 0x8b4   :  { %v1318_v38 = vpop.permute.xlu1 %1317 }
 0x8b5   :  { %v4720_v39 = vadd.f32 %v1318_v38, %v1310_v37 }
 0x8b7   :  { %4171 = vtanh.f32 %v4720_v39 }
 0x8c1   :  { %v4172_v57 = vpop.eup %4171 }
 0x8c2   :  { %1323 = vrot.lane.b32.xlu1 %v4172_v57, %s4263_s14 }
 0x8c3   :  { %v1125_v42 = vpop.permute.xlu0 %1124 }
 0x8c4   :  { %v4731_v44 = vadd.f32 %v1125_v42, %v1117_v48 }
 0x8c5   :  { %v4735_v18 = vpop.permute.xlu1 %1332 }
 0x8c6   :  { %4173 = vtanh.f32 %v4731_v44  ;;  %1146 = vperm.xlu1 %4124, %v1143_v3  }
 0x8d0   :  { %v4174_v45 = vpop.eup %4173 }
 0x8d1   :  { %1130 = vrot.lane.b32.xlu0 %v4174_v45, %s4263_s14 }
 0x8d4   :  { %v4737_v24 = vpop.permute.xlu0 %1339 }
 0x8d5   :  { %v1342_v52 = vmul.f32 %v4737_v24, %v4651_v29 }
 0x8d8   :  { %v4749_v59 = vpop.permute.xlu0 %1139 }
 0x934   :  { %v1324_v46 = vpop.permute.xlu1 %1323 }
 0x935   :  { %v1326_v47 = vmul.f32 %v4168_v2, %v1324_v46 }
 0x937   :  { %v4742_v53 = vmul.f32 %v4735_v18, %v1326_v47 }
 0x939   :  { %v4745_v56 = vadd.f32 %v1342_v52, %v4742_v53 }
 0x93b   :  { %1614 = vrot.lane.b32.xlu1 %v4745_v56, %s4264_s15 }
 0x943   :  { %v1131_v10 = vpop.permute.xlu0 %1130 }
 0x944   :  { %v1133_v11 = vmul.f32 %v4170_v43, %v1131_v10  ;;  %v3302_v43 = vsel %vm3157_vm11, %v3288_v26, %v4660_v34  ;;  %v3442_v26 = vsel %vm1713_vm12, 1.0, %v4259_v16 }
 0x945   :  { %v4752_v22 = vpop.permute.xlu1 %1146 }
 0x946   :  { %v1142_v29 = vmul.f32 %v4749_v59, %v1133_v11  ;;  %v1149_v2 = vmul.f32 %v4752_v22, %v4665_v35  ;;  %v1152_v19 = vmul.f32 %v4752_v22, %v4727_v50 }
 0x948   :  { %v3140_v27 = vrot.slane %v1142_v29, 6  ;;  %v3290_v28 = vrot.slane %v1142_v29, 7  ;;  %v4758_v31 = vadd.f32 %v1149_v2, %v1142_v29 }
 0x94a   :  { %v4765_v0 = vsel %vm77_vm1, %v3158_v32, %v3140_v27  ;;  %v4768_v37 = vsel %vm77_vm1, %v3302_v43, %v3290_v28  ;;  %1421 = vrot.lane.b32.xlu0 %v4758_v31, %s4264_s15  ;;  %v1722_v43 = vsub.f32 1.0, %v3442_v26 }
 0x9ad   :  { %v1615_v35 = vpop.permute.xlu1 %1614 }
 0x9ae   :  { %3743 = vmatmul.mubr.msk.f32.vlgmr.msra.gmra.mrb[6].mxu1 %vm264_vm6, %v1615_v35  ;;  %v3439_v35 = vsel %vm1520_vm13, 1.0, %v4259_v16 }
 0x9af   :  { %3994 = vmatpush3.bf16.msra.mxu1 %v4411_v12  ;;  %3771 = vmatprep.mubr.msk.f32.mxu1 %vm4258_vm2, %v4259_v16 }
 0x9b0   :  { %3995 = vmatprep.subr.bf16.mxu1 %v4257_v8 }
 0x9b3   :  { %3997 = vmatpush3.bf16.msra.mxu1 %v4435_v20 }
 0x9b4   :  { %3998 = vmatprep.subr.bf16.mxu1 %v4257_v8 }
 0x9b6   :  { %3772 = vmatmul.mubr.msk.f32.vlgmr.msra.gmra.mrb[8].mxu1 %vm190_vm3, %v4694_v55 }
 0x9b7   :  { %4000 = vmatpush3.bf16.msra.mxu1 %v4468_v4  ;;  %3778 = vmatprep.mubr.msk.f32.mxu1 %vm4258_vm2, %v4259_v16 }
 0x9b8   :  { %4010 = vmatprep.subr.bf16.mxu1 %v4257_v8 }
 0x9bc   :  { %v1422_v13 = vpop.permute.xlu0 %1421 }
 0x9bd   :  { %3725 = vmatmul.mubr.msk.f32.vlgmr.msra.gmra.mrb[6].mxu0 %vm264_vm6, %v1422_v13  ;;  %v1345_v13 = vmul.f32 %v4737_v24, %v4717_v36 }
 0x9be   :  { %3985 = vmatpush3.bf16.msra.mxu0 %v4426_v17  ;;  %3753 = vmatprep.mubr.msk.f32.mxu0 %vm4258_vm2, %v4259_v16 }
 0x9bf   :  { %3986 = vmatprep.subr.bf16.mxu0 %v4257_v8 }
 0x9c2   :  { %3988 = vmatpush3.bf16.msra.mxu0 %v4439_v21 }
 0x9c3   :  { %3989 = vmatprep.subr.bf16.mxu0 %v4257_v8 }
 0x9c5   :  { %3754 = vmatmul.mubr.msk.f32.vlgmr.msra.gmra.mrb[8].mxu0 %vm190_vm3, %v4677_v15 }
 0x9c6   :  { %3991 = vmatpush3.bf16.msra.mxu0 %v4470_v5  ;;  %3760 = vmatprep.mubr.msk.f32.mxu0 %vm4258_vm2, %v4259_v16 }
 0x9c7   :  { %4001 = vmatprep.subr.bf16.mxu0 %v4257_v8 }
 0xa81   :  { %v1684_v34 = vpop.f32.mrb[6].mxu1 }
 0xa82   :  { %v4074_v55 = vadd.f32 %v4534_v9, %v1684_v34  ;;  %v3744_v38 = vpop.f32.mrb[7].mxu1  ;;  %v1344_v34 = vmul.f32 %v4735_v18, %v4720_v39 }
 0xa84   :  { %4175 = vtanh.f32 %v4074_v55  ;;  %v1689_v48 = vsub.f32 0.0, %v4074_v55  ;;  %v4812_v55 = vadd.f32 %v1345_v13, %v1344_v34 }
 0xa86   :  { %v1690_v42 = vmul.f32 1.442695, %v1689_v48 }
 0xa8e   :  { %v4176_v40 = vpop.eup %4175 }
 0xa8f   :  { %1698 = vrot.lane.b32.xlu1 %v4176_v40, %s4261_s13 }
 0xa90   :  { %v1491_v41 = vpop.f32.mrb[6].mxu0 }
 0xa91   :  { %v4073_v57 = vadd.f32 %v4529_v61, %v1491_v41  ;;  %v3726_v3 = vpop.f32.mrb[7].mxu0 }
 0xa93   :  { %4177 = vtanh.f32 %v4073_v57  ;;  %v1496_v45 = vsub.f32 0.0, %v4073_v57  ;;  %v1151_v57 = vmul.f32 %v4749_v59, %v4731_v44 }
 0xa94   :  { %4179 = vpow2.f32 %v1690_v42 }
 0xa95   :  { %v1497_v47 = vmul.f32 1.442695, %v1496_v45  ;;  %v4822_v3 = vadd.f32 %v1152_v19, %v1151_v57 }
 0xa97   :  { %4181 = vpow2.f32 %v1497_v47 }
 0xa9d   :  { %v4178_v15 = vpop.eup %4177 }
 0xa9e   :  { %1505 = vrot.lane.b32.xlu0 %v4178_v15, %s4261_s13  ;;  %v4180_v46 = vpop.eup %4179  ;;  %v1529_v15 = vsub.f32 1.0, %v3439_v35 }
 0xa9f   :  { %v1692_v52 = vadd.f32 1.0, %v4180_v46 }
 0xaa1   :  { %4183 = vrcp.f32 %v1692_v52  ;;  %v4182_v10 = vpop.eup %4181 }
 0xaa2   :  { %v1499_v29 = vadd.f32 1.0, %v4182_v10 }
 0xaa4   :  { %4185 = vrcp.f32 %v1499_v29 }
 0xaab   :  { %v4184_v11 = vpop.eup %4183 }
 0xaac   :  { %v1696_v38 = vmul.f32 %v4184_v11, %v4812_v55 }
 0xaae   :  { %v4186_v27 = vpop.eup %4185 }
 0xaaf   :  { %v1503_v39 = vmul.f32 %v4186_v27, %v4822_v3 }
 0xb01   :  { %v1699_v14 = vpop.permute.xlu1 %1698 }
 0xb02   :  { %v1701_v2 = vmul.f32 %v4184_v11, %v1699_v14 }
 0xb04   :  { %1703 = vrot.lane.b32.xlu1 %v1701_v2, %s4262_s1 }
 0xb08   :  { %1718 = vperm.xlu1 %4124, %v3442_v26  }
 0xb10   :  { %v1506_v28 = vpop.permute.xlu0 %1505 }
 0xb11   :  { %v1508_v32 = vmul.f32 %v4186_v27, %v1506_v28 }
 0xb13   :  { %1510 = vrot.lane.b32.xlu0 %v1508_v32, %s4262_s1 }
 0xb17   :  { %1725 = vperm.xlu0 %4123, %v1722_v43  }
 0xb1b   :  { %1525 = vperm.xlu0 %4123, %v3439_v35  }
 0xb76   :  { %v1704_v40 = vpop.permute.xlu1 %1703 }
 0xb77   :  { %v4815_v41 = vadd.f32 %v1704_v40, %v1696_v38 }
 0xb79   :  { %4187 = vtanh.f32 %v4815_v41 }
 0xb83   :  { %v4188_v36 = vpop.eup %4187 }
 0xb84   :  { %1709 = vrot.lane.b32.xlu1 %v4188_v36, %s4263_s14 }
 0xb85   :  { %v1511_v48 = vpop.permute.xlu0 %1510 }
 0xb86   :  { %v4826_v42 = vadd.f32 %v1511_v48, %v1503_v39 }
 0xb87   :  { %v4830_v50 = vpop.permute.xlu1 %1718 }
 0xb88   :  { %4189 = vtanh.f32 %v4826_v42  ;;  %1532 = vperm.xlu1 %4124, %v1529_v15  }
 0xb92   :  { %v4190_v45 = vpop.eup %4189 }
 0xb93   :  { %1516 = vrot.lane.b32.xlu0 %v4190_v45, %s4263_s14 }
 0xb96   :  { %v4832_v44 = vpop.permute.xlu0 %1725 }
 0xb97   :  { %v1728_v52 = vmul.f32 %v4832_v44, %v4745_v56 }
 0xb9a   :  { %v4844_v29 = vpop.permute.xlu0 %1525 }
 0xbf6   :  { %v1710_v46 = vpop.permute.xlu1 %1709 }
 0xbf7   :  { %v1712_v47 = vmul.f32 %v4184_v11, %v1710_v46 }
 0xbf9   :  { %v4837_v10 = vmul.f32 %v4830_v50, %v1712_v47 }
 0xbfb   :  { %v4840_v14 = vadd.f32 %v1728_v52, %v4837_v10 }
 0xbfd   :  { %1980 = vrot.lane.b32.xlu1 %v4840_v14, %s4264_s15 }
 0xc05   :  { %v1517_v2 = vpop.permute.xlu0 %1516 }
 0xc06   :  { %v1519_v26 = vmul.f32 %v4186_v27, %v1517_v2 }
 0xc07   :  { %v4846_v28 = vpop.permute.xlu1 %1532 }
 0xc08   :  { %v1528_v11 = vmul.f32 %v4844_v29, %v1519_v26  ;;  %v1535_v56 = vmul.f32 %v4846_v28, %v4758_v31 }
 0xc0a   :  { %v3143_v32 = vrot.slane %v1528_v11, 5  ;;  %v3292_v43 = vrot.slane %v1528_v11, 6  ;;  %v4851_v35 = vadd.f32 %v1535_v56, %v1528_v11 }
 0xc0c   :  { %v4855_v13 = vsel %vm3160_vm14, %v4768_v37, %v3292_v43  ;;  %1804 = vrot.lane.b32.xlu0 %v4851_v35, %s4264_s15  ;;  %v4861_v27 = vsel %vm3160_vm14, %v4765_v0, %v3143_v32 }
 0xc6f   :  { %v1981_v34 = vpop.permute.xlu1 %1980 }
 0xc70   :  { %3779 = vmatmul.mubr.msk.f32.vlgmr.msra.gmra.mrb[8].mxu1 %vm264_vm6, %v1981_v34  ;;  %v1731_v34 = vmul.f32 %v4832_v44, %v4812_v55 }
 0xc71   :  { %4012 = vmatpush3.bf16.msra.mxu1 %v4411_v12  ;;  %3807 = vmatprep.mubr.msk.f32.mxu1 %vm4258_vm2, %v4259_v16 }
 0xc72   :  { %4013 = vmatprep.subr.bf16.mxu1 %v4257_v8 }
 0xc75   :  { %4015 = vmatpush3.bf16.msra.mxu1 %v4435_v20 }
 0xc76   :  { %4016 = vmatprep.subr.bf16.mxu1 %v4257_v8 }
 0xc78   :  { %3808 = vmatmul.mubr.msk.f32.vlgmr.msra.gmra.mrb[10].mxu1 %vm190_vm3, %v4607_v54 }
 0xc79   :  { %4018 = vmatpush3.bf16.msra.mxu1 %v4468_v4  ;;  %3814 = vmatprep.mubr.msk.f32.mxu1 %vm4258_vm2, %v4259_v16 }
 0xc7a   :  { %4028 = vmatprep.subr.bf16.mxu1 %v4257_v8 }
 0xc7e   :  { %v1805_v31 = vpop.permute.xlu0 %1804 }
 0xc7f   :  { %3761 = vmatmul.mubr.msk.f32.vlgmr.msra.gmra.mrb[8].mxu0 %vm264_vm6, %v1805_v31  ;;  %v1730_v31 = vmul.f32 %v4830_v50, %v4815_v41 }
 0xc80   :  { %4003 = vmatpush3.bf16.msra.mxu0 %v4426_v17  ;;  %3789 = vmatprep.mubr.msk.f32.mxu0 %vm4258_vm2, %v4259_v16 }
 0xc81   :  { %4004 = vmatprep.subr.bf16.mxu0 %v4257_v8 }
 0xc84   :  { %4006 = vmatpush3.bf16.msra.mxu0 %v4439_v21 }
 0xc85   :  { %4007 = vmatprep.subr.bf16.mxu0 %v4257_v8 }
 0xc87   :  { %3790 = vmatmul.mubr.msk.f32.vlgmr.msra.gmra.mrb[10].mxu0 %vm190_vm3, %v4590_v23 }
 0xc88   :  { %4009 = vmatpush3.bf16.msra.mxu0 %v4470_v5  ;;  %3796 = vmatprep.mubr.msk.f32.mxu0 %vm4258_vm2, %v4259_v16 }
 0xc89   :  { %4019 = vmatprep.subr.bf16.mxu0 %v4257_v8 }
 0xd43   :  { %v2050_v54 = vpop.f32.mrb[8].mxu1 }
 0xd44   :  { %v4076_v0 = vadd.f32 %v4534_v9, %v2050_v54  ;;  %v3780_v37 = vpop.f32.mrb[9].mxu1  ;;  %v4899_v54 = vadd.f32 %v1731_v34, %v1730_v31 }
 0xd46   :  { %4191 = vtanh.f32 %v4076_v0  ;;  %v2055_v36 = vsub.f32 0.0, %v4076_v0 }
 0xd48   :  { %v2056_v15 = vmul.f32 1.442695, %v2055_v36 }
 0xd50   :  { %v4192_v38 = vpop.eup %4191 }
 0xd51   :  { %2064 = vrot.lane.b32.xlu1 %v4192_v38, %s4261_s13 }
 0xd52   :  { %v1874_v40 = vpop.f32.mrb[8].mxu0 }
 0xd53   :  { %v4075_v19 = vadd.f32 %v4529_v61, %v1874_v40  ;;  %v3762_v57 = vpop.f32.mrb[9].mxu0  ;;  %v1538_v40 = vmul.f32 %v4846_v28, %v4822_v3 }
 0xd55   :  { %4193 = vtanh.f32 %v4075_v19  ;;  %v1879_v39 = vsub.f32 0.0, %v4075_v19  ;;  %v1537_v19 = vmul.f32 %v4844_v29, %v4826_v42  ;;  %v2080_v42 = vmul.f32 %v4840_v14, %v4846_v28 }
 0xd56   :  { %4195 = vpow2.f32 %v2056_v15 }
 0xd57   :  { %v1880_v45 = vmul.f32 1.442695, %v1879_v39  ;;  %v4909_v57 = vadd.f32 %v1538_v40, %v1537_v19 }
 0xd59   :  { %4197 = vpow2.f32 %v1880_v45 }
 0xd5f   :  { %v4194_v23 = vpop.eup %4193 }
 0xd60   :  { %1888 = vrot.lane.b32.xlu0 %v4194_v23, %s4261_s13  ;;  %v4196_v48 = vpop.eup %4195 }
 0xd61   :  { %v2058_v46 = vadd.f32 1.0, %v4196_v48 }
 0xd63   :  { %4199 = vrcp.f32 %v2058_v46  ;;  %v4198_v47 = vpop.eup %4197 }
 0xd64   :  { %v1882_v26 = vadd.f32 1.0, %v4198_v47 }
 0xd66   :  { %4201 = vrcp.f32 %v1882_v26  ;;  %v1904_v26 = vmul.f32 %v4832_v44, %v4851_v35 }
 0xd6d   :  { %v4200_v52 = vpop.eup %4199 }
 0xd6e   :  { %v2062_v0 = vmul.f32 %v4200_v52, %v4899_v54 }
 0xd70   :  { %v4202_v56 = vpop.eup %4201 }
 0xd71   :  { %v1886_v41 = vmul.f32 %v4202_v56, %v4909_v57 }
 0xdc3   :  { %v2065_v2 = vpop.permute.xlu1 %2064 }
 0xdc4   :  { %v2067_v11 = vmul.f32 %v4200_v52, %v2065_v2 }
 0xdc6   :  { %2069 = vrot.lane.b32.xlu1 %v2067_v11, %s4262_s1 }
 0xdd2   :  { %v1889_v32 = vpop.permute.xlu0 %1888 }
 0xdd3   :  { %v1891_v43 = vmul.f32 %v4202_v56, %v1889_v32 }
 0xdd5   :  { %1893 = vrot.lane.b32.xlu0 %v1891_v43, %s4262_s1 }
 0xe38   :  { %v2070_v37 = vpop.permute.xlu1 %2069 }
 0xe39   :  { %v4902_v38 = vadd.f32 %v2070_v37, %v2062_v0 }
 0xe3b   :  { %4203 = vtanh.f32 %v4902_v38 }
 0xe45   :  { %v4204_v55 = vpop.eup %4203 }
 0xe46   :  { %2075 = vrot.lane.b32.xlu1 %v4204_v55, %s4263_s14 }
 0xe47   :  { %v1894_v23 = vpop.permute.xlu0 %1893 }
 0xe48   :  { %v4913_v36 = vadd.f32 %v1894_v23, %v1886_v41 }
 0xe4a   :  { %4205 = vtanh.f32 %v4913_v36 }
 0xe54   :  { %v4206_v15 = vpop.eup %4205 }
 0xe55   :  { %1899 = vrot.lane.b32.xlu0 %v4206_v15, %s4263_s14 }
 0xeb8   :  { %v2076_v39 = vpop.permute.xlu1 %2075 }
 0xeb9   :  { %v2078_v3 = vmul.f32 %v4200_v52, %v2076_v39 }
 0xebb   :  { %v4920_v48 = vmul.f32 %v2078_v3, %v4844_v29 }
 0xebd   :  { %v4923_v45 = vadd.f32 %v2080_v42, %v4920_v48 }
 0xebf   :  { %2332 = vrot.lane.b32.xlu1 %v4923_v45, %s4264_s15 }
 0xec7   :  { %v1900_v46 = vpop.permute.xlu0 %1899 }
 0xec8   :  { %v1902_v47 = vmul.f32 %v4202_v56, %v1900_v46 }
 0xeca   :  { %v1903_v2 = vmul.f32 %v1902_v47, %v4830_v50 }
 0xecc   :  { %v3146_v52 = vrot.slane %v1903_v2, 4  ;;  %v3294_v11 = vrot.slane %v1903_v2, 5  ;;  %v4930_v14 = vadd.f32 %v1904_v26, %v1903_v2  ;;  %v2082_v26 = vmul.f32 %v4902_v38, %v4844_v29 }
 0xece   :  { %2156 = vrot.lane.b32.xlu0 %v4930_v14, %s4264_s15  ;;  %v4936_v32 = vsel %vm3162_vm15, %v4861_v27, %v3146_v52  ;;  %v4940_v56 = vsel %vm3162_vm15, %v4855_v13, %v3294_v11  ;;  %v2083_v52 = vmul.f32 %v4899_v54, %v4846_v28 }
 0xed0   :  { %v4978_v11 = vadd.f32 %v2083_v52, %v2082_v26 }
 0xf31   :  { %v2333_v43 = vpop.permute.xlu1 %2332 }
 0xf32   :  { %3815 = vmatmul.mubr.msk.f32.vlgmr.msra.gmra.mrb[10].mxu1 %vm264_vm6, %v2333_v43 }
 0xf33   :  { %4030 = vmatpush3.bf16.msra.mxu1 %v4411_v12  ;;  %3843 = vmatprep.mubr.msk.f32.mxu1 %vm4258_vm2, %v4259_v16 }
 0xf34   :  { %4031 = vmatprep.subr.bf16.mxu1 %v4257_v8 }
 0xf37   :  { %4033 = vmatpush3.bf16.msra.mxu1 %v4435_v20 }
 0xf38   :  { %4034 = vmatprep.subr.bf16.mxu1 %v4257_v8 }
 0xf3a   :  { %3844 = vmatmul.mubr.msk.f32.vlgmr.msra.gmra.mrb[12].mxu1 %vm190_vm3, %v4506_v49 }
 0xf3b   :  { %4036 = vmatpush3.bf16.msra.mxu1 %v4468_v4  ;;  %3850 = vmatprep.mubr.msk.f32.mxu1 %vm4258_vm2, %v4259_v16 }
 0xf3c   :  { %4046 = vmatprep.subr.bf16.mxu1 %v4257_v8 }
 0xf40   :  { %v2157_v35 = vpop.permute.xlu0 %2156 }
 0xf41   :  { %3797 = vmatmul.mubr.msk.f32.vlgmr.msra.gmra.mrb[10].mxu0 %vm264_vm6, %v2157_v35 }
 0xf42   :  { %4021 = vmatpush3.bf16.msra.mxu0 %v4426_v17  ;;  %3825 = vmatprep.mubr.msk.f32.mxu0 %vm4258_vm2, %v4259_v16 }
 0xf43   :  { %4022 = vmatprep.subr.bf16.mxu0 %v4257_v8 }
 0xf46   :  { %4024 = vmatpush3.bf16.msra.mxu0 %v4439_v21 }
 0xf47   :  { %4025 = vmatprep.subr.bf16.mxu0 %v4257_v8 }
 0xf49   :  { %3826 = vmatmul.mubr.msk.f32.vlgmr.msra.gmra.mrb[12].mxu0 %vm190_vm3, %v4510_v60 }
 0xf4a   :  { %4027 = vmatpush3.bf16.msra.mxu0 %v4470_v5  ;;  %3832 = vmatprep.mubr.msk.f32.mxu0 %vm4258_vm2, %v4259_v16 }
 0xf4b   :  { %4037 = vmatprep.subr.bf16.mxu0 %v4257_v8 }
0x1005   :  { %v2402_v49 = vpop.f32.mrb[10].mxu1 }
0x1006   :  { %v4078_v13 = vadd.f32 %v4534_v9, %v2402_v49  ;;  %v3816_v27 = vpop.f32.mrb[11].mxu1 }
0x1007   :  { %v1907_v27 = vmul.f32 %v4832_v44, %v4909_v57  ;;  %v2432_v44 = vmul.f32 %v4923_v45, %v4752_v22 }
0x1008   :  { %4207 = vtanh.f32 %v4078_v13  ;;  %v2407_v40 = vsub.f32 0.0, %v4078_v13  ;;  %v1906_v13 = vmul.f32 %v4913_v36, %v4830_v50 }
0x100a   :  { %v2408_v19 = vmul.f32 1.442695, %v2407_v40 }
0x1012   :  { %v4208_v34 = vpop.eup %4207 }
0x1013   :  { %2416 = vrot.lane.b32.xlu1 %v4208_v34, %s4261_s13  ;;  %v4988_v34 = vadd.f32 %v1907_v27, %v1906_v13 }
0x1014   :  { %v2226_v31 = vpop.f32.mrb[10].mxu0 }
0x1015   :  { %v4077_v0 = vadd.f32 %v4529_v61, %v2226_v31  ;;  %v3798_v37 = vpop.f32.mrb[11].mxu0 }
0x1017   :  { %4209 = vtanh.f32 %v4077_v0  ;;  %v2231_v55 = vsub.f32 0.0, %v4077_v0 }
0x1018   :  { %4211 = vpow2.f32 %v2408_v19  ;;  %v2256_v19 = vmul.f32 %v4930_v14, %v4737_v24 }
0x1019   :  { %v2232_v23 = vmul.f32 1.442695, %v2231_v55 }
0x101b   :  { %4213 = vpow2.f32 %v2232_v23 }
0x1021   :  { %v4210_v60 = vpop.eup %4209 }
0x1022   :  { %2240 = vrot.lane.b32.xlu0 %v4210_v60, %s4261_s13  ;;  %v4212_v41 = vpop.eup %4211 }
0x1023   :  { %v2410_v9 = vadd.f32 1.0, %v4212_v41 }
0x1025   :  { %4215 = vrcp.f32 %v2410_v9  ;;  %v4214_v15 = vpop.eup %4213 }
0x1026   :  { %v2234_v42 = vadd.f32 1.0, %v4214_v15 }
0x1028   :  { %4217 = vrcp.f32 %v2234_v42 }
0x102f   :  { %v4216_v39 = vpop.eup %4215 }
0x1030   :  { %v2414_v43 = vmul.f32 %v4216_v39, %v4978_v11 }
0x1032   :  { %v4218_v61 = vpop.eup %4217 }
0x1033   :  { %v2238_v28 = vmul.f32 %v4218_v61, %v4988_v34 }
0x1085   :  { %v2417_v3 = vpop.permute.xlu1 %2416 }
0x1086   :  { %v2419_v46 = vmul.f32 %v4216_v39, %v2417_v3 }
0x1088   :  { %2421 = vrot.lane.b32.xlu1 %v2419_v46, %s4262_s1 }
0x1094   :  { %v2241_v47 = vpop.permute.xlu0 %2240 }
0x1095   :  { %v2243_v2 = vmul.f32 %v4218_v61, %v2241_v47 }
0x1097   :  { %2245 = vrot.lane.b32.xlu0 %v2243_v2, %s4262_s1 }
0x10fa   :  { %v2422_v35 = vpop.permute.xlu1 %2421 }
0x10fb   :  { %v4981_v49 = vadd.f32 %v2422_v35, %v2414_v43 }
0x10fd   :  { %4219 = vtanh.f32 %v4981_v49 }
0x1107   :  { %v4220_v29 = vpop.eup %4219 }
0x1108   :  { %2427 = vrot.lane.b32.xlu1 %v4220_v29, %s4263_s14 }
0x1109   :  { %v2246_v54 = vpop.permute.xlu0 %2245 }
0x110a   :  { %v4992_v38 = vadd.f32 %v2246_v54, %v2238_v28  ;;  %v2434_v28 = vmul.f32 %v4981_v49, %v4749_v59  ;;  %v2435_v54 = vmul.f32 %v4978_v11, %v4752_v22 }
0x110c   :  { %4221 = vtanh.f32 %v4992_v38 }
0x1116   :  { %v4222_v31 = vpop.eup %4221 }
0x1117   :  { %2251 = vrot.lane.b32.xlu0 %v4222_v31, %s4263_s14  ;;  %v5067_v31 = vadd.f32 %v2435_v54, %v2434_v28 }
0x117a   :  { %v2428_v0 = vpop.permute.xlu1 %2427 }
0x117b   :  { %v2430_v50 = vmul.f32 %v4216_v39, %v2428_v0 }
0x117d   :  { %v4997_v36 = vmul.f32 %v2430_v50, %v4749_v59 }
0x117f   :  { %v5002_v57 = vadd.f32 %v2432_v44, %v4997_v36 }
0x1181   :  { %2684 = vrot.lane.b32.xlu1 %v5002_v57, %s4264_s15 }
0x1189   :  { %v2252_v37 = vpop.permute.xlu0 %2251 }
0x118a   :  { %v2254_v60 = vmul.f32 %v4218_v61, %v2252_v37  ;;  %v2258_v37 = vmul.f32 %v4992_v38, %v4735_v18 }
0x118c   :  { %v2255_v40 = vmul.f32 %v2254_v60, %v4735_v18  ;;  %v2259_v60 = vmul.f32 %v4988_v34, %v4737_v24  ;;  %v2784_v24 = vmul.f32 %v5002_v57, %v4657_v33 }
0x118e   :  { %v3149_v55 = vrot.slane %v2255_v40, 3  ;;  %v3296_v41 = vrot.slane %v2255_v40, 4  ;;  %v5009_v23 = vadd.f32 %v2256_v19, %v2255_v40  ;;  %v5077_v40 = vadd.f32 %v2259_v60, %v2258_v37 }
0x1190   :  { %2508 = vrot.lane.b32.xlu0 %v5009_v23, %s4264_s15  ;;  %v5015_v45 = vsel %vm3164_vm0, %v4936_v32, %v3149_v55  ;;  %v5019_v9 = vsel %vm3164_vm0, %v4940_v56, %v3296_v41 }
0x11f3   :  { %v2685_v15 = vpop.permute.xlu1 %2684 }
0x11f4   :  { %3851 = vmatmul.mubr.msk.f32.vlgmr.msra.gmra.mrb[12].mxu1 %vm264_vm6, %v2685_v15 }
0x11f5   :  { %4048 = vmatpush3.bf16.msra.mxu1 %v4411_v12  ;;  %3879 = vmatprep.mubr.msk.f32.mxu1 %vm4258_vm2, %v4259_v16 }
0x11f6   :  { %4049 = vmatprep.subr.bf16.mxu1 %v4257_v8 }
0x11f9   :  { %4051 = vmatpush3.bf16.msra.mxu1 %v4435_v20  ;;  %v5050_v20 = vld [vmem:[%s5204_s5] ss:$0 sm:$0xff] }
0x11fa   :  { %4052 = vmatprep.subr.bf16.mxu1 %v4257_v8 }
0x11fc   :  { %3880 = vmatmul.mubr.msk.f32.vlgmr.msra.gmra.mrb[14].mxu1 %vm190_vm3, %v4474_v6 }
0x11fd   :  { %4054 = vmatpush3.bf16.msra.mxu1 %v4468_v4  ;;  %3886 = vmatprep.mubr.msk.f32.mxu1 %vm4258_vm2, %v4259_v16 }
0x11fe   :  { %4061 = vmatprep.subr.bf16.mxu1 %v4257_v8 }
0x1202   :  { %v2509_v12 = vpop.permute.xlu0 %2508 }
0x1203   :  { %3833 = vmatmul.mubr.msk.f32.vlgmr.msra.gmra.mrb[12].mxu0 %vm264_vm6, %v2509_v12 }
0x1204   :  { %4039 = vmatpush3.bf16.msra.mxu0 %v4426_v17  ;;  %3861 = vmatprep.mubr.msk.f32.mxu0 %vm4258_vm2, %v4259_v16 }
0x1205   :  { %4040 = vmatprep.subr.bf16.mxu0 %v4257_v8 }
0x1208   :  { %4042 = vmatpush3.bf16.msra.mxu0 %v4439_v21 }
0x1209   :  { %4043 = vmatprep.subr.bf16.mxu0 %v4257_v8 }
0x120b   :  { %3862 = vmatmul.mubr.msk.f32.vlgmr.msra.gmra.mrb[14].mxu0 %vm190_vm3, %v4478_v7 }
0x120c   :  { %4045 = vmatpush3.bf16.msra.mxu0 %v4470_v5  ;;  %3868 = vmatprep.mubr.msk.f32.mxu0 %vm4258_vm2, %v4259_v16  ;;  %v5057_v5 = vld [vmem:[%s5203_s4] ss:$0 sm:$0xff] }
0x120d   :  { %4055 = vmatprep.subr.bf16.mxu0 %v4257_v8 }
0x12c7   :  { %v2754_v17 = vpop.f32.mrb[12].mxu1 }
0x12c8   :  { %v4080_v21 = vadd.f32 %v5050_v20, %v2754_v17  ;;  %v3852_v4 = vpop.f32.mrb[13].mxu1  ;;  %v2608_v17 = vmul.f32 %v5009_v23, %v4643_v25 }
0x12ca   :  { %4223 = vtanh.f32 %v4080_v21  ;;  %v2759_v39 = vsub.f32 0.0, %v4080_v21 }
0x12cc   :  { %v2760_v3 = vmul.f32 1.442695, %v2759_v39 }
0x12d4   :  { %v4224_v6 = vpop.eup %4223 }
0x12d5   :  { %2768 = vrot.lane.b32.xlu1 %v4224_v6, %s4261_s13 }
0x12d6   :  { %v2578_v7 = vpop.f32.mrb[12].mxu0 }
0x12d7   :  { %v4079_v14 = vadd.f32 %v5057_v5, %v2578_v7  ;;  %v3834_v32 = vpop.f32.mrb[13].mxu0 }
0x12d9   :  { %4225 = vtanh.f32 %v4079_v14  ;;  %v2583_v42 = vsub.f32 0.0, %v4079_v14 }
0x12da   :  { %4227 = vpow2.f32 %v2760_v3 }
0x12db   :  { %v2584_v61 = vmul.f32 1.442695, %v2583_v42 }
0x12dd   :  { %4229 = vpow2.f32 %v2584_v61 }
0x12e3   :  { %v4226_v56 = vpop.eup %4225 }
0x12e4   :  { %2592 = vrot.lane.b32.xlu0 %v4226_v56, %s4261_s13  ;;  %v4228_v46 = vpop.eup %4227 }
0x12e5   :  { %v2762_v47 = vadd.f32 1.0, %v4228_v46 }
0x12e7   :  { %4231 = vrcp.f32 %v2762_v47  ;;  %v4230_v2 = vpop.eup %4229 }
0x12e8   :  { %v2586_v43 = vadd.f32 1.0, %v4230_v2 }
0x12ea   :  { %4233 = vrcp.f32 %v2586_v43 }
0x12f1   :  { %v4232_v26 = vpop.eup %4231 }
0x12f2   :  { %v2766_v0 = vmul.f32 %v4232_v26, %v5067_v31 }
0x12f4   :  { %v4234_v13 = vpop.eup %4233 }
0x12f5   :  { %v2590_v22 = vmul.f32 %v4234_v13, %v5077_v40 }
0x1347   :  { %v2769_v52 = vpop.permute.xlu1 %2768 }
0x1348   :  { %v2771_v35 = vmul.f32 %v4232_v26, %v2769_v52 }
0x134a   :  { %2773 = vrot.lane.b32.xlu1 %v2771_v35, %s4262_s1 }
0x1356   :  { %v2593_v27 = vpop.permute.xlu0 %2592 }
0x1357   :  { %v2595_v29 = vmul.f32 %v4234_v13, %v2593_v27 }
0x1359   :  { %2597 = vrot.lane.b32.xlu0 %v2595_v29, %s4262_s1 }
0x13bc   :  { %v2774_v50 = vpop.permute.xlu1 %2773 }
0x13bd   :  { %v5070_v44 = vadd.f32 %v2774_v50, %v2766_v0  ;;  %v2787_v0 = vmul.f32 %v5067_v31, %v4657_v33 }
0x13bf   :  { %4235 = vtanh.f32 %v5070_v44  ;;  %v2786_v54 = vmul.f32 %v5070_v44, %v4655_v30 }
0x13c1   :  { %v2788_v50 = vadd.f32 %v2787_v0, %v2786_v54 }
0x13c9   :  { %v4236_v59 = vpop.eup %4235 }
0x13ca   :  { %2779 = vrot.lane.b32.xlu1 %v4236_v59, %s4263_s14 }
0x13cb   :  { %v2598_v11 = vpop.permute.xlu0 %2597 }
0x13cc   :  { %v5081_v49 = vadd.f32 %v2598_v11, %v2590_v22  ;;  %v2611_v11 = vmul.f32 %v5077_v40, %v4643_v25  ;;  %v3132_v25 = vld [vmem:[%s5206_s8 + $0x8] sm:$0xff]  ;;  %v3133_v40 = vld [vmem:[%s5206_s8 + $0x10] sm:$0xff] }
0x13ce   :  { %4237 = vtanh.f32 %v5081_v49  ;;  %v2610_v22 = vmul.f32 %v5081_v49, %v4641_v62 }
0x13d8   :  { %v4238_v19 = vpop.eup %4237 }
0x13d9   :  { %2603 = vrot.lane.b32.xlu0 %v4238_v19, %s4263_s14  ;;  %v2612_v19 = vadd.f32 %v2611_v11, %v2610_v22 }
0x143c   :  { %v2780_v55 = vpop.permute.xlu1 %2779 }
0x143d   :  { %v2782_v18 = vmul.f32 %v4232_v26, %v2780_v55 }
0x143f   :  { %v5086_v38 = vmul.f32 %v2782_v18, %v4655_v30 }
0x1441   :  { %v2785_v34 = vadd.f32 %v2784_v24, %v5086_v38  ;;  %v3171_v49 = vrot.slane %v5086_v38, 7 }
0x1443   :  { %3031 = vrot.lane.b32.xlu1 %v2785_v34, %s4264_s15 }
0x144b   :  { %v2604_v41 = vpop.permute.xlu0 %2603 }
0x144c   :  { %v2606_v15 = vmul.f32 %v4234_v13, %v2604_v41 }
0x144e   :  { %v2607_v12 = vmul.f32 %v2606_v15, %v4641_v62  ;;  %v3131_v62 = vld [vmem:[%s5206_s8] sm:$0xff]  ;;  %v3134_v15 = vld [vmem:[%s5206_s8 + $0x18] sm:$0xff] }
0x144f   :  { %v4056_v41 = vpack.c.bf16 %v3132_v25, %v3131_v62 }
0x1450   :  { %v3152_v21 = vrot.slane %v2607_v12, 2  ;;  %v3298_v4 = vrot.slane %v2607_v12, 3  ;;  %v2609_v6 = vadd.f32 %v2608_v17, %v2607_v12  ;;  %v3174_v12 = vrot.slane %v4997_v36, 6 }
0x1451   :  { %v3177_v17 = vrot.slane %v4920_v48, 5 }
0x1452   :  { %2860 = vrot.lane.b32.xlu0 %v2609_v6, %s4264_s15  ;;  %v5098_v57 = vsel %vm3166_vm4, %v5015_v45, %v3152_v21  ;;  %v5102_v7 = vsel %vm3166_vm4, %v5019_v9, %v3298_v4  ;;  %v4059_v6 = vpack.c.bf16 %v3134_v15, %v3133_v40 }
0x14b5   :  { %v3032_v14 = vpop.permute.xlu1 %3031 }
0x14b6   :  { %3887 = vmatmul.mubr.msk.f32.vlgmr.msra.gmra.mrb[14].mxu1 %vm264_vm6, %v3032_v14  ;;  %v3186_v14 = vrot.slane %v4648_v51, 2 }
0x14b7   :  { %3908 = vmatprep.mubr.msk.f32.mxu1 %vm4258_vm2, %v4259_v16  ;;  %4063 = vmatpush3.bf16.msra.mxu1 %v4056_v41 }
0x14b8   :  { %4064 = vmatprep.subr.bf16.mxu1 %v4257_v8 }
0x14bb   :  { %4066 = vmatpush3.bf16.msra.mxu1 %v4059_v6 }
0x14c4   :  { %v2861_v23 = vpop.permute.xlu0 %2860 }
0x14c5   :  { %3869 = vmatmul.mubr.msk.f32.vlgmr.msra.gmra.mrb[14].mxu0 %vm264_vm6, %v2861_v23  ;;  %v3180_v23 = vrot.slane %v4837_v10, 4 }
0x14c6   :  { %3897 = vmatprep.mubr.msk.f32.mxu0 %vm4258_vm2, %v4259_v16  ;;  %4057 = vmatpush3.bf16.msra.mxu0 %v4056_v41  ;;  %vm3168_vm2 = vcmask 1046528  }
0x14c7   :  { %4058 = vmatprep.subr.bf16.mxu0 %v4257_v8  ;;  %v3189_v8 = vrot.slane %v4561_v63, 1 }
0x14ca   :  { %4060 = vmatpush3.bf16.msra.mxu0 %v4059_v6 }
0x1589   :  { %v3101_v32 = vpop.f32.mrb[14].mxu1 }
0x158a   :  { %v4082_v45 = vadd.f32 %v5050_v20, %v3101_v32  ;;  %v3888_v56 = vpop.f32.mrb[15].mxu1 }
0x158b   :  { %v3314_v56 = vrot.slane %v4920_v48, 6 }
0x158c   :  { %4239 = vtanh.f32 %v4082_v45  ;;  %v3106_v61 = vsub.f32 0.0, %v4082_v45  ;;  %v3183_v45 = vrot.slane %v4742_v53, 3 }
0x158e   :  { %v3107_v47 = vmul.f32 1.442695, %v3106_v61 }
0x1596   :  { %v4240_v39 = vpop.eup %4239 }
0x1597   :  { %3115 = vrot.lane.b32.xlu1 %v4240_v39, %s4261_s13 }
0x1598   :  { %v2930_v9 = vpop.f32.mrb[14].mxu0 }
0x1599   :  { %v4081_v3 = vadd.f32 %v5057_v5, %v2930_v9  ;;  %v3870_v42 = vpop.f32.mrb[15].mxu0 }
0x159b   :  { %4241 = vtanh.f32 %v4081_v3  ;;  %v2935_v16 = vsub.f32 0.0, %v4081_v3  ;;  %v3316_v3 = vrot.slane %v4837_v10, 5 }
0x159c   :  { %4243 = vpow2.f32 %v3107_v47 }
0x159d   :  { %v2936_v26 = vmul.f32 1.442695, %v2935_v16 }
0x159f   :  { %4245 = vpow2.f32 %v2936_v26 }
0x15a5   :  { %v4242_v46 = vpop.eup %4241 }
0x15a6   :  { %2944 = vrot.lane.b32.xlu0 %v4242_v46, %s4261_s13  ;;  %v4244_v2 = vpop.eup %4243  ;;  %v3318_v46 = vrot.slane %v4742_v53, 4 }
0x15a7   :  { %v3109_v20 = vadd.f32 1.0, %v4244_v2  ;;  %v3322_v2 = vrot.slane %v4561_v63, 2 }
0x15a9   :  { %4247 = vrcp.f32 %v3109_v20  ;;  %v4246_v52 = vpop.eup %4245 }
0x15aa   :  { %v2938_v13 = vadd.f32 1.0, %v4246_v52 }
0x15ac   :  { %4249 = vrcp.f32 %v2938_v13 }
0x15b3   :  { %v4248_v43 = vpop.eup %4247 }
0x15b4   :  { %v3113_v37 = vmul.f32 %v4248_v43, %v2788_v50 }
0x15b6   :  { %v5115_v5 = vpop.eup %4249 }
0x15b7   :  { %v2942_v30 = vmul.f32 %v5115_v5, %v2612_v19 }
0x1609   :  { %v3116_v35 = vpop.permute.xlu1 %3115 }
0x160a   :  { %v3118_v27 = vmul.f32 %v4248_v43, %v3116_v35 }
0x160c   :  { %3120 = vrot.lane.b32.xlu1 %v3118_v27, %s4262_s1 }
0x1618   :  { %v2945_v29 = vpop.permute.xlu0 %2944 }
0x1619   :  { %v2947_v28 = vmul.f32 %v5115_v5, %v2945_v29 }
0x161b   :  { %2949 = vrot.lane.b32.xlu0 %v2947_v28, %s4262_s1 }
0x167e   :  { %v3121_v60 = vpop.permute.xlu1 %3120 }
0x167f   :  { %v3123_v59 = vadd.f32 %v3121_v60, %v3113_v37 }
0x1681   :  { %4251 = vtanh.f32 %v3123_v59 }
0x168b   :  { %v4252_v55 = vpop.eup %4251 }
0x168c   :  { %3126 = vrot.lane.b32.xlu1 %v4252_v55, %s4263_s14 }
0x168d   :  { %v2950_v44 = vpop.permute.xlu0 %2949 }
0x168e   :  { %v2952_v18 = vadd.f32 %v2950_v44, %v2942_v30 }
0x1690   :  { %4253 = vtanh.f32 %v2952_v18 }
0x169a   :  { %v4254_v33 = vpop.eup %4253 }
0x169b   :  { %2955 = vrot.lane.b32.xlu0 %v4254_v33, %s4263_s14 }
0x16fe   :  { %v3127_v31 = vpop.permute.xlu1 %3126 }
0x16ff   :  { %v3129_v24 = vmul.f32 %v4248_v43, %v3127_v31 }
0x1701   :  { %v3130_v34 = vmul.f32 %v3129_v24, %v4567_v1  ;;  %v3312_v1 = vrot.slane %v4997_v36, 7 }
0x1703   :  { %v3191_v21 = vsel %vm3157_vm11, %v3130_v34, %v3171_v49  ;;  %v3310_v4 = vrot.slane %v3130_v34, 1 }
0x1704   :  { %v3192_v32 = vsel %vm77_vm1, %v3191_v21, %v3174_v12 }
0x1705   :  { %v3324_v39 = vsel %vm3157_vm11, %v3310_v4, %v5086_v38  ;;  %v3193_v9 = vsel %vm3160_vm14, %v3192_v32, %v3177_v17  ;;  %v3320_v38 = vrot.slane %v4648_v51, 3 }
0x1706   :  { %v3325_v42 = vsel %vm77_vm1, %v3324_v39, %v3312_v1  ;;  %v3194_v36 = vsel %vm3162_vm15, %v3193_v9, %v3180_v23 }
0x1707   :  { %v3195_v61 = vsel %vm3164_vm0, %v3194_v36, %v3183_v45  ;;  %v3326_v48 = vsel %vm3160_vm14, %v3325_v42, %v3314_v56 }
0x1708   :  { %v3196_v47 = vsel %vm3166_vm4, %v3195_v61, %v3186_v14  ;;  %v3327_v10 = vsel %vm3162_vm15, %v3326_v48, %v3316_v3 }
0x1709   :  { %v3197_v16 = vsel %vm3168_vm2, %v3196_v47, %v3189_v8  ;;  %v3328_v53 = vsel %vm3164_vm0, %v3327_v10, %v3318_v46 }
0x170a   :  { %3203 = vrot.lane.b32.xlu0 %v3197_v16, %s4261_s13  ;;  %v3329_v26 = vsel %vm3166_vm4, %v3328_v53, %v3320_v38 }
0x170b   :  { %v3330_v20 = vsel %vm3168_vm2, %v3329_v26, %v3322_v2 }
0x170d   :  { %v2956_v52 = vpop.permute.xlu0 %2955 }
0x170e   :  { %v2958_v43 = vmul.f32 %v5115_v5, %v2956_v52  ;;  %3336 = vrot.lane.b32.xlu0 %v3330_v20, %s4261_s13 }
0x1710   :  { %v2959_v51 = vmul.f32 %v2958_v43, %v4556_v58 }
0x1712   :  { %v3155_v35 = vrot.slane %v2959_v51, 1  ;;  %v3300_v13 = vrot.slane %v2959_v51, 2 }
0x1714   :  { %v3169_v63 = vsel %vm3168_vm2, %v5098_v57, %v3155_v35  ;;  %v3308_v27 = vsel %vm3168_vm2, %v5102_v7, %v3300_v13  ;;  %v3459_v57 = vld [vmem:[%s5207_s9] ss:$0 sm:$0xff] }
0x1715   :  { %3199 = vrot.lane.b32.xlu1 %v3169_v63, %s4264_s15 }
0x1719   :  { %3332 = vrot.lane.b32.xlu1 %v3308_v27, %s4264_s15 }
0x177c   :  { %v3204_v29 = vpop.permute.xlu0 %3203 }
0x1780   :  { %v3337_v54 = vpop.permute.xlu0 %3336 }
0x1787   :  { %v3200_v28 = vpop.permute.xlu1 %3199 }
0x1788   :  { %v3206_v5 = vsel %vm264_vm6, %v3200_v28, %v3204_v29 }
0x1789   :  { %3898 = vmatmul.mubr.msk.f32.vlgmr.msra.gmra.mrb[16].mxu0 %vm190_vm3, %v3206_v5 }
0x178b   :  { %v3333_v58 = vpop.permute.xlu1 %3332 }
0x178c   :  { %v3339_v0 = vsel %vm264_vm6, %v3333_v58, %v3337_v54 }
0x178d   :  { %3909 = vmatmul.mubr.msk.f32.vlgmr.msra.gmra.mrb[16].mxu1 %vm190_vm3, %v3339_v0 }
0x185c   :  { %v3282_v50 = vpop.f32.mrb[16].mxu0 }
0x185d   :  { %v3283_v7 = vadd.f32 %v3459_v57, %v3282_v50  ;;  %v3899_v37 = vpop.f32.mrb[17].mxu0 }
0x185f   :  { %3286 = vst.msk [vmem:[%s5208_s10] sm:$0xff] %vm190_vm3, %v3283_v7 }
0x1860   :  { %v3409_v60 = vpop.f32.mrb[16].mxu1 }
0x1861   :  { %v3410_v59 = vadd.f32 %v3459_v57, %v3409_v60  ;;  %v3910_v22 = vpop.f32.mrb[17].mxu1 }
0x1863   :  { %3462 = vst.msk [vmem:[%s5208_s10 + $0x8] sm:$0xff] %vm190_vm3, %v3410_v59 }

</bundles_post_ra>
